<compile_context>
chip_gen: v6e
topology: v6e:2x2x1
jax: 0.10.0
libtpu: 0.0.40
codegen_flags: <defaults>
</compile_context>

<pallas_src>
import functools

import jax
import jax.numpy as jnp
from jax.experimental import pallas as pl
from jax.experimental.pallas import tpu as pltpu

BN_EPS = 1e-5
KSIZE = 5
PAD = 2


def _round_up(x, m):
    return (x + m - 1) // m * m


def _vmem_spec():
    return pl.BlockSpec(memory_space=pltpu.MemorySpace.VMEM)


# ----------------------------- Pallas kernels ------------------------------ #

def conv_block_kernel(a_ref, w_ref, b_ref, g_ref, be_ref, o_ref,
                      s_ref, ss_ref, sc_ref, sh_ref, *, tq, q_true):
    """Fused Conv2d(k=5,pad=2) + bias + ReLU + BatchNorm2d(train) + MaxPool2d(2).

    Grid = (pass, q_tile), both "arbitrary" (stats carried in scratch).

    a_ref : (F, 4*tq) bf16  -- one q-tile of the im2col slabs, lane chunks
                               ordered [pp0 | pp1 | pp2 | pp3]
    w_ref : (Cout, F) bf16  -- feature order (ci, kh, kw)
    b/g/be_ref : (Cout, 1) f32
    o_ref : (Cout, tq)      -- pooled, normalized activation tile
    s/ss/sc/sh_ref : (Cout, 1) f32 VMEM scratch (sum, sumsq, scale, shift)
    """
    p = pl.program_id(0)   # 0 = stats pass, 1 = normalize+pool pass
    t = pl.program_id(1)   # q tile

    @pl.when(jnp.logical_and(p == 0, t == 0))
    def _():
        s_ref[...] = jnp.zeros_like(s_ref)
        ss_ref[...] = jnp.zeros_like(ss_ref)

    # Single MXU dot covering all 4 pool positions of this tile (f32 accum).
    z = jnp.dot(w_ref[...], a_ref[...], preferred_element_type=jnp.float32)
    z = jnp.maximum(z + b_ref[...], 0.0)                    # bias + ReLU (f32)

    @pl.when(p == 0)
    def _():
        # Pad columns hold ReLU(bias); mask them out of the batch statistics.
        j = jax.lax.broadcasted_iota(jnp.int32, (1, z.shape[1]), 1)
        valid = ((t * tq + (j % tq)) < q_true).astype(jnp.float32)
        s_ref[...] += jnp.sum(z * valid, axis=1, keepdims=True)
        ss_ref[...] += jnp.sum((z * z) * valid, axis=1, keepdims=True)

    @pl.when(jnp.logical_and(p == 1, t == 0))
    def _():
        # Finalize training-mode batch stats (biased variance), once.
        inv_cnt = 1.0 / (4 * q_true)          # = 1 / (N * H * W) conv positions
        mu = s_ref[...] * inv_cnt
        var = ss_ref[...] * inv_cnt - mu * mu
        scale = g_ref[...] * jax.lax.rsqrt(var + BN_EPS)
        sc_ref[...] = scale
        sh_ref[...] = be_ref[...] - mu * scale

    @pl.when(p == 1)
    def _():
        # BN is per-channel affine => maxpool-after-BN == affine(zmax) if
        # scale > 0 else affine(zmin).  No live per-position slabs needed.
        z0 = z[:, 0 * tq:1 * tq]
        z1 = z[:, 1 * tq:2 * tq]
        z2 = z[:, 2 * tq:3 * tq]
        z3 = z[:, 3 * tq:4 * tq]
        zmax = jnp.maximum(jnp.maximum(z0, z1), jnp.maximum(z2, z3))
        zmin = jnp.minimum(jnp.minimum(z0, z1), jnp.minimum(z2, z3))
        scale = sc_ref[...]
        zsel = jnp.where(scale > 0.0, zmax, zmin)
        o_ref[...] = (zsel * scale + sh_ref[...]).astype(o_ref.dtype)


def linear_kernel(w_ref, x_ref, b_ref, o_ref):
    o_ref[...] = (
        jnp.dot(w_ref[...], x_ref[...], preferred_element_type=jnp.float32)
        + b_ref[...]
    )


# ------------------------------- JAX glue ---------------------------------- #

def _pool_tap_slabs(x_chwn, tq):
    """x_chwn: (Cin, H, W, N) -> (F, nt*4*tq) im2col slabs, F = 25*Cin.

    Column  t*4*tq + pp*tq + j  holds the (ci, kh, kw) tap values for pooled
    output position q = t*tq + j (columns ordered (ho, wo, n)) and pool offset
    pp = (ph, pw):  A[.., f, ..] = x_pad[ci, 2*ho+ph+kh, 2*wo+pw+kw, n].
    """
    c, h, w, n = x_chwn.shape
    ho, wo = h // 2, w // 2
    q = ho * wo * n
    qpad = _round_up(q, tq)
    nt = qpad // tq
    f = c * KSIZE * KSIZE
    xp = jnp.pad(x_chwn, ((0, 0), (PAD, PAD), (PAD, PAD), (0, 0)))
    slabs = []
    for ph in range(2):
        for pw in range(2):
            taps = [xp[:, ph + kh: ph + kh + h: 2, pw + kw: pw + kw + w: 2, :]
                    for kh in range(KSIZE) for kw in range(KSIZE)]  # (C,Ho,Wo,N)
            a = jnp.stack(taps, axis=1).reshape(f, q)               # rows (ci,kh,kw)
            slabs.append(a)
    s = jnp.stack(slabs, axis=0)                                    # (4, F, Q)
    s = jnp.pad(s, ((0, 0), (0, 0), (0, qpad - q)))                 # pad lanes -> 0
    # Tile-major interleave: (4, F, nt, tq) -> (F, nt, 4, tq) -> (F, nt*4*tq).
    return s.reshape(4, f, nt, tq).transpose(1, 2, 0, 3).reshape(f, nt * 4 * tq)


def conv_block(x_chwn, w_torch, b, gamma, beta, out_dtype):
    """Conv2d(k=5,pad=2) -> ReLU -> BatchNorm2d(train) -> MaxPool2d(2).

    Input/output layout (C, H, W, N); one fused pallas_call, grid (pass, q_tile).
    """
    cin, h, w_sp, n = x_chwn.shape
    cout = w_torch.shape[0]
    ho, wo = h // 2, w_sp // 2
    q = ho * wo * n
    f = cin * KSIZE * KSIZE
    tq = min(512, _round_up(q, 128))       # 128-aligned lane tiles (lane-dense stores)
    qpad = _round_up(q, tq)
    nt = qpad // tq

    # bf16 MXU operands; the im2col glue intermediates are also half-width.
    # TODO(synk): build the taps inside the kernel from a VMEM-resident padded
    # activation (strided pl.ds slices) to remove the ~25x im2col HBM blowup.
    a = _pool_tap_slabs(x_chwn.astype(jnp.bfloat16), tq)            # (F, nt*4*tq)
    w_mat = w_torch.reshape(cout, f).astype(jnp.bfloat16)           # (Cout, F)

    kernel = functools.partial(conv_block_kernel, tq=tq, q_true=q)
    cost = pl.CostEstimate(
        flops=2 * (2 * cout * f * 4 * qpad) + 10 * cout * 4 * qpad,
        transcendentals=cout,
        bytes_accessed=2 * (f * 4 * qpad + cout * f) * 2 + cout * qpad * 4,
    )
    out = pl.pallas_call(
        kernel,
        out_shape=jax.ShapeDtypeStruct((cout, qpad), out_dtype),
        grid_spec=pltpu.PrefetchScalarGridSpec(
            num_scalar_prefetch=0,
            grid=(2, nt),                                  # (pass, q_tile)
            in_specs=[
                pl.BlockSpec((f, 4 * tq), lambda p, t: (0, t)),
                pl.BlockSpec((cout, f), lambda p, t: (0, 0)),
                pl.BlockSpec((cout, 1), lambda p, t: (0, 0)),
                pl.BlockSpec((cout, 1), lambda p, t: (0, 0)),
                pl.BlockSpec((cout, 1), lambda p, t: (0, 0)),
            ],
            out_specs=pl.BlockSpec((cout, tq), lambda p, t: (0, t)),
            scratch_shapes=[pltpu.VMEM((cout, 1), jnp.float32)] * 4,
        ),
        compiler_params=pltpu.CompilerParams(
            dimension_semantics=("arbitrary", "arbitrary"),
        ),
        cost_estimate=cost,
    )(a, w_mat, b.reshape(cout, 1), gamma.reshape(cout, 1), beta.reshape(cout, 1))
    # TODO(synk): on v7x, shard the q_tile axis across the 2 TensorCores
    # (per-core partial sums + small combine) instead of a purely serial grid.
    return out[:, :q].reshape(cout, ho, wo, n)


def cnn_classif_bnorm_forward(x_nchw, params):
    n = x_nchw.shape[0]
    c2 = params["w2"].shape[0]
    num_classes = params["wl"].shape[0]

    # NCHW -> (C, H, W, N): channels on sublanes, (h, w, n) on lanes throughout.
    # Block-2 output then flattens straight into PyTorch (c, h, w) feature
    # order with batch on lanes -- no activation transpose between kernels.
    x = jnp.transpose(x_nchw.astype(jnp.float32), (1, 2, 3, 0))       # (1,28,28,N)

    y1 = conv_block(x, params["w1"], params["b1"], params["g1"], params["be1"],
                    out_dtype=jnp.bfloat16)                           # (C1,14,14,N)
    y2 = conv_block(y1, params["w2"], params["b2"], params["g2"], params["be2"],
                    out_dtype=jnp.float32)                            # (C2, 7, 7,N)

    h2, w2 = y2.shape[1], y2.shape[2]
    flat_t = y2.reshape(c2 * h2 * w2, n)            # (1568, N), rows in (c,h,w) order

    cost = pl.CostEstimate(
        flops=2 * num_classes * flat_t.shape[0] * n,
        transcendentals=0,
        bytes_accessed=4 * (flat_t.size + params["wl"].size
                            + num_classes + n * num_classes),
    )
    # TODO(synk): fuse this tiny matmul into the block-2 epilogue to drop one
    # pallas_call and the y2 HBM round trip (latency win at small batch).
    logits_t = pl.pallas_call(
        linear_kernel,
        out_shape=jax.ShapeDtypeStruct((num_classes, n), jnp.float32),
        in_specs=[_vmem_spec()] * 3,
        out_specs=_vmem_spec(),
        cost_estimate=cost,
    )(params["wl"].astype(jnp.float32), flat_t,
      params["bl"].reshape(num_classes, 1))
    return jnp.transpose(logits_t, (1, 0))                            # (N, classes)


def init_params(key, c1=16, c2=32, num_classes=10):
    # Deterministic synthetic parameters with the module's shapes
    # (PyTorch conventions: conv (Cout, Cin, 5, 5), linear (out, in)).
    ks = jax.random.split(key, 6)
    return {
        "w1": 0.1 * jax.random.normal(ks[0], (c1, 1, 5, 5), jnp.float32),
        "b1": 0.05 * jax.random.normal(ks[1], (c1,), jnp.float32),
        "g1": jnp.ones((c1,), jnp.float32),      # BatchNorm2d weight init
        "be1": jnp.zeros((c1,), jnp.float32),    # BatchNorm2d bias init
        "w2": 0.1 * jax.random.normal(ks[2], (c2, c1, 5, 5), jnp.float32),
        "b2": 0.05 * jax.random.normal(ks[3], (c2,), jnp.float32),
        "g2": jnp.ones((c2,), jnp.float32),
        "be2": jnp.zeros((c2,), jnp.float32),
        "wl": 0.05 * jax.random.normal(ks[4], (num_classes, 7 * 7 * c2), jnp.float32),
        "bl": 0.05 * jax.random.normal(ks[5], (num_classes,), jnp.float32),
    }


if __name__ == "__main__":
    key = jax.random.PRNGKey(0)
    pkey, xkey = jax.random.split(key)
    params = init_params(pkey)
    # 28x28 single-channel input is implied by the 7*7*num_channels2 linear layer.
    x = jax.random.normal(xkey, (2, 1, 28, 28), jnp.float32)   # NCHW
    out = jax.jit(cnn_classif_bnorm_forward)(x, params)
    out = jax.block_until_ready(out)
    assert out.shape == (2, 10) and out.dtype == jnp.float32
    assert bool(jnp.all(jnp.isfinite(out)))
    print("KERNEL_OK")
</pallas_src>

<mosaic_0001>
module attributes {stable_mosaic.version = 11 : i64} {
  func.func @conv_block_kernel(%arg0: i32, %arg1: i32, %arg2: memref<25x2048xbf16, #tpu.memory_space<vmem>>, %arg3: memref<16x25xbf16, #tpu.memory_space<vmem>>, %arg4: memref<16x1xf32, #tpu.memory_space<vmem>>, %arg5: memref<16x1xf32, #tpu.memory_space<vmem>>, %arg6: memref<16x1xf32, #tpu.memory_space<vmem>>, %arg7: memref<16x512xbf16, #tpu.memory_space<vmem>>, %arg8: memref<16x1xf32, #tpu.memory_space<vmem>>, %arg9: memref<16x1xf32, #tpu.memory_space<vmem>>, %arg10: memref<16x1xf32, #tpu.memory_space<vmem>>, %arg11: memref<16x1xf32, #tpu.memory_space<vmem>>) attributes {dimension_semantics = [#tpu.dimension_semantics<arbitrary>, #tpu.dimension_semantics<arbitrary>], iteration_bounds = array<i64: 2, 1>, scalar_prefetch = 0 : i64, scratch_operands = 4 : i64, tpu.core_type = #tpu.core_type<tc>, window_params = [{transform_indices = @transform_0, window_bounds = array<i64: 25, 2048>}, {pipeline_mode = #tpu.pipeline_mode<synchronous>, transform_indices = @transform_1, window_bounds = array<i64: 16, 25>}, {pipeline_mode = #tpu.pipeline_mode<synchronous>, transform_indices = @transform_2, window_bounds = array<i64: 16, 1>}, {pipeline_mode = #tpu.pipeline_mode<synchronous>, transform_indices = @transform_3, window_bounds = array<i64: 16, 1>}, {pipeline_mode = #tpu.pipeline_mode<synchronous>, transform_indices = @transform_4, window_bounds = array<i64: 16, 1>}, {transform_indices = @transform_5, window_bounds = array<i64: 16, 512>}]} {
    %c0_i32 = arith.constant 0 : i32
    %0 = arith.cmpi eq, %arg0, %c0_i32 : i32
    %c0_i32_0 = arith.constant 0 : i32
    %1 = arith.cmpi eq, %arg1, %c0_i32_0 : i32
    %2 = arith.andi %0, %1 : i1
    %3 = arith.extui %2 : i1 to i32
    %c0_i32_1 = arith.constant 0 : i32
    %4 = arith.cmpi ne, %3, %c0_i32_1 : i32
    scf.if %4 {
      %cst_14 = arith.constant 0.000000e+00 : f32
      %24 = vector.broadcast %cst_14 : f32 to vector<16x1xf32>
      %c0_15 = arith.constant 0 : index
      %c0_16 = arith.constant 0 : index
      %25 = vector.load %arg8[%c0_15, %c0_16] : memref<16x1xf32, #tpu.memory_space<vmem>>, vector<16x1xf32>
      tpu.vector_store %arg8[%c0_15, %c0_16], %24 {strides = array<i32>} : memref<16x1xf32, #tpu.memory_space<vmem>>, vector<16x1xf32>,
      %cst_17 = arith.constant 0.000000e+00 : f32
      %26 = vector.broadcast %cst_17 : f32 to vector<16x1xf32>
      %c0_18 = arith.constant 0 : index
      %c0_19 = arith.constant 0 : index
      %27 = vector.load %arg9[%c0_18, %c0_19] : memref<16x1xf32, #tpu.memory_space<vmem>>, vector<16x1xf32>
      tpu.vector_store %arg9[%c0_18, %c0_19], %26 {strides = array<i32>} : memref<16x1xf32, #tpu.memory_space<vmem>>, vector<16x1xf32>,
    } else {
    }
    %c0 = arith.constant 0 : index
    %c0_2 = arith.constant 0 : index
    %5 = vector.load %arg3[%c0, %c0_2] : memref<16x25xbf16, #tpu.memory_space<vmem>>, vector<16x25xbf16>
    %c0_3 = arith.constant 0 : index
    %c0_4 = arith.constant 0 : index
    %6 = vector.load %arg2[%c0_3, %c0_4] : memref<25x2048xbf16, #tpu.memory_space<vmem>>, vector<25x2048xbf16>
    %cst = arith.constant dense<0.000000e+00> : vector<16x2048xf32>
    %7 = tpu.matmul %5, %6, %cst {dimension_numbers = #tpu.dot_dimension_numbers<[1], [0], [0], [1], [0, 0, 1, 1], [], []>} : vector<16x25xbf16>, vector<25x2048xbf16>, vector<16x2048xf32> -> vector<16x2048xf32>
    %c0_5 = arith.constant 0 : index
    %c0_6 = arith.constant 0 : index
    %8 = vector.load %arg4[%c0_5, %c0_6] : memref<16x1xf32, #tpu.memory_space<vmem>>, vector<16x1xf32>
    %9 = vector.broadcast %8 : vector<16x1xf32> to vector<16x2048xf32>
    %10 = arith.addf %7, %9 : vector<16x2048xf32>
    %cst_7 = arith.constant 0.000000e+00 : f32
    %11 = vector.broadcast %cst_7 : f32 to vector<16x2048xf32>
    %12 = arith.maximumf %10, %11 : vector<16x2048xf32>
    %c0_i32_8 = arith.constant 0 : i32
    %13 = arith.cmpi eq, %arg0, %c0_i32_8 : i32
    %14 = arith.extui %13 : i1 to i32
    %c0_i32_9 = arith.constant 0 : i32
    %15 = arith.cmpi ne, %14, %c0_i32_9 : i32
    scf.if %15 {
      %24 = tpu.iota {dimensions = array<i32: 1>} : vector<1x2048xi32>
      %c512_i32 = arith.constant 512 : i32
      %25 = arith.muli %arg1, %c512_i32 : i32
      %c512_i32_14 = arith.constant 512 : i32
      %c0_i32_15 = arith.constant 0 : i32
      %26 = arith.cmpi eq, %c512_i32_14, %c0_i32_15 : i32
      %c1_i32_16 = arith.constant 1 : i32
      %27 = arith.select %26, %c1_i32_16, %c512_i32_14 : i32
      %28 = vector.broadcast %27 : i32 to vector<1x2048xi32>
      %29 = arith.remsi %24, %28 : vector<1x2048xi32>
      %c0_i32_17 = arith.constant 0 : i32
      %30 = vector.broadcast %c0_i32_17 : i32 to vector<1x2048xi32>
      %31 = arith.cmpi ne, %29, %30 : vector<1x2048xi32>
      %c0_i32_18 = arith.constant 0 : i32
      %32 = vector.broadcast %c0_i32_18 : i32 to vector<1x2048xi32>
      %33 = arith.cmpi slt, %29, %32 : vector<1x2048xi32>
      %c0_i32_19 = arith.constant 0 : i32
      %34 = arith.cmpi slt, %27, %c0_i32_19 : i32
      %35 = vector.broadcast %34 : i1 to vector<1x2048xi1>
      %36 = vector.broadcast %35 : vector<1x2048xi1> to vector<1x2048xi1>
      %37 = arith.xori %33, %36 : vector<1x2048xi1>
      %38 = arith.andi %37, %31 : vector<1x2048xi1>
      %39 = vector.broadcast %27 : i32 to vector<1x2048xi32>
      %40 = arith.addi %29, %39 : vector<1x2048xi32>
      %41 = arith.select %38, %40, %29 : vector<1x2048xi1>, vector<1x2048xi32>
      %42 = vector.broadcast %25 : i32 to vector<1x2048xi32>
      %43 = arith.addi %42, %41 : vector<1x2048xi32>
      %c392_i32 = arith.constant 392 : i32
      %44 = vector.broadcast %c392_i32 : i32 to vector<1x2048xi32>
      %45 = arith.cmpi slt, %43, %44 : vector<1x2048xi32>
      %46 = arith.extui %45 : vector<1x2048xi1> to vector<1x2048xi32>
      %47 = arith.sitofp %46 : vector<1x2048xi32> to vector<1x2048xf32>
      %c0_20 = arith.constant 0 : index
      %c0_21 = arith.constant 0 : index
      %48 = vector.load %arg8[%c0_20, %c0_21] : memref<16x1xf32, #tpu.memory_space<vmem>>, vector<16x1xf32>
      %49 = vector.broadcast %47 : vector<1x2048xf32> to vector<16x2048xf32>
      %50 = arith.mulf %12, %49 : vector<16x2048xf32>
      %cst_22 = arith.constant dense<0.000000e+00> : vector<16xf32>
      %51 = vector.multi_reduction <add>, %50, %cst_22 [1] : vector<16x2048xf32> to vector<16xf32>
      %52 = vector.shape_cast %51 : vector<16xf32> to vector<16x1xf32>
      %53 = arith.addf %48, %52 : vector<16x1xf32>
      %c0_23 = arith.constant 0 : index
      %c0_24 = arith.constant 0 : index
      %54 = vector.load %arg8[%c0_23, %c0_24] : memref<16x1xf32, #tpu.memory_space<vmem>>, vector<16x1xf32>
      tpu.vector_store %arg8[%c0_23, %c0_24], %53 {strides = array<i32>} : memref<16x1xf32, #tpu.memory_space<vmem>>, vector<16x1xf32>,
      %c0_25 = arith.constant 0 : index
      %c0_26 = arith.constant 0 : index
      %55 = vector.load %arg9[%c0_25, %c0_26] : memref<16x1xf32, #tpu.memory_space<vmem>>, vector<16x1xf32>
      %56 = arith.mulf %12, %12 : vector<16x2048xf32>
      %57 = vector.broadcast %47 : vector<1x2048xf32> to vector<16x2048xf32>
      %58 = arith.mulf %56, %57 : vector<16x2048xf32>
      %cst_27 = arith.constant dense<0.000000e+00> : vector<16xf32>
      %59 = vector.multi_reduction <add>, %58, %cst_27 [1] : vector<16x2048xf32> to vector<16xf32>
      %60 = vector.shape_cast %59 : vector<16xf32> to vector<16x1xf32>
      %61 = arith.addf %55, %60 : vector<16x1xf32>
      %c0_28 = arith.constant 0 : index
      %c0_29 = arith.constant 0 : index
      %62 = vector.load %arg9[%c0_28, %c0_29] : memref<16x1xf32, #tpu.memory_space<vmem>>, vector<16x1xf32>
      tpu.vector_store %arg9[%c0_28, %c0_29], %61 {strides = array<i32>} : memref<16x1xf32, #tpu.memory_space<vmem>>, vector<16x1xf32>,
    } else {
    }
    %c1_i32 = arith.constant 1 : i32
    %16 = arith.cmpi eq, %arg0, %c1_i32 : i32
    %c0_i32_10 = arith.constant 0 : i32
    %17 = arith.cmpi eq, %arg1, %c0_i32_10 : i32
    %18 = arith.andi %16, %17 : i1
    %19 = arith.extui %18 : i1 to i32
    %c0_i32_11 = arith.constant 0 : i32
    %20 = arith.cmpi ne, %19, %c0_i32_11 : i32
    scf.if %20 {
      %c0_14 = arith.constant 0 : index
      %c0_15 = arith.constant 0 : index
      %24 = vector.load %arg8[%c0_14, %c0_15] : memref<16x1xf32, #tpu.memory_space<vmem>>, vector<16x1xf32>
      %cst_16 = arith.constant 6.37755089E-4 : f32
      %25 = vector.broadcast %cst_16 : f32 to vector<16x1xf32>
      %26 = arith.mulf %24, %25 : vector<16x1xf32>
      %c0_17 = arith.constant 0 : index
      %c0_18 = arith.constant 0 : index
      %27 = vector.load %arg9[%c0_17, %c0_18] : memref<16x1xf32, #tpu.memory_space<vmem>>, vector<16x1xf32>
      %cst_19 = arith.constant 6.37755089E-4 : f32
      %28 = vector.broadcast %cst_19 : f32 to vector<16x1xf32>
      %29 = arith.mulf %27, %28 : vector<16x1xf32>
      %30 = arith.mulf %26, %26 : vector<16x1xf32>
      %31 = arith.subf %29, %30 : vector<16x1xf32>
      %c0_20 = arith.constant 0 : index
      %c0_21 = arith.constant 0 : index
      %32 = vector.load %arg5[%c0_20, %c0_21] : memref<16x1xf32, #tpu.memory_space<vmem>>, vector<16x1xf32>
      %cst_22 = arith.constant 9.99999974E-6 : f32
      %33 = vector.broadcast %cst_22 : f32 to vector<16x1xf32>
      %34 = arith.addf %31, %33 : vector<16x1xf32>
      %35 = math.rsqrt %34 : vector<16x1xf32>
      %36 = arith.mulf %32, %35 : vector<16x1xf32>
      %c0_23 = arith.constant 0 : index
      %c0_24 = arith.constant 0 : index
      %37 = vector.load %arg10[%c0_23, %c0_24] : memref<16x1xf32, #tpu.memory_space<vmem>>, vector<16x1xf32>
      tpu.vector_store %arg10[%c0_23, %c0_24], %36 {strides = array<i32>} : memref<16x1xf32, #tpu.memory_space<vmem>>, vector<16x1xf32>,
      %c0_25 = arith.constant 0 : index
      %c0_26 = arith.constant 0 : index
      %38 = vector.load %arg6[%c0_25, %c0_26] : memref<16x1xf32, #tpu.memory_space<vmem>>, vector<16x1xf32>
      %39 = arith.mulf %26, %36 : vector<16x1xf32>
      %40 = arith.subf %38, %39 : vector<16x1xf32>
      %c0_27 = arith.constant 0 : index
      %c0_28 = arith.constant 0 : index
      %41 = vector.load %arg11[%c0_27, %c0_28] : memref<16x1xf32, #tpu.memory_space<vmem>>, vector<16x1xf32>
      tpu.vector_store %arg11[%c0_27, %c0_28], %40 {strides = array<i32>} : memref<16x1xf32, #tpu.memory_space<vmem>>, vector<16x1xf32>,
    } else {
    }
    %c1_i32_12 = arith.constant 1 : i32
    %21 = arith.cmpi eq, %arg0, %c1_i32_12 : i32
    %22 = arith.extui %21 : i1 to i32
    %c0_i32_13 = arith.constant 0 : i32
    %23 = arith.cmpi ne, %22, %c0_i32_13 : i32
    scf.if %23 {
      %24 = vector.extract_strided_slice %12 {offsets = [0, 0], sizes = [16, 512], strides = [1, 1]} : vector<16x2048xf32> to vector<16x512xf32>
      %25 = vector.extract_strided_slice %12 {offsets = [0, 512], sizes = [16, 512], strides = [1, 1]} : vector<16x2048xf32> to vector<16x512xf32>
      %26 = vector.extract_strided_slice %12 {offsets = [0, 1024], sizes = [16, 512], strides = [1, 1]} : vector<16x2048xf32> to vector<16x512xf32>
      %27 = vector.extract_strided_slice %12 {offsets = [0, 1536], sizes = [16, 512], strides = [1, 1]} : vector<16x2048xf32> to vector<16x512xf32>
      %28 = arith.maximumf %24, %25 : vector<16x512xf32>
      %29 = arith.maximumf %26, %27 : vector<16x512xf32>
      %30 = arith.maximumf %28, %29 : vector<16x512xf32>
      %31 = arith.minimumf %24, %25 : vector<16x512xf32>
      %32 = arith.minimumf %26, %27 : vector<16x512xf32>
      %33 = arith.minimumf %31, %32 : vector<16x512xf32>
      %c0_14 = arith.constant 0 : index
      %c0_15 = arith.constant 0 : index
      %34 = vector.load %arg10[%c0_14, %c0_15] : memref<16x1xf32, #tpu.memory_space<vmem>>, vector<16x1xf32>
      %cst_16 = arith.constant 0.000000e+00 : f32
      %35 = vector.broadcast %cst_16 : f32 to vector<16x1xf32>
      %36 = arith.cmpf ogt, %34, %35 : vector<16x1xf32>
      %37 = vector.shape_cast %36 : vector<16x1xi1> to vector<16x1xi1>
      %38 = vector.broadcast %37 : vector<16x1xi1> to vector<16x512xi1>
      %39 = arith.select %38, %30, %33 : vector<16x512xi1>, vector<16x512xf32>
      %40 = vector.broadcast %34 : vector<16x1xf32> to vector<16x512xf32>
      %41 = arith.mulf %39, %40 : vector<16x512xf32>
      %c0_17 = arith.constant 0 : index
      %c0_18 = arith.constant 0 : index
      %42 = vector.load %arg11[%c0_17, %c0_18] : memref<16x1xf32, #tpu.memory_space<vmem>>, vector<16x1xf32>
      %43 = vector.broadcast %42 : vector<16x1xf32> to vector<16x512xf32>
      %44 = arith.addf %41, %43 : vector<16x512xf32>
      %45 = arith.truncf %44 : vector<16x512xf32> to vector<16x512xbf16>
      %c0_19 = arith.constant 0 : index
      %c0_20 = arith.constant 0 : index
      %46 = vector.load %arg7[%c0_19, %c0_20] : memref<16x512xbf16, #tpu.memory_space<vmem>>, vector<16x512xbf16>
      tpu.vector_store %arg7[%c0_19, %c0_20], %45 {strides = array<i32>} : memref<16x512xbf16, #tpu.memory_space<vmem>>, vector<16x512xbf16>,
    } else {
    }
    return
  }
  func.func @transform_0(%arg0: i32, %arg1: i32) -> (i32, i32) {
    %c0_i32 = arith.constant 0 : i32
    %c0_i32_0 = arith.constant 0 : i32
    return %c0_i32, %arg1 : i32, i32
  }
  func.func @transform_1(%arg0: i32, %arg1: i32) -> (i32, i32) {
    %c0_i32 = arith.constant 0 : i32
    %c0_i32_0 = arith.constant 0 : i32
    %c0_i32_1 = arith.constant 0 : i32
    return %c0_i32, %c0_i32_0 : i32, i32
  }
  func.func @transform_2(%arg0: i32, %arg1: i32) -> (i32, i32) {
    %c0_i32 = arith.constant 0 : i32
    %c0_i32_0 = arith.constant 0 : i32
    %c0_i32_1 = arith.constant 0 : i32
    return %c0_i32, %c0_i32_0 : i32, i32
  }
  func.func @transform_3(%arg0: i32, %arg1: i32) -> (i32, i32) {
    %c0_i32 = arith.constant 0 : i32
    %c0_i32_0 = arith.constant 0 : i32
    %c0_i32_1 = arith.constant 0 : i32
    return %c0_i32, %c0_i32_0 : i32, i32
  }
  func.func @transform_4(%arg0: i32, %arg1: i32) -> (i32, i32) {
    %c0_i32 = arith.constant 0 : i32
    %c0_i32_0 = arith.constant 0 : i32
    %c0_i32_1 = arith.constant 0 : i32
    return %c0_i32, %c0_i32_0 : i32, i32
  }
  func.func @transform_5(%arg0: i32, %arg1: i32) -> (i32, i32) {
    %c0_i32 = arith.constant 0 : i32
    %c0_i32_0 = arith.constant 0 : i32
    return %c0_i32, %arg1 : i32, i32
  }
}

module attributes {stable_mosaic.version = 11 : i64} {
  func.func @linear_kernel(%arg0: memref<10x1568xf32, #tpu.memory_space<vmem>>, %arg1: memref<1568x2xf32, #tpu.memory_space<vmem>>, %arg2: memref<10x1xf32, #tpu.memory_space<vmem>>, %arg3: memref<10x2xf32, #tpu.memory_space<vmem>>) attributes {dimension_semantics = [], scalar_prefetch = 0 : i64, scratch_operands = 0 : i64, tpu.core_type = #tpu.core_type<tc>} {
    %c0 = arith.constant 0 : index
    %c0_0 = arith.constant 0 : index
    %0 = vector.load %arg0[%c0, %c0_0] : memref<10x1568xf32, #tpu.memory_space<vmem>>, vector<10x1568xf32>
    %c0_1 = arith.constant 0 : index
    %c0_2 = arith.constant 0 : index
    %1 = vector.load %arg1[%c0_1, %c0_2] : memref<1568x2xf32, #tpu.memory_space<vmem>>, vector<1568x2xf32>
    %cst = arith.constant dense<0.000000e+00> : vector<10x2xf32>
    %2 = tpu.matmul %0, %1, %cst {dimension_numbers = #tpu.dot_dimension_numbers<[1], [0], [0], [1], [0, 0, 1, 1], [], []>} : vector<10x1568xf32>, vector<1568x2xf32>, vector<10x2xf32> -> vector<10x2xf32>
    %c0_3 = arith.constant 0 : index
    %c0_4 = arith.constant 0 : index
    %3 = vector.load %arg2[%c0_3, %c0_4] : memref<10x1xf32, #tpu.memory_space<vmem>>, vector<10x1xf32>
    %4 = vector.broadcast %3 : vector<10x1xf32> to vector<10x2xf32>
    %5 = arith.addf %2, %4 : vector<10x2xf32>
    %c0_5 = arith.constant 0 : index
    %c0_6 = arith.constant 0 : index
    %6 = vector.load %arg3[%c0_5, %c0_6] : memref<10x2xf32, #tpu.memory_space<vmem>>, vector<10x2xf32>
    tpu.vector_store %arg3[%c0_5, %c0_6], %5 {strides = array<i32>} : memref<10x2xf32, #tpu.memory_space<vmem>>, vector<10x2xf32>,
    return
  }
}

module attributes {stable_mosaic.version = 11 : i64} {
  func.func @conv_block_kernel(%arg0: i32, %arg1: i32, %arg2: memref<400x512xbf16, #tpu.memory_space<vmem>>, %arg3: memref<32x400xbf16, #tpu.memory_space<vmem>>, %arg4: memref<32x1xf32, #tpu.memory_space<vmem>>, %arg5: memref<32x1xf32, #tpu.memory_space<vmem>>, %arg6: memref<32x1xf32, #tpu.memory_space<vmem>>, %arg7: memref<32x128xf32, #tpu.memory_space<vmem>>, %arg8: memref<32x1xf32, #tpu.memory_space<vmem>>, %arg9: memref<32x1xf32, #tpu.memory_space<vmem>>, %arg10: memref<32x1xf32, #tpu.memory_space<vmem>>, %arg11: memref<32x1xf32, #tpu.memory_space<vmem>>) attributes {dimension_semantics = [#tpu.dimension_semantics<arbitrary>, #tpu.dimension_semantics<arbitrary>], iteration_bounds = array<i64: 2, 1>, scalar_prefetch = 0 : i64, scratch_operands = 4 : i64, tpu.core_type = #tpu.core_type<tc>, window_params = [{transform_indices = @transform_0, window_bounds = array<i64: 400, 512>}, {pipeline_mode = #tpu.pipeline_mode<synchronous>, transform_indices = @transform_1, window_bounds = array<i64: 32, 400>}, {pipeline_mode = #tpu.pipeline_mode<synchronous>, transform_indices = @transform_2, window_bounds = array<i64: 32, 1>}, {pipeline_mode = #tpu.pipeline_mode<synchronous>, transform_indices = @transform_3, window_bounds = array<i64: 32, 1>}, {pipeline_mode = #tpu.pipeline_mode<synchronous>, transform_indices = @transform_4, window_bounds = array<i64: 32, 1>}, {transform_indices = @transform_5, window_bounds = array<i64: 32, 128>}]} {
    %c0_i32 = arith.constant 0 : i32
    %0 = arith.cmpi eq, %arg0, %c0_i32 : i32
    %c0_i32_0 = arith.constant 0 : i32
    %1 = arith.cmpi eq, %arg1, %c0_i32_0 : i32
    %2 = arith.andi %0, %1 : i1
    %3 = arith.extui %2 : i1 to i32
    %c0_i32_1 = arith.constant 0 : i32
    %4 = arith.cmpi ne, %3, %c0_i32_1 : i32
    scf.if %4 {
      %cst_14 = arith.constant 0.000000e+00 : f32
      %24 = vector.broadcast %cst_14 : f32 to vector<32x1xf32>
      %c0_15 = arith.constant 0 : index
      %c0_16 = arith.constant 0 : index
      %25 = vector.load %arg8[%c0_15, %c0_16] : memref<32x1xf32, #tpu.memory_space<vmem>>, vector<32x1xf32>
      tpu.vector_store %arg8[%c0_15, %c0_16], %24 {strides = array<i32>} : memref<32x1xf32, #tpu.memory_space<vmem>>, vector<32x1xf32>,
      %cst_17 = arith.constant 0.000000e+00 : f32
      %26 = vector.broadcast %cst_17 : f32 to vector<32x1xf32>
      %c0_18 = arith.constant 0 : index
      %c0_19 = arith.constant 0 : index
      %27 = vector.load %arg9[%c0_18, %c0_19] : memref<32x1xf32, #tpu.memory_space<vmem>>, vector<32x1xf32>
      tpu.vector_store %arg9[%c0_18, %c0_19], %26 {strides = array<i32>} : memref<32x1xf32, #tpu.memory_space<vmem>>, vector<32x1xf32>,
    } else {
    }
    %c0 = arith.constant 0 : index
    %c0_2 = arith.constant 0 : index
    %5 = vector.load %arg3[%c0, %c0_2] : memref<32x400xbf16, #tpu.memory_space<vmem>>, vector<32x400xbf16>
    %c0_3 = arith.constant 0 : index
    %c0_4 = arith.constant 0 : index
    %6 = vector.load %arg2[%c0_3, %c0_4] : memref<400x512xbf16, #tpu.memory_space<vmem>>, vector<400x512xbf16>
    %cst = arith.constant dense<0.000000e+00> : vector<32x512xf32>
    %7 = tpu.matmul %5, %6, %cst {dimension_numbers = #tpu.dot_dimension_numbers<[1], [0], [0], [1], [0, 0, 1, 1], [], []>} : vector<32x400xbf16>, vector<400x512xbf16>, vector<32x512xf32> -> vector<32x512xf32>
    %c0_5 = arith.constant 0 : index
    %c0_6 = arith.constant 0 : index
    %8 = vector.load %arg4[%c0_5, %c0_6] : memref<32x1xf32, #tpu.memory_space<vmem>>, vector<32x1xf32>
    %9 = vector.broadcast %8 : vector<32x1xf32> to vector<32x512xf32>
    %10 = arith.addf %7, %9 : vector<32x512xf32>
    %cst_7 = arith.constant 0.000000e+00 : f32
    %11 = vector.broadcast %cst_7 : f32 to vector<32x512xf32>
    %12 = arith.maximumf %10, %11 : vector<32x512xf32>
    %c0_i32_8 = arith.constant 0 : i32
    %13 = arith.cmpi eq, %arg0, %c0_i32_8 : i32
    %14 = arith.extui %13 : i1 to i32
    %c0_i32_9 = arith.constant 0 : i32
    %15 = arith.cmpi ne, %14, %c0_i32_9 : i32
    scf.if %15 {
      %24 = tpu.iota {dimensions = array<i32: 1>} : vector<1x512xi32>
      %c128_i32 = arith.constant 128 : i32
      %25 = arith.muli %arg1, %c128_i32 : i32
      %c128_i32_14 = arith.constant 128 : i32
      %c0_i32_15 = arith.constant 0 : i32
      %26 = arith.cmpi eq, %c128_i32_14, %c0_i32_15 : i32
      %c1_i32_16 = arith.constant 1 : i32
      %27 = arith.select %26, %c1_i32_16, %c128_i32_14 : i32
      %28 = vector.broadcast %27 : i32 to vector<1x512xi32>
      %29 = arith.remsi %24, %28 : vector<1x512xi32>
      %c0_i32_17 = arith.constant 0 : i32
      %30 = vector.broadcast %c0_i32_17 : i32 to vector<1x512xi32>
      %31 = arith.cmpi ne, %29, %30 : vector<1x512xi32>
      %c0_i32_18 = arith.constant 0 : i32
      %32 = vector.broadcast %c0_i32_18 : i32 to vector<1x512xi32>
      %33 = arith.cmpi slt, %29, %32 : vector<1x512xi32>
      %c0_i32_19 = arith.constant 0 : i32
      %34 = arith.cmpi slt, %27, %c0_i32_19 : i32
      %35 = vector.broadcast %34 : i1 to vector<1x512xi1>
      %36 = vector.broadcast %35 : vector<1x512xi1> to vector<1x512xi1>
      %37 = arith.xori %33, %36 : vector<1x512xi1>
      %38 = arith.andi %37, %31 : vector<1x512xi1>
      %39 = vector.broadcast %27 : i32 to vector<1x512xi32>
      %40 = arith.addi %29, %39 : vector<1x512xi32>
      %41 = arith.select %38, %40, %29 : vector<1x512xi1>, vector<1x512xi32>
      %42 = vector.broadcast %25 : i32 to vector<1x512xi32>
      %43 = arith.addi %42, %41 : vector<1x512xi32>
      %c98_i32 = arith.constant 98 : i32
      %44 = vector.broadcast %c98_i32 : i32 to vector<1x512xi32>
      %45 = arith.cmpi slt, %43, %44 : vector<1x512xi32>
      %46 = arith.extui %45 : vector<1x512xi1> to vector<1x512xi32>
      %47 = arith.sitofp %46 : vector<1x512xi32> to vector<1x512xf32>
      %c0_20 = arith.constant 0 : index
      %c0_21 = arith.constant 0 : index
      %48 = vector.load %arg8[%c0_20, %c0_21] : memref<32x1xf32, #tpu.memory_space<vmem>>, vector<32x1xf32>
      %49 = vector.broadcast %47 : vector<1x512xf32> to vector<32x512xf32>
      %50 = arith.mulf %12, %49 : vector<32x512xf32>
      %cst_22 = arith.constant dense<0.000000e+00> : vector<32xf32>
      %51 = vector.multi_reduction <add>, %50, %cst_22 [1] : vector<32x512xf32> to vector<32xf32>
      %52 = vector.shape_cast %51 : vector<32xf32> to vector<32x1xf32>
      %53 = arith.addf %48, %52 : vector<32x1xf32>
      %c0_23 = arith.constant 0 : index
      %c0_24 = arith.constant 0 : index
      %54 = vector.load %arg8[%c0_23, %c0_24] : memref<32x1xf32, #tpu.memory_space<vmem>>, vector<32x1xf32>
      tpu.vector_store %arg8[%c0_23, %c0_24], %53 {strides = array<i32>} : memref<32x1xf32, #tpu.memory_space<vmem>>, vector<32x1xf32>,
      %c0_25 = arith.constant 0 : index
      %c0_26 = arith.constant 0 : index
      %55 = vector.load %arg9[%c0_25, %c0_26] : memref<32x1xf32, #tpu.memory_space<vmem>>, vector<32x1xf32>
      %56 = arith.mulf %12, %12 : vector<32x512xf32>
      %57 = vector.broadcast %47 : vector<1x512xf32> to vector<32x512xf32>
      %58 = arith.mulf %56, %57 : vector<32x512xf32>
      %cst_27 = arith.constant dense<0.000000e+00> : vector<32xf32>
      %59 = vector.multi_reduction <add>, %58, %cst_27 [1] : vector<32x512xf32> to vector<32xf32>
      %60 = vector.shape_cast %59 : vector<32xf32> to vector<32x1xf32>
      %61 = arith.addf %55, %60 : vector<32x1xf32>
      %c0_28 = arith.constant 0 : index
      %c0_29 = arith.constant 0 : index
      %62 = vector.load %arg9[%c0_28, %c0_29] : memref<32x1xf32, #tpu.memory_space<vmem>>, vector<32x1xf32>
      tpu.vector_store %arg9[%c0_28, %c0_29], %61 {strides = array<i32>} : memref<32x1xf32, #tpu.memory_space<vmem>>, vector<32x1xf32>,
    } else {
    }
    %c1_i32 = arith.constant 1 : i32
    %16 = arith.cmpi eq, %arg0, %c1_i32 : i32
    %c0_i32_10 = arith.constant 0 : i32
    %17 = arith.cmpi eq, %arg1, %c0_i32_10 : i32
    %18 = arith.andi %16, %17 : i1
    %19 = arith.extui %18 : i1 to i32
    %c0_i32_11 = arith.constant 0 : i32
    %20 = arith.cmpi ne, %19, %c0_i32_11 : i32
    scf.if %20 {
      %c0_14 = arith.constant 0 : index
      %c0_15 = arith.constant 0 : index
      %24 = vector.load %arg8[%c0_14, %c0_15] : memref<32x1xf32, #tpu.memory_space<vmem>>, vector<32x1xf32>
      %cst_16 = arith.constant 0.00255102036 : f32
      %25 = vector.broadcast %cst_16 : f32 to vector<32x1xf32>
      %26 = arith.mulf %24, %25 : vector<32x1xf32>
      %c0_17 = arith.constant 0 : index
      %c0_18 = arith.constant 0 : index
      %27 = vector.load %arg9[%c0_17, %c0_18] : memref<32x1xf32, #tpu.memory_space<vmem>>, vector<32x1xf32>
      %cst_19 = arith.constant 0.00255102036 : f32
      %28 = vector.broadcast %cst_19 : f32 to vector<32x1xf32>
      %29 = arith.mulf %27, %28 : vector<32x1xf32>
      %30 = arith.mulf %26, %26 : vector<32x1xf32>
      %31 = arith.subf %29, %30 : vector<32x1xf32>
      %c0_20 = arith.constant 0 : index
      %c0_21 = arith.constant 0 : index
      %32 = vector.load %arg5[%c0_20, %c0_21] : memref<32x1xf32, #tpu.memory_space<vmem>>, vector<32x1xf32>
      %cst_22 = arith.constant 9.99999974E-6 : f32
      %33 = vector.broadcast %cst_22 : f32 to vector<32x1xf32>
      %34 = arith.addf %31, %33 : vector<32x1xf32>
      %35 = math.rsqrt %34 : vector<32x1xf32>
      %36 = arith.mulf %32, %35 : vector<32x1xf32>
      %c0_23 = arith.constant 0 : index
      %c0_24 = arith.constant 0 : index
      %37 = vector.load %arg10[%c0_23, %c0_24] : memref<32x1xf32, #tpu.memory_space<vmem>>, vector<32x1xf32>
      tpu.vector_store %arg10[%c0_23, %c0_24], %36 {strides = array<i32>} : memref<32x1xf32, #tpu.memory_space<vmem>>, vector<32x1xf32>,
      %c0_25 = arith.constant 0 : index
      %c0_26 = arith.constant 0 : index
      %38 = vector.load %arg6[%c0_25, %c0_26] : memref<32x1xf32, #tpu.memory_space<vmem>>, vector<32x1xf32>
      %39 = arith.mulf %26, %36 : vector<32x1xf32>
      %40 = arith.subf %38, %39 : vector<32x1xf32>
      %c0_27 = arith.constant 0 : index
      %c0_28 = arith.constant 0 : index
      %41 = vector.load %arg11[%c0_27, %c0_28] : memref<32x1xf32, #tpu.memory_space<vmem>>, vector<32x1xf32>
      tpu.vector_store %arg11[%c0_27, %c0_28], %40 {strides = array<i32>} : memref<32x1xf32, #tpu.memory_space<vmem>>, vector<32x1xf32>,
    } else {
    }
    %c1_i32_12 = arith.constant 1 : i32
    %21 = arith.cmpi eq, %arg0, %c1_i32_12 : i32
    %22 = arith.extui %21 : i1 to i32
    %c0_i32_13 = arith.constant 0 : i32
    %23 = arith.cmpi ne, %22, %c0_i32_13 : i32
    scf.if %23 {
      %24 = vector.extract_strided_slice %12 {offsets = [0, 0], sizes = [32, 128], strides = [1, 1]} : vector<32x512xf32> to vector<32x128xf32>
      %25 = vector.extract_strided_slice %12 {offsets = [0, 128], sizes = [32, 128], strides = [1, 1]} : vector<32x512xf32> to vector<32x128xf32>
      %26 = vector.extract_strided_slice %12 {offsets = [0, 256], sizes = [32, 128], strides = [1, 1]} : vector<32x512xf32> to vector<32x128xf32>
      %27 = vector.extract_strided_slice %12 {offsets = [0, 384], sizes = [32, 128], strides = [1, 1]} : vector<32x512xf32> to vector<32x128xf32>
      %28 = arith.maximumf %24, %25 : vector<32x128xf32>
      %29 = arith.maximumf %26, %27 : vector<32x128xf32>
      %30 = arith.maximumf %28, %29 : vector<32x128xf32>
      %31 = arith.minimumf %24, %25 : vector<32x128xf32>
      %32 = arith.minimumf %26, %27 : vector<32x128xf32>
      %33 = arith.minimumf %31, %32 : vector<32x128xf32>
      %c0_14 = arith.constant 0 : index
      %c0_15 = arith.constant 0 : index
      %34 = vector.load %arg10[%c0_14, %c0_15] : memref<32x1xf32, #tpu.memory_space<vmem>>, vector<32x1xf32>
      %cst_16 = arith.constant 0.000000e+00 : f32
      %35 = vector.broadcast %cst_16 : f32 to vector<32x1xf32>
      %36 = arith.cmpf ogt, %34, %35 : vector<32x1xf32>
      %37 = vector.shape_cast %36 : vector<32x1xi1> to vector<32x1xi1>
      %38 = vector.broadcast %37 : vector<32x1xi1> to vector<32x128xi1>
      %39 = arith.select %38, %30, %33 : vector<32x128xi1>, vector<32x128xf32>
      %40 = vector.broadcast %34 : vector<32x1xf32> to vector<32x128xf32>
      %41 = arith.mulf %39, %40 : vector<32x128xf32>
      %c0_17 = arith.constant 0 : index
      %c0_18 = arith.constant 0 : index
      %42 = vector.load %arg11[%c0_17, %c0_18] : memref<32x1xf32, #tpu.memory_space<vmem>>, vector<32x1xf32>
      %43 = vector.broadcast %42 : vector<32x1xf32> to vector<32x128xf32>
      %44 = arith.addf %41, %43 : vector<32x128xf32>
      %c0_19 = arith.constant 0 : index
      %c0_20 = arith.constant 0 : index
      %45 = vector.load %arg7[%c0_19, %c0_20] : memref<32x128xf32, #tpu.memory_space<vmem>>, vector<32x128xf32>
      tpu.vector_store %arg7[%c0_19, %c0_20], %44 {strides = array<i32>} : memref<32x128xf32, #tpu.memory_space<vmem>>, vector<32x128xf32>,
    } else {
    }
    return
  }
  func.func @transform_0(%arg0: i32, %arg1: i32) -> (i32, i32) {
    %c0_i32 = arith.constant 0 : i32
    %c0_i32_0 = arith.constant 0 : i32
    return %c0_i32, %arg1 : i32, i32
  }
  func.func @transform_1(%arg0: i32, %arg1: i32) -> (i32, i32) {
    %c0_i32 = arith.constant 0 : i32
    %c0_i32_0 = arith.constant 0 : i32
    %c0_i32_1 = arith.constant 0 : i32
    return %c0_i32, %c0_i32_0 : i32, i32
  }
  func.func @transform_2(%arg0: i32, %arg1: i32) -> (i32, i32) {
    %c0_i32 = arith.constant 0 : i32
    %c0_i32_0 = arith.constant 0 : i32
    %c0_i32_1 = arith.constant 0 : i32
    return %c0_i32, %c0_i32_0 : i32, i32
  }
  func.func @transform_3(%arg0: i32, %arg1: i32) -> (i32, i32) {
    %c0_i32 = arith.constant 0 : i32
    %c0_i32_0 = arith.constant 0 : i32
    %c0_i32_1 = arith.constant 0 : i32
    return %c0_i32, %c0_i32_0 : i32, i32
  }
  func.func @transform_4(%arg0: i32, %arg1: i32) -> (i32, i32) {
    %c0_i32 = arith.constant 0 : i32
    %c0_i32_0 = arith.constant 0 : i32
    %c0_i32_1 = arith.constant 0 : i32
    return %c0_i32, %c0_i32_0 : i32, i32
  }
  func.func @transform_5(%arg0: i32, %arg1: i32) -> (i32, i32) {
    %c0_i32 = arith.constant 0 : i32
    %c0_i32_0 = arith.constant 0 : i32
    return %c0_i32, %arg1 : i32, i32
  }
}

</mosaic_0001>

<bundles_post_ra>
// kernel: cnn_classif_bnorm_forward.3
= control target key start
LH: loop header
LB: loop body
LE: loop exit
PB: predicated region body
PF: predicated region fallthrough
CT: control target
= control target key end

     0   :  { %s1737_s18 = smov 0   ;;  %s1739_s19 = smov 0   ;;  %s2214_s0 = inlined_call_operand.vmem [shape: bf16[25,2048], index: 0, kind: input, shape index: {}]   ;;  %s2215_s1 = inlined_call_operand.vmem [shape: bf16[16,25], index: 1, kind: input, shape index: {}]   ;;  %s2216_s2 = inlined_call_operand.vmem [shape: f32[16,1], index: 2, kind: input, shape index: {}]   ;;  %s2217_s3 = inlined_call_operand.vmem [shape: f32[16,1], index: 3, kind: input, shape index: {}]   ;;  %s2218_s4 = inlined_call_operand.vmem [shape: f32[16,1], index: 4, kind: input, shape index: {}]   ;;  %s2219_s5 = inlined_call_operand.vmem [shape: bf16[16,512], index: 5, kind: output, shape index: {}]  }
   0x1   :  { %s1741_s20 = smov 0  }
   0x2 LB: > { %s27_s21 = sadd.s32 1, %s1696_s19  ;;  %p1577_p0 = scmp.ge.s32.totalorder %s1700_s20, 1  ;;  %s1700_s20 = sphi %s1741_s20, %s15_s20   ;;  %s1696_s19 = sphi %s1739_s19, %s2223_s19   ;;  %s1692_s18 = sphi %s1737_s18, %s2222_s18  }
   0x3   : > { %p29_p1 = scmp.ge.s32.totalorder %s27_s21, 2  ;;  %p200_p2 = scmp.lt.s32.totalorder %s1700_s20, 3 }
   0x5   : > { %s2225_s21 = smov (%p29_p1, %s27_s21), 0  ;;  %p201_p3 = pnand %p1577_p0, %p200_p2 }
   0x6   : > { %p241_p4 = scmp.eq.s32.totalorder (!%p201_p3), %s1692_s18, 0 }
   0x7   : > { %204 = sbr.rel (%p201_p3) target bundleno = 627 (0x273), region = 40 }
   0xc   : > { %246 = sbr.rel (!%p241_p4) target bundleno = 17 (0x11), region = 44  ;;  %vm247_vm0 = vcmask (%p241_p4), 7168   ;;  %v1702_v0 = vmov (%p241_p4), 0.0  }
   0xd   : > { %248 = vst.msk [vmem:[#allocation2] sm:$0xff] (%p241_p4), %vm247_vm0, %v1702_v0  ;;  %249 = vst.msk [vmem:[#allocation2 + $0x8] sm:$0xff] (%p241_p4), %vm247_vm0, %v1702_v0 }
   0xe   : > { %250 = vst.msk [vmem:[#allocation3] sm:$0xff] (%p241_p4), %vm247_vm0, %v1702_v0  ;;  %251 = vst.msk [vmem:[#allocation3 + $0x8] sm:$0xff] (%p241_p4), %vm247_vm0, %v1702_v0 }
  0x11 PF: > { %v270_v1 = vld [vmem:[%s2214_s0 + $0x80] sm:$0xff]  ;;  %vm451_vm1 = vcmask 1043456   ;;  %vm452_vm2 = vcmask 1044480   ;;  %v1703_v4 = vmov 65535   ;;  %v271_v6 = vld [vmem:[%s2214_s0 + $0x88] sm:$0xff]  ;;  %v1704_v16 = vmov 0  }
  0x12   : > { %v278_v2 = vld [vmem:[%s2214_s0 + $0xc0] sm:$0x11]  ;;  %v453_v5 = vsel %vm451_vm1, 4294967295, %v1703_v4  ;;  %v279_v7 = vld [vmem:[%s2214_s0 + $0xc8] sm:$0x11]  ;;  %535 = vmatprep.mubr.bf16.mxu0 %v1704_v16  ;;  %578 = vmatprep.mubr.bf16.mxu1 %v1704_v16  ;;  %v272_v23 = vld [vmem:[%s2214_s0 + $0x90] sm:$0xff] }
  0x13   : > { %v1597_v3 = vcombine.high %v270_v1, %v278_v2  ;;  %v1596_v8 = vcombine.low %v270_v1, %v278_v2  ;;  %v254_v9 = vld [vmem:[%s2214_s0] sm:$0xff]  ;;  %v1773_v10 = vsel %vm452_vm2, %v453_v5, 0  ;;  %v1599_v11 = vcombine.high %v271_v6, %v279_v7  ;;  %v255_v14 = vld [vmem:[%s2214_s0 + $0x8] sm:$0xff]  ;;  %1670 = vset.pattern.permute.xlu0 %v1704_v16  ;;  %v280_v24 = vld [vmem:[%s2214_s0 + $0xd0] sm:$0x11]  ;;  %p1620_p5 = scmp.ne.s32.totalorder %s1692_s18, 0 }
  0x14   : > { %v1598_v12 = vcombine.low %v271_v6, %v279_v7  ;;  %v262_v13 = vld [vmem:[%s2214_s0 + $0x40] sm:$0xff]  ;;  %v263_v15 = vld [vmem:[%s2214_s0 + $0x48] sm:$0xff]  ;;  %v273_v25 = vld [vmem:[%s2214_s0 + $0x98] sm:$0xff]  ;;  %v1601_v26 = vcombine.high %v272_v23, %v280_v24  ;;  %v1600_v29 = vcombine.low %v272_v23, %v280_v24  ;;  %vm447_vm3 = vcmask 203776  }
  0x15   : > { %v459_v17 = vand.u32 %v1597_v3, %v1773_v10  ;;  %v456_v18 = vand.u32 %v1596_v8, %v1773_v10  ;;  %v1581_v19 = vcombine.high %v254_v9, %v262_v13  ;;  %v465_v20 = vand.u32 %v1599_v11, %v1773_v10  ;;  %v281_v27 = vld [vmem:[%s2214_s0 + $0xd8] sm:$0x11]  ;;  %v1806_v32 = vld [vmem:[%s2215_s1] sm:$0xff]   ;;  %v256_v35 = vld [vmem:[%s2214_s0 + $0x10] sm:$0xff] }
  0x16   : > { %v462_v21 = vand.u32 %v1598_v12, %v1773_v10  ;;  %v1583_v22 = vcombine.high %v255_v14, %v263_v15  ;;  %v1580_v28 = vcombine.low %v254_v9, %v262_v13  ;;  %v1603_v30 = vcombine.high %v273_v25, %v281_v27  ;;  %v264_v36 = vld [vmem:[%s2214_s0 + $0x50] sm:$0xff]  ;;  %v257_v38 = vld [vmem:[%s2214_s0 + $0x18] sm:$0xff]  ;;  %v274_v39 = vld [vmem:[%s2214_s0 + $0xa0] sm:$0xff] }
  0x17   : > { %515 = vmatprep.subr.bf16.mxu0 %v459_v17  ;;  %558 = vmatprep.subr.bf16.mxu1 %v465_v20  ;;  %v1582_v31 = vcombine.low %v255_v14, %v263_v15  ;;  %v471_v33 = vand.u32 %v1601_v26, %v1773_v10  ;;  %v1602_v34 = vcombine.low %v273_v25, %v281_v27  ;;  %v282_v40 = vld [vmem:[%s2214_s0 + $0xe0] sm:$0x11]  ;;  %v265_v41 = vld [vmem:[%s2214_s0 + $0x58] sm:$0xff]  ;;  %v275_v42 = vld [vmem:[%s2214_s0 + $0xa8] sm:$0xff] }
  0x18   : > { %516 = vmatpush1.bf16.msra.mxu0 %v456_v18  ;;  %559 = vmatpush1.bf16.msra.mxu1 %v462_v21  ;;  %v477_v37 = vand.u32 %v1603_v30, %v1773_v10  ;;  %v283_v43 = vld [vmem:[%s2214_s0 + $0xe8] sm:$0x11]  ;;  %v468_v44 = vand.u32 %v1600_v29, %v1773_v10  ;;  %v1585_v46 = vcombine.high %v256_v35, %v264_v36  ;;  %v286_v52 = vld [vmem:[%s2216_s2] sm:$0xff]  ;;  %v276_v60 = vld [vmem:[%s2214_s0 + $0xb0] sm:$0xff] }
  0x19   : > { %517 = vmatprep.subr.bf16.mxu0 %v1581_v19  ;;  %560 = vmatprep.subr.bf16.mxu1 %v1583_v22  ;;  %v474_v45 = vand.u32 %v1602_v34, %v1773_v10  ;;  %v1605_v47 = vcombine.high %v274_v39, %v282_v40  ;;  %v1587_v48 = vcombine.high %v257_v38, %v265_v41  ;;  %v258_v56 = vld [vmem:[%s2214_s0 + $0x20] sm:$0xff]  ;;  %v259_v59 = vld [vmem:[%s2214_s0 + $0x28] sm:$0xff]  ;;  %v284_v61 = vld [vmem:[%s2214_s0 + $0xf0] sm:$0x11] }
  0x1a   : > { %v1607_v49 = vcombine.high %v275_v42, %v283_v43  ;;  %v1584_v50 = vcombine.low %v256_v35, %v264_v36  ;;  %v1604_v51 = vcombine.low %v274_v39, %v282_v40  ;;  %v1586_v53 = vcombine.low %v257_v38, %v265_v41  ;;  %v266_v57 = vld [vmem:[%s2214_s0 + $0x60] sm:$0xff]  ;;  %v267_v62 = vld [vmem:[%s2214_s0 + $0x68] sm:$0xff]  ;;  %v277_v63 = vld [vmem:[%s2214_s0 + $0xb8] sm:$0xff]  ;;  %290 = vperm.xlu0 %1670, %v286_v52  }
  0x1b   : > { %v483_v54 = vand.u32 %v1605_v47, %v1773_v10  ;;  %v1606_v55 = vcombine.low %v275_v42, %v283_v43  ;;  %v285_v0 = vld [vmem:[%s2214_s0 + $0xf8] sm:$0x11]  ;;  %v287_v2 = vld [vmem:[%s2216_s2 + $0x8] sm:$0xff]  ;;  %v1589_v4 = vcombine.high %v258_v56, %v266_v57  ;;  %v1609_v5 = vcombine.high %v276_v60, %v284_v61  ;;  %v260_v15 = vld [vmem:[%s2214_s0 + $0x30] sm:$0xff] }
  0x1c   : > { %518 = vmatpush1.bf16.msra.mxu0 %v1580_v28  ;;  %561 = vmatpush1.bf16.msra.mxu1 %v1582_v31  ;;  %v489_v58 = vand.u32 %v1607_v49, %v1773_v10  ;;  %v480_v1 = vand.u32 %v1604_v51, %v1773_v10  ;;  %v1591_v6 = vcombine.high %v259_v59, %v267_v62  ;;  %v268_v17 = vld [vmem:[%s2214_s0 + $0x70] sm:$0xff]  ;;  %v261_v18 = vld [vmem:[%s2214_s0 + $0x38] sm:$0xff] }
  0x1d   : > { %601 = vmatprep.subr.bf16.mxu0 %v471_v33  ;;  %644 = vmatprep.subr.bf16.mxu1 %v477_v37  ;;  %v486_v3 = vand.u32 %v1606_v55, %v1773_v10  ;;  %v1611_v7 = vcombine.high %v277_v63, %v285_v0  ;;  %v1588_v8 = vcombine.low %v258_v56, %v266_v57  ;;  %v269_v19 = vld [vmem:[%s2214_s0 + $0x78] sm:$0xff] }
  0x1e   : > { %295 = vperm.xlu0 %1670, %v287_v2   ;;  %v1608_v9 = vcombine.low %v276_v60, %v284_v61  ;;  %v1590_v11 = vcombine.low %v259_v59, %v267_v62  ;;  %v495_v12 = vand.u32 %v1609_v5, %v1773_v10  ;;  %v1610_v13 = vcombine.low %v277_v63, %v285_v0 }
  0x1f   : > { %1612 = vmatmul.mubr.msk.bf16.vlgmr.msra.gmra.mxu0 %vm447_vm3, %v1806_v32  ;;  %1613 = vmatmul.mubr.msk.bf16.vlgmr.msra.gmra.mxu1 %vm447_vm3, %v1806_v32  ;;  %v501_v14 = vand.u32 %v1611_v7, %v1773_v10  ;;  %v1593_v22 = vcombine.high %v260_v15, %v268_v17  ;;  %v1595_v23 = vcombine.high %v261_v18, %v269_v19 }
  0x20   : > { %602 = vmatpush1.bf16.msra.mxu0 %v468_v44  ;;  %645 = vmatpush1.bf16.msra.mxu1 %v474_v45  ;;  %v492_v20 = vand.u32 %v1608_v9, %v1773_v10  ;;  %v498_v21 = vand.u32 %v1610_v13, %v1773_v10  ;;  %v1592_v24 = vcombine.low %v260_v15, %v268_v17 }
  0x21   : > { %603 = vmatprep.subr.bf16.mxu0 %v1585_v46  ;;  %646 = vmatprep.subr.bf16.mxu1 %v1587_v48  ;;  %v1594_v25 = vcombine.low %v261_v18, %v269_v19 }
  0x22   : > { %621 = vmatprep.mubr.bf16.mxu0 %v1704_v16  ;;  %664 = vmatprep.mubr.bf16.mxu1 %v1704_v16 }
  0x24   : > { %604 = vmatpush1.bf16.msra.mxu0 %v1584_v50  ;;  %647 = vmatpush1.bf16.msra.mxu1 %v1586_v53 }
  0x25   : > { %687 = vmatprep.subr.bf16.mxu0 %v483_v54  ;;  %730 = vmatprep.subr.bf16.mxu1 %v489_v58 }
  0x27   : > { %1614 = vmatmul.mubr.msk.bf16.vlgmr.msra.gmra.mxu0 %vm447_vm3, %v1806_v32  ;;  %1615 = vmatmul.mubr.msk.bf16.vlgmr.msra.gmra.mxu1 %vm447_vm3, %v1806_v32 }
  0x28   : > { %688 = vmatpush1.bf16.msra.mxu0 %v480_v1  ;;  %731 = vmatpush1.bf16.msra.mxu1 %v486_v3 }
  0x29   : > { %689 = vmatprep.subr.bf16.mxu0 %v1589_v4  ;;  %732 = vmatprep.subr.bf16.mxu1 %v1591_v6 }
  0x2a   : > { %707 = vmatprep.mubr.bf16.mxu0 %v1704_v16  ;;  %750 = vmatprep.mubr.bf16.mxu1 %v1704_v16 }
  0x2c   : > { %690 = vmatpush1.bf16.msra.mxu0 %v1588_v8  ;;  %733 = vmatpush1.bf16.msra.mxu1 %v1590_v11 }
  0x2d   : > { %773 = vmatprep.subr.bf16.mxu0 %v495_v12  ;;  %816 = vmatprep.subr.bf16.mxu1 %v501_v14 }
  0x2f   : > { %1616 = vmatmul.mubr.msk.bf16.vlgmr.msra.gmra.mxu0 %vm447_vm3, %v1806_v32  ;;  %1617 = vmatmul.mubr.msk.bf16.vlgmr.msra.gmra.mxu1 %vm447_vm3, %v1806_v32 }
  0x30   : > { %774 = vmatpush1.bf16.msra.mxu0 %v492_v20  ;;  %817 = vmatpush1.bf16.msra.mxu1 %v498_v21 }
  0x31   : > { %775 = vmatprep.subr.bf16.mxu0 %v1593_v22  ;;  %818 = vmatprep.subr.bf16.mxu1 %v1595_v23 }
  0x32   : > { %793 = vmatprep.mubr.bf16.mxu0 %v1704_v16  ;;  %836 = vmatprep.mubr.bf16.mxu1 %v1704_v16 }
  0x34   : > { %776 = vmatpush1.bf16.msra.mxu0 %v1592_v24  ;;  %819 = vmatpush1.bf16.msra.mxu1 %v1594_v25 }
  0x37   : > { %1618 = vmatmul.mubr.msk.bf16.vlgmr.msra.gmra.mxu0 %vm447_vm3, %v1806_v32  ;;  %1619 = vmatmul.mubr.msk.bf16.vlgmr.msra.gmra.mxu1 %vm447_vm3, %v1806_v32 }
  0x95   : > { %v1908_v10 = vpop.permute.xlu0 %290 }
  0x99   : > { %v1912_v31 = vpop.permute.xlu0 %295 }
  0xdf   : > { %v537_v26 = vpop.f32.mrf.mxu0  ;;  %v580_v28 = vpop.f32.mrf.mxu1 }
  0xe0   : > { %v538_v27 = vadd.f32 %v537_v26, %v1908_v10  ;;  %v581_v29 = vadd.f32 %v580_v28, %v1908_v10 }
  0xe1   : > { %v539_v30 = vpop.f32.mrf.mxu0  ;;  %v582_v34 = vpop.f32.mrf.mxu1 }
  0xe2   : > { %v1914_v16 = vmax.f32 %v538_v27, 0.0  ;;  %v540_v33 = vadd.f32 %v539_v30, %v1908_v10  ;;  %v1917_v35 = vmax.f32 %v581_v29, 0.0  ;;  %v583_v32 = vadd.f32 %v582_v34, %v1908_v10 }
  0xe3   : > { %v541_v36 = vpop.f32.mrf.mxu0  ;;  %v584_v39 = vpop.f32.mrf.mxu1 }
  0xe4   : > { %v1920_v37 = vmax.f32 %v540_v33, 0.0  ;;  %v542_v38 = vadd.f32 %v541_v36, %v1912_v31  ;;  %v1923_v40 = vmax.f32 %v583_v32, 0.0  ;;  %v585_v41 = vadd.f32 %v584_v39, %v1912_v31 }
  0xe5   : > { %v543_v42 = vpop.f32.mrf.mxu0  ;;  %v586_v45 = vpop.f32.mrf.mxu1 }
  0xe6   : > { %v1926_v43 = vmax.f32 %v542_v38, 0.0  ;;  %v544_v44 = vadd.f32 %v543_v42, %v1912_v31  ;;  %v1929_v46 = vmax.f32 %v585_v41, 0.0  ;;  %v587_v47 = vadd.f32 %v586_v45, %v1912_v31 }
  0xe7   : > { %v623_v48 = vpop.f32.mrf.mxu0  ;;  %v666_v51 = vpop.f32.mrf.mxu1 }
  0xe8   : > { %v1932_v49 = vmax.f32 %v544_v44, 0.0  ;;  %v624_v50 = vadd.f32 %v623_v48, %v1908_v10  ;;  %v1935_v52 = vmax.f32 %v587_v47, 0.0  ;;  %v667_v53 = vadd.f32 %v666_v51, %v1908_v10 }
  0xe9   : > { %v625_v54 = vpop.f32.mrf.mxu0  ;;  %v668_v57 = vpop.f32.mrf.mxu1 }
  0xea   : > { %v1938_v55 = vmax.f32 %v624_v50, 0.0  ;;  %v626_v56 = vadd.f32 %v625_v54, %v1908_v10  ;;  %v1941_v58 = vmax.f32 %v667_v53, 0.0  ;;  %v669_v59 = vadd.f32 %v668_v57, %v1908_v10 }
  0xeb   : > { %v627_v60 = vpop.f32.mrf.mxu0  ;;  %v670_v63 = vpop.f32.mrf.mxu1 }
  0xec   : > { %v1944_v61 = vmax.f32 %v626_v56, 0.0  ;;  %v628_v62 = vadd.f32 %v627_v60, %v1912_v31  ;;  %v1947_v0 = vmax.f32 %v669_v59, 0.0  ;;  %v671_v1 = vadd.f32 %v670_v63, %v1912_v31 }
  0xed   : > { %v629_v2 = vpop.f32.mrf.mxu0  ;;  %v672_v5 = vpop.f32.mrf.mxu1 }
  0xee   : > { %v1950_v3 = vmax.f32 %v628_v62, 0.0  ;;  %v630_v4 = vadd.f32 %v629_v2, %v1912_v31  ;;  %v1953_v6 = vmax.f32 %v671_v1, 0.0  ;;  %v673_v7 = vadd.f32 %v672_v5, %v1912_v31 }
  0xef   : > { %v709_v8 = vpop.f32.mrf.mxu0  ;;  %v752_v12 = vpop.f32.mrf.mxu1 }
  0xf0   : > { %v1956_v9 = vmax.f32 %v630_v4, 0.0  ;;  %v710_v11 = vadd.f32 %v709_v8, %v1908_v10  ;;  %v1959_v13 = vmax.f32 %v673_v7, 0.0  ;;  %v753_v14 = vadd.f32 %v752_v12, %v1908_v10 }
  0xf1   : > { %v711_v15 = vpop.f32.mrf.mxu0  ;;  %v754_v19 = vpop.f32.mrf.mxu1 }
  0xf2   : > { %v1962_v17 = vmax.f32 %v710_v11, 0.0  ;;  %v712_v18 = vadd.f32 %v711_v15, %v1908_v10  ;;  %v1965_v20 = vmax.f32 %v753_v14, 0.0  ;;  %v755_v21 = vadd.f32 %v754_v19, %v1908_v10 }
  0xf3   : > { %v713_v22 = vpop.f32.mrf.mxu0  ;;  %v756_v25 = vpop.f32.mrf.mxu1 }
  0xf4   : > { %v1968_v23 = vmax.f32 %v712_v18, 0.0  ;;  %v714_v24 = vadd.f32 %v713_v22, %v1912_v31  ;;  %v1971_v26 = vmax.f32 %v755_v21, 0.0  ;;  %v757_v27 = vadd.f32 %v756_v25, %v1912_v31 }
  0xf5   : > { %v715_v28 = vpop.f32.mrf.mxu0  ;;  %v758_v33 = vpop.f32.mrf.mxu1 }
  0xf6   : > { %v1974_v29 = vmax.f32 %v714_v24, 0.0  ;;  %v716_v30 = vadd.f32 %v715_v28, %v1912_v31  ;;  %v1977_v34 = vmax.f32 %v757_v27, 0.0  ;;  %v759_v32 = vadd.f32 %v758_v33, %v1912_v31 }
  0xf7   : > { %v795_v36 = vpop.f32.mrf.mxu0  ;;  %v838_v41 = vpop.f32.mrf.mxu1 }
  0xf8   : > { %v1980_v38 = vmax.f32 %v716_v30, 0.0  ;;  %v796_v39 = vadd.f32 %v795_v36, %v1908_v10  ;;  %v1983_v42 = vmax.f32 %v759_v32, 0.0  ;;  %v839_v44 = vadd.f32 %v838_v41, %v1908_v10 }
  0xf9   : > { %v797_v45 = vpop.f32.mrf.mxu0  ;;  %v840_v50 = vpop.f32.mrf.mxu1 }
  0xfa   : > { %v1986_v47 = vmax.f32 %v796_v39, 0.0  ;;  %v798_v48 = vadd.f32 %v797_v45, %v1908_v10  ;;  %v1989_v51 = vmax.f32 %v839_v44, 0.0  ;;  %v841_v53 = vadd.f32 %v840_v50, %v1908_v10 }
  0xfb   : > { %v799_v54 = vpop.f32.mrf.mxu0  ;;  %v842_v59 = vpop.f32.mrf.mxu1 }
  0xfc   : > { %v1992_v56 = vmax.f32 %v798_v48, 0.0  ;;  %v800_v57 = vadd.f32 %v799_v54, %v1912_v31  ;;  %v1995_v60 = vmax.f32 %v841_v53, 0.0  ;;  %v843_v62 = vadd.f32 %v842_v59, %v1912_v31  ;;  %881 = sbr.rel (%p1620_p5) target bundleno = 443 (0x1bb), region = 48 }
  0xfd   : > { %v801_v63 = vpop.f32.mrf.mxu0  ;;  %v844_v4 = vpop.f32.mrf.mxu1 }
  0xfe   : > { %v1998_v1 = vmax.f32 %v800_v57, 0.0  ;;  %v802_v2 = vadd.f32 %v801_v63, %v1912_v31  ;;  %v2001_v5 = vmax.f32 %v843_v62, 0.0  ;;  %v845_v10 = vadd.f32 %v844_v4, %v1912_v31 }
 0x100   : > { %v2004_v7 = vmax.f32 %v802_v2, 0.0  ;;  %v2006_v8 = vmax.f32 %v845_v10, 0.0 }
 0x101   : > { %v882_v11 = vlaneseq  ;;  %v1232_v21 = vmul.f32 %v1914_v16, %v1914_v16  ;;  %v1233_v22 = vmul.f32 %v1920_v37, %v1920_v37  ;;  %v1235_v31 = vmul.f32 %v1923_v40, %v1923_v40 }
 0x102   : > { %v1248_v24 = vmul.f32 %v1926_v43, %v1926_v43  ;;  %v1249_v25 = vmul.f32 %v1932_v49, %v1932_v49  ;;  %v1251_v27 = vmul.f32 %v1935_v52, %v1935_v52  ;;  %v1705_v28 = vmov 0.0  }
 0x103   : > { %v883_v12 = vand.u32 127, %v882_v11  ;;  %v1234_v33 = vmul.f32 %v1917_v35, %v1917_v35  ;;  %v1250_v32 = vmul.f32 %v1929_v46, %v1929_v46  ;;  %v1296_v44 = vadd.f32 %v1233_v22, %v1232_v21 }
 0x104   : > { %v1313_v45 = vadd.f32 %v1249_v25, %v1248_v24  ;;  %v1236_v48 = vmul.f32 %v1938_v55, %v1938_v55  ;;  %v1237_v50 = vmul.f32 %v1944_v61, %v1944_v61  ;;  %v1252_v53 = vmul.f32 %v1950_v3, %v1950_v3 }
 0x105   : > { %v886_v14 = vadd.s32 384, %v883_v12  ;;  %v890_v15 = vadd.s32 896, %v883_v12  ;;  %v894_v36 = vadd.s32 1408, %v883_v12  ;;  %v1297_v54 = vadd.f32 %v1296_v44, %v1234_v33 }
 0x106   : > { %v1314_v57 = vadd.f32 %v1313_v45, %v1250_v32  ;;  %v1191_v62 = vadd.f32 %v1920_v37, %v1914_v16  ;;  %v1239_v4 = vmul.f32 %v1947_v0, %v1947_v0  ;;  %v1255_v10 = vmul.f32 %v1959_v13, %v1959_v13 }
 0x107   : > { %v925_v18 = vand.u32 511, %v886_v14  ;;  %v953_v19 = vand.u32 511, %v890_v15  ;;  %v981_v63 = vand.u32 511, %v894_v36  ;;  %v1254_v24 = vmul.f32 %v1953_v6, %v1953_v6 }
 0x108   : > { %v1192_v15 = vadd.f32 %v1191_v62, %v1917_v35  ;;  %v1241_v33 = vmul.f32 %v1968_v23, %v1968_v23  ;;  %v898_v45 = vadd.s32 1920, %v883_v12  ;;  %v1256_v62 = vmul.f32 %v1974_v29, %v1974_v29 }
 0x109   : > { %vm1112_vm4 = vcmp.lt.s32.totalorder %v925_v18, 392  ;;  %vm1116_vm5 = vcmp.lt.s32.totalorder %v953_v19, 392  ;;  %v1253_v18 = vmul.f32 %v1956_v9, %v1956_v9  ;;  %v1238_v19 = vmul.f32 %v1941_v58, %v1941_v58 }
 0x10a   : > { %v1621_v30 = vsel %vm1112_vm4, 1.0, %v1705_v28  ;;  %v1622_v2 = vsel %vm1116_vm5, 1.0, %v1705_v28  ;;  %vm2047_vm6 = vcmp.lt.s32.totalorder %v981_v63, 392  ;;  %v1243_v12 = vmul.f32 %v1971_v26, %v1971_v26 }
 0x10b   : > { %v1267_v39 = vmul.f32 %v1621_v30, %v1235_v31  ;;  %v1283_v41 = vmul.f32 %v1621_v30, %v1251_v27  ;;  %v1162_v59 = vmul.f32 %v1621_v30, %v1923_v40  ;;  %v1240_v27 = vmul.f32 %v1962_v17, %v1962_v17 }
 0x10c   : > { %v1271_v32 = vmul.f32 %v1622_v2, %v1239_v4  ;;  %v1287_v36 = vmul.f32 %v1622_v2, %v1255_v10  ;;  %vm1227_vm8 = vcmask 7168  }
 0x10d   : > { %v1298_v11 = vadd.f32 %v1297_v54, %v1267_v39  ;;  %v1315_v14 = vadd.f32 %v1314_v57, %v1283_v41  ;;  %v1193_v31 = vadd.f32 %v1192_v15, %v1162_v59  ;;  %v1208_v54 = vadd.f32 %v1932_v49, %v1926_v43 }
 0x10f   : > { %v1299_v21 = vadd.f32 %v1298_v11, %v1236_v48  ;;  %v1316_v22 = vadd.f32 %v1315_v14, %v1252_v53  ;;  %v1194_v41 = vadd.f32 %v1193_v31, %v1938_v55  ;;  %v1166_v48 = vmul.f32 %v1622_v2, %v1947_v0 }
 0x110   : > { %v1178_v53 = vmul.f32 %v1621_v30, %v1935_v52  ;;  %v1257_v30 = vmul.f32 %v1980_v38, %v1980_v38  ;;  %v1209_v4 = vadd.f32 %v1208_v54, %v1929_v46  ;;  %v1259_v14 = vmul.f32 %v1983_v42, %v1983_v42 }
 0x111   : > { %v1300_v39 = vadd.f32 %v1299_v21, %v1237_v50  ;;  %v1317_v44 = vadd.f32 %v1316_v22, %v1253_v18  ;;  %v1195_v59 = vadd.f32 %v1194_v41, %v1944_v61  ;;  %v1623_v50 = vsel %vm2047_vm6, 1.0, %v1705_v28 }
 0x112   : > { %v1009_v18 = vand.u32 511, %v898_v45  ;;  %v1210_v21 = vadd.f32 %v1209_v4, %v1178_v53  ;;  %v1291_v45 = vmul.f32 %v1623_v50, %v1259_v14  ;;  %v1170_v53 = vmul.f32 %v1623_v50, %v1971_v26 }
 0x113   : > { %v1301_v57 = vadd.f32 %v1300_v39, %v1238_v19  ;;  %v1318_v63 = vadd.f32 %v1317_v44, %v1254_v24  ;;  %v1196_v11 = vadd.f32 %v1195_v59, %v1941_v58  ;;  %v1242_v19 = vmul.f32 %v1965_v20, %v1965_v20 }
 0x114   : > { %v1258_v24 = vmul.f32 %v1977_v34, %v1977_v34  ;;  %v1275_v39 = vmul.f32 %v1623_v50, %v1243_v12  ;;  %v1211_v41 = vadd.f32 %v1210_v21, %v1950_v3  ;;  %vm1124_vm7 = vcmp.lt.s32.totalorder %v1009_v18, 392 }
 0x115   : > { %v1302_v10 = vadd.f32 %v1301_v57, %v1271_v32  ;;  %v1319_v15 = vadd.f32 %v1318_v63, %v1287_v36  ;;  %v1197_v31 = vadd.f32 %v1196_v11, %v1166_v48  ;;  %v1244_v32 = vmul.f32 %v1986_v47, %v1986_v47 }
 0x116   : > { %v1212_v48 = vadd.f32 %v1211_v41, %v1956_v9  ;;  %v1247_v12 = vmul.f32 %v1995_v60, %v1995_v60  ;;  %v1624_v14 = vsel %vm1124_vm7, 1.0, %v1705_v28  ;;  %v1262_v18 = vmul.f32 %v2001_v5, %v2001_v5 }
 0x117   : > { %v1303_v22 = vadd.f32 %v1302_v10, %v1240_v27  ;;  %v1320_v25 = vadd.f32 %v1319_v15, %v1256_v62  ;;  %v1198_v36 = vadd.f32 %v1197_v31, %v1962_v17  ;;  %v1182_v27 = vmul.f32 %v1622_v2, %v1959_v13 }
 0x118   : > { %v1260_v62 = vmul.f32 %v1998_v1, %v1998_v1  ;;  %v1261_v10 = vmul.f32 %v2004_v7, %v2004_v7  ;;  %v1246_v15 = vmul.f32 %v1989_v51, %v1989_v51  ;;  %v1263_v31 = vmul.f32 %v2006_v8, %v2006_v8 }
 0x119   : > { %v1304_v44 = vadd.f32 %v1303_v22, %v1241_v33  ;;  %v1321_v54 = vadd.f32 %v1320_v25, %v1257_v30  ;;  %v1199_v59 = vadd.f32 %v1198_v36, %v1968_v23  ;;  %v1245_v33 = vmul.f32 %v1992_v56, %v1992_v56 }
 0x11a   : > { %v1213_v30 = vadd.f32 %v1212_v48, %v1953_v6  ;;  %v1174_v36 = vmul.f32 %v1624_v14, %v1995_v60 }
 0x11b   : > { %v1305_v57 = vadd.f32 %v1304_v44, %v1242_v19  ;;  %v1322_v63 = vadd.f32 %v1321_v54, %v1258_v24  ;;  %v1200_v2 = vadd.f32 %v1199_v59, %v1965_v20 }
 0x11c   : > { %v1214_v19 = vadd.f32 %v1213_v30, %v1182_v27 }
 0x11d   : > { %v1306_v4 = vadd.f32 %v1305_v57, %v1275_v39  ;;  %v1323_v11 = vadd.f32 %v1322_v63, %v1291_v45  ;;  %v1201_v22 = vadd.f32 %v1200_v2, %v1170_v53  ;;  %v1279_v39 = vmul.f32 %v1624_v14, %v1247_v12 }
 0x11e   : > { %v1215_v25 = vadd.f32 %v1214_v19, %v1974_v29  ;;  %v1186_v45 = vmul.f32 %v1623_v50, %v1983_v42  ;;  %v1295_v53 = vmul.f32 %v1624_v14, %v1263_v31  ;;  %v1190_v50 = vmul.f32 %v1624_v14, %v2006_v8  ;;  %v1158_v14 = vld [vmem:[#allocation2 + $0x8] sm:$0xff] }
 0x11f   : > { %v1307_v21 = vadd.f32 %v1306_v4, %v1244_v32  ;;  %v1324_v24 = vadd.f32 %v1323_v11, %v1260_v62  ;;  %v1202_v44 = vadd.f32 %v1201_v22, %v1986_v47  ;;  %v1230_v11 = vld [vmem:[#allocation3] sm:$0xff]  ;;  %v1231_v22 = vld [vmem:[#allocation3 + $0x8] sm:$0xff] }
 0x120   : > { %v1216_v54 = vadd.f32 %v1215_v25, %v1980_v38 }
 0x121   : > { %v1308_v41 = vadd.f32 %v1307_v21, %v1245_v33  ;;  %v1325_v28 = vadd.f32 %v1324_v24, %v1261_v10  ;;  %v1203_v32 = vadd.f32 %v1202_v44, %v1992_v56 }
 0x122   : > { %v1217_v57 = vadd.f32 %v1216_v54, %v1977_v34 }
 0x123   : > { %v1309_v27 = vadd.f32 %v1308_v41, %v1246_v15  ;;  %v1326_v48 = vadd.f32 %v1325_v28, %v1262_v18  ;;  %v1204_v62 = vadd.f32 %v1203_v32, %v1989_v51  ;;  %v1157_v18 = vld [vmem:[#allocation2] sm:$0xff] }
 0x124   : > { %v1218_v63 = vadd.f32 %v1217_v57, %v1186_v45 }
 0x125   : > { %v1310_v59 = vadd.f32 %v1309_v27, %v1279_v39  ;;  %v1205_v33 = vadd.f32 %v1204_v62, %v1174_v36  ;;  %v1327_v12 = vadd.f32 %v1326_v48, %v1295_v53 }
 0x126   : > { %v1219_v30 = vadd.f32 %v1218_v63, %v1998_v1 }
 0x127   : > { %1311 = vadd.xlane.f32.xlu1 %v1310_v59  ;;  %1206 = vadd.xlane.f32.xlu0 %v1205_v33 }
 0x128   : > { %v1220_v4 = vadd.f32 %v1219_v30, %v2004_v7 }
 0x12a   : > { %v1221_v2 = vadd.f32 %v1220_v4, %v2001_v5 }
 0x12b   : > { %1328 = vadd.xlane.f32.xlu1 %v1327_v12 }
 0x12c   : > { %v1222_v10 = vadd.f32 %v1221_v2, %v1190_v50 }
 0x12e   : > { %1223 = vadd.xlane.f32.xlu0 %v1222_v10 }
 0x1b0   : > { %v1312_v15 = vpop.xlane.xlu1 %1311  ;;  %v1207_v21 = vpop.xlane.xlu0 %1206 }
 0x1b1   : > { %v1330_v19 = vadd.f32 %v1312_v15, %v1230_v11  ;;  %v1225_v31 = vadd.f32 %v1207_v21, %v1157_v18 }
 0x1b3   : > { %1332 = vst.msk [vmem:[#allocation3] sm:$0xff] %vm1227_vm8, %v1330_v19  ;;  %1228 = vst.msk [vmem:[#allocation2] sm:$0xff] %vm1227_vm8, %v1225_v31 }
 0x1b4   : > { %v1329_v24 = vpop.xlane.xlu1 %1328 }
 0x1b5   : > { %v1331_v25 = vadd.f32 %v1329_v24, %v1231_v22 }
 0x1b7   : > { %1333 = vst.msk [vmem:[#allocation3 + $0x8] sm:$0xff] %vm1227_vm8, %v1331_v25  ;;  %v1224_v39 = vpop.xlane.xlu0 %1223 }
 0x1b8   : > { %v1226_v41 = vadd.f32 %v1224_v39, %v1158_v14 }
 0x1ba   : > { %1229 = vst.msk [vmem:[#allocation2 + $0x8] sm:$0xff] %vm1227_vm8, %v1226_v41 }
 0x1bb PF: > { %p1334_p6 = scmp.eq.s32.totalorder %s1692_s18, 1 }
 0x1bc   : > { %v1339_v44 = vld [vmem:[#allocation2] sm:$0xff] (%p1334_p6)  ;;  %v1343_v28 = vld [vmem:[#allocation3] sm:$0xff] (%p1334_p6)  ;;  %v1352_v30 = vld [vmem:[%s2217_s3 + $0x8] sm:$0xff] (%p1334_p6)  ;;  %vm1359_vm9 = vcmask (%p1334_p6), 7168  }
 0x1bd   : > { %1338 = sbr.rel (!%p1334_p6) target bundleno = 479 (0x1df), region = 52  ;;  %v1341_v36 = vmul.f32 (%p1334_p6), 0.0006377551, %v1339_v44  ;;  %v1345_v45 = vmul.f32 (%p1334_p6), 0.0006377551, %v1343_v28  ;;  %v1351_v12 = vld [vmem:[%s2217_s3] sm:$0xff] (%p1334_p6) }
 0x1be   : > { %v1344_v27 = vld [vmem:[#allocation3 + $0x8] sm:$0xff] (%p1334_p6)  ;;  %v1362_v11 = vld [vmem:[%s2218_s4] sm:$0xff] (%p1334_p6)  ;;  %v1363_v18 = vld [vmem:[%s2218_s4 + $0x8] sm:$0xff] (%p1334_p6) }
 0x1bf   : > { %v1346_v53 = vmul.f32 (%p1334_p6), 0.0006377551, %v1344_v27  ;;  %v1347_v48 = vmul.f32 (%p1334_p6), %v1341_v36, %v1341_v36 }
 0x1c1   : > { %v1340_v54 = vld [vmem:[#allocation2 + $0x8] sm:$0xff] (%p1334_p6)  ;;  %v1349_v59 = vsub.f32 (%p1334_p6), %v1345_v45, %v1347_v48 }
 0x1c2   : > { %v1342_v32 = vmul.f32 0.0006377551, %v1340_v54 }
 0x1c3   : > { %v1353_v63 = vadd.f32 1e-05, %v1349_v59 }
 0x1c4   : > { %v1348_v57 = vmul.f32 %v1342_v32, %v1342_v32 }
 0x1c5   : > { %1672 = vrsqrt.f32 %v1353_v63 }
 0x1c6   : > { %v1350_v62 = vsub.f32 %v1346_v53, %v1348_v57 }
 0x1c8   : > { %v1354_v33 = vadd.f32 1e-05, %v1350_v62 }
 0x1ca   : > { %1674 = vrsqrt.f32 %v1354_v33 }
 0x1d2   : > { %v1673_v50 = vpop.eup %1672 }
 0x1d3   : > { %v1357_v2 = vmul.f32 %v1673_v50, %v1351_v12 }
 0x1d5   : > { %1360 = vst.msk [vmem:[#allocation4] sm:$0xff] %vm1359_vm9, %v1357_v2  ;;  %v1364_v15 = vmul.f32 %v1357_v2, %v1341_v36 }
 0x1d7   : > { %v1675_v4 = vpop.eup %1674  ;;  %v1366_v21 = vsub.f32 %v1362_v11, %v1364_v15 }
 0x1d8   : > { %v1358_v10 = vmul.f32 %v1675_v4, %v1352_v30 }
 0x1d9   : > { %1368 = vst.msk [vmem:[#allocation5] sm:$0xff] %vm1359_vm9, %v1366_v21 }
 0x1da   : > { %1361 = vst.msk [vmem:[#allocation4 + $0x8] sm:$0xff] %vm1359_vm9, %v1358_v10  ;;  %v1365_v19 = vmul.f32 %v1358_v10, %v1342_v32 }
 0x1dc   : > { %v1367_v22 = vsub.f32 %v1363_v18, %v1365_v19 }
 0x1de   : > { %1369 = vst.msk [vmem:[#allocation5 + $0x8] sm:$0xff] %vm1359_vm9, %v1367_v22 }
 0x1df PF: > { %p1626_p7 = scmp.ne.s32.totalorder %s1692_s18, 1 }
 0x1e1   : > { %1372 = sbr.rel (%p1626_p7) target bundleno = 627 (0x273), region = 56 }
 0x1e6   : > { %v1421_v31 = vld [vmem:[#allocation4] sm:$0xff]  ;;  %v1422_v24 = vld [vmem:[#allocation4 + $0x8] sm:$0xff]  ;;  %v1706_v25 = vmov 0   ;;  %v1462_v41 = vld [vmem:[#allocation5 + $0x8] sm:$0xff]  ;;  %v1373_v28 = vmax.f32 %v1914_v16, %v1938_v55  ;;  %v1381_v36 = vmax.f32 %v1962_v17, %v1986_v47  ;;  %v1374_v45 = vmax.f32 %v1920_v37, %v1944_v61 }
 0x1e7   : > { %1677 = vset.pattern.permute.xlu1 %v1706_v25  ;;  %1676 = vset.pattern.permute.xlu0 %v1706_v25  ;;  %vm1423_vm10 = vcmp.gt.f32.partialorder %v1421_v31, 0.0  ;;  %vm1424_vm11 = vcmp.gt.f32.partialorder %v1422_v24, 0.0  ;;  %v1461_v44 = vld [vmem:[#allocation5] sm:$0xff]  ;;  %v1375_v54 = vmax.f32 %v1917_v35, %v1941_v58  ;;  %v1376_v27 = vmax.f32 %v1923_v40, %v1947_v0 }
 0x1e8   : > { %1445 = vperm.xlu1 %1677, %v1421_v31   ;;  %v1425_v14 = vsel %vm1423_vm10, 1, %v1706_v25  ;;  %v1426_v39 = vsel %vm1424_vm11, 1, %v1706_v25  ;;  %v1382_v32 = vmax.f32 %v1968_v23, %v1992_v56  ;;  %v1383_v53 = vmax.f32 %v1965_v20, %v1989_v51 }
 0x1e9   : > { %1428 = vperm.xlu0 %1676, %v1425_v14   ;;  %v1384_v48 = vmax.f32 %v1971_v26, %v1995_v60  ;;  %v1389_v57 = vmax.f32 %v1373_v28, %v1381_v36  ;;  %v1397_v59 = vmin.f32 %v1914_v16, %v1938_v55  ;;  %v1398_v62 = vmin.f32 %v1920_v37, %v1944_v61 }
 0x1ea   : > { %v1399_v63 = vmin.f32 %v1917_v35, %v1941_v58  ;;  %v1400_v33 = vmin.f32 %v1923_v40, %v1947_v0  ;;  %v1405_v12 = vmin.f32 %v1962_v17, %v1986_v47  ;;  %v1406_v30 = vmin.f32 %v1968_v23, %v1992_v56 }
 0x1eb   : > { %v1407_v50 = vmin.f32 %v1965_v20, %v1989_v51  ;;  %v1408_v16 = vmin.f32 %v1971_v26, %v1995_v60  ;;  %v1377_v37 = vmax.f32 %v1926_v43, %v1950_v3  ;;  %v1378_v35 = vmax.f32 %v1932_v49, %v1956_v9 }
 0x1ec   : > { %1450 = vperm.xlu1 %1677, %v1422_v24   ;;  %v1379_v40 = vmax.f32 %v1929_v46, %v1953_v6  ;;  %v1380_v55 = vmax.f32 %v1935_v52, %v1959_v13  ;;  %v1385_v58 = vmax.f32 %v1974_v29, %v1998_v1  ;;  %v1386_v61 = vmax.f32 %v1980_v38, %v2004_v7 }
 0x1ed   : > { %1431 = vperm.xlu0 %1676, %v1426_v39   ;;  %v1387_v0 = vmax.f32 %v1977_v34, %v2001_v5  ;;  %v1388_v17 = vmax.f32 %v1983_v42, %v2006_v8  ;;  %v1401_v20 = vmin.f32 %v1926_v43, %v1950_v3  ;;  %v1402_v23 = vmin.f32 %v1932_v49, %v1956_v9 }
 0x1ee   : > { %v1403_v26 = vmin.f32 %v1929_v46, %v1953_v6  ;;  %v1404_v47 = vmin.f32 %v1935_v52, %v1959_v13  ;;  %v1409_v51 = vmin.f32 %v1974_v29, %v1998_v1  ;;  %v1410_v56 = vmin.f32 %v1980_v38, %v2004_v7 }
 0x1ef   : > { %v1411_v60 = vmin.f32 %v1977_v34, %v2001_v5  ;;  %v1412_v43 = vmin.f32 %v1983_v42, %v2006_v8  ;;  %v1390_v49 = vmax.f32 %v1374_v45, %v1382_v32  ;;  %v1391_v9 = vmax.f32 %v1375_v54, %v1383_v53 }
 0x1f0   : > { %1470 = vperm.xlu1 %1677, %v1462_v41   ;;  %v1392_v4 = vmax.f32 %v1376_v27, %v1384_v48  ;;  %v1413_v46 = vmin.f32 %v1397_v59, %v1405_v12  ;;  %v1414_v2 = vmin.f32 %v1398_v62, %v1406_v30  ;;  %v1415_v52 = vmin.f32 %v1399_v63, %v1407_v50 }
 0x1f1   : > { %1465 = vperm.xlu0 %1676, %v1461_v44   ;;  %v1416_v13 = vmin.f32 %v1400_v33, %v1408_v16  ;;  %v1393_v10 = vmax.f32 %v1377_v37, %v1385_v58  ;;  %v1394_v29 = vmax.f32 %v1378_v35, %v1386_v61  ;;  %v1395_v1 = vmax.f32 %v1379_v40, %v1387_v0 }
 0x1f2   : > { %v1396_v38 = vmax.f32 %v1380_v55, %v1388_v17  ;;  %v1417_v7 = vmin.f32 %v1401_v20, %v1409_v51  ;;  %v1418_v11 = vmin.f32 %v1402_v23, %v1410_v56  ;;  %v1419_v34 = vmin.f32 %v1403_v26, %v1411_v60 }
 0x1f3   : > { %v1420_v5 = vmin.f32 %v1404_v47, %v1412_v43 }
 0x263   : > { %v1446_v3 = vpop.permute.xlu1 %1445 }
 0x264   : > { %v1429_v6 = vpop.permute.xlu0 %1428 }
 0x265   : > { %vm1433_vm12 = vcmp.eq.s32.totalorder %v1429_v6, 1 }
 0x266   : > { %v1435_v42 = vsel %vm1433_vm12, %v1389_v57, %v1413_v46  ;;  %v1436_v18 = vsel %vm1433_vm12, %v1390_v49, %v1414_v2  ;;  %v1437_v19 = vsel %vm1433_vm12, %v1391_v9, %v1415_v52  ;;  %v1438_v21 = vsel %vm1433_vm12, %v1392_v4, %v1416_v13 }
 0x267   : > { %v1451_v15 = vpop.permute.xlu1 %1450  ;;  %v1453_v45 = vmul.f32 %v1446_v3, %v1435_v42  ;;  %v1454_v54 = vmul.f32 %v1446_v3, %v1436_v18  ;;  %v1455_v27 = vmul.f32 %v1446_v3, %v1437_v19  ;;  %v1456_v32 = vmul.f32 %v1446_v3, %v1438_v21 }
 0x268   : > { %v1432_v8 = vpop.permute.xlu0 %1431 }
 0x269   : > { %vm1434_vm13 = vcmp.eq.s32.totalorder %v1432_v8, 1 }
 0x26a   : > { %v1439_v22 = vsel %vm1434_vm13, %v1393_v10, %v1417_v7  ;;  %v1440_v31 = vsel %vm1434_vm13, %v1394_v29, %v1418_v11  ;;  %v1441_v24 = vsel %vm1434_vm13, %v1395_v1, %v1419_v34  ;;  %v1442_v25 = vsel %vm1434_vm13, %v1396_v38, %v1420_v5 }
 0x26b   : > { %v1471_v14 = vpop.permute.xlu1 %1470  ;;  %v1457_v39 = vmul.f32 %v1451_v15, %v1439_v22  ;;  %v1458_v41 = vmul.f32 %v1451_v15, %v1440_v31  ;;  %v1459_v44 = vmul.f32 %v1451_v15, %v1441_v24  ;;  %v1460_v28 = vmul.f32 %v1451_v15, %v1442_v25 }
 0x26c   : > { %v1466_v36 = vpop.permute.xlu0 %1465 }
 0x26d   : > { %v1477_v53 = vadd.f32 %v1471_v14, %v1457_v39  ;;  %v1478_v48 = vadd.f32 %v1471_v14, %v1458_v41  ;;  %v1479_v57 = vadd.f32 %v1471_v14, %v1459_v44  ;;  %v1480_v59 = vadd.f32 %v1471_v14, %v1460_v28 }
 0x26e   : > { %v1473_v62 = vadd.f32 %v1466_v36, %v1453_v45  ;;  %v1474_v63 = vadd.f32 %v1466_v36, %v1454_v54  ;;  %v1475_v33 = vadd.f32 %v1466_v36, %v1455_v27  ;;  %v1476_v12 = vadd.f32 %v1466_v36, %v1456_v32 }
 0x26f   : > { %v1639_v30 = vpack.c.bf16 %v1478_v48, %v1477_v53  ;;  %v1640_v50 = vpack.c.bf16 %v1480_v59, %v1479_v57 }
 0x270   : > { %v1637_v16 = vpack.c.bf16 %v1474_v63, %v1473_v62  ;;  %v1638_v37 = vpack.c.bf16 %v1476_v12, %v1475_v33 }
 0x271   : > { %1507 = vst [vmem:[%s2219_s5 + $0x10] sm:$0xff] %v1639_v30  ;;  %1508 = vst [vmem:[%s2219_s5 + $0x18] sm:$0xff] %v1640_v50 }
 0x272   : > { %1505 = vst [vmem:[%s2219_s5] sm:$0xff] %v1637_v16  ;;  %1506 = vst [vmem:[%s2219_s5 + $0x8] sm:$0xff] %v1638_v37 }
 0x273 PF: > { %s15_s20 = sadd.s32 1, %s1700_s20   ;;  %s2222_s18 = smov %s1696_s19 }
 0x274   : > { %p12_p8 = scmp.ge.s32.totalorder %s15_s20, 4   ;;  %s2223_s19 = smov %s2225_s21 }
 0x276   :  { %14 = sbr.rel (!%p12_p8) target bundleno = 2 (0x2), region = 86 }

// kernel: cnn_classif_bnorm_forward.5
= control target key start
LH: loop header
LB: loop body
LE: loop exit
PB: predicated region body
PF: predicated region fallthrough
CT: control target
= control target key end

     0   :  { %v1037_v3 = vmov 0   ;;  %vm248_vm0 = vcmask 261120   ;;  %vm780_vm1 = vcmask 15360   ;;  %vm782_vm2 = vcmask 9216   ;;  %s1736_s1 = inlined_call_operand.vmem [shape: f32[1568,2], index: 1, kind: input, shape index: {}]   ;;  %s1737_s0 = inlined_call_operand.vmem [shape: f32[10,1568], index: 0, kind: input, shape index: {}]   ;;  %s1738_s2 = inlined_call_operand.vmem [shape: f32[10,1], index: 2, kind: input, shape index: {}]   ;;  %s1739_s3 = inlined_call_operand.vmem [shape: f32[10,2], index: 3, kind: output, shape index: {}]  }
   0x1   :  { %v71_v0 = vld [vmem:[%s1736_s1 + $0xf8] sm:$0xff]  ;;  %1036 = vset.pattern.permute.xlu0 %v1037_v3  ;;  %v70_v5 = vld [vmem:[%s1736_s1 + $0xf0] sm:$0xff]  ;;  %v69_v9 = vld [vmem:[%s1736_s1 + $0xe8] sm:$0xff] }
   0x2   :  { %v103_v1 = vld [vmem:[%s1736_s1 + $0x1f8] sm:$0xff]  ;;  %790 = vmatprep.subr.mxu0 %v71_v0  ;;  %v102_v6 = vld [vmem:[%s1736_s1 + $0x1f0] sm:$0xff]  ;;  %v101_v10 = vld [vmem:[%s1736_s1 + $0x1e8] sm:$0xff] }
   0x3   :  { %v55_v2 = vld [vmem:[%s1736_s1 + $0x78] sm:$0xff]  ;;  %828 = vmatprep.subr.mxu1 %v103_v1  ;;  %v54_v7 = vld [vmem:[%s1736_s1 + $0x70] sm:$0xff]  ;;  %v53_v11 = vld [vmem:[%s1736_s1 + $0x68] sm:$0xff] }
   0x4   :  { %v87_v4 = vld [vmem:[%s1736_s1 + $0x178] sm:$0xff]  ;;  %791 = vmatpush3.msra.mxu0 %v55_v2  ;;  %v86_v8 = vld [vmem:[%s1736_s1 + $0x170] sm:$0xff]  ;;  %v85_v12 = vld [vmem:[%s1736_s1 + $0x168] sm:$0xff] }
   0x5   :  { %829 = vmatpush3.msra.mxu1 %v87_v4  ;;  %792 = vmatprep.subr.mxu0 %v70_v5  ;;  %v68_v13 = vld [vmem:[%s1736_s1 + $0xe0] sm:$0xff]  ;;  %v67_v17 = vld [vmem:[%s1736_s1 + $0xd8] sm:$0xff]  ;;  %v66_v21 = vld [vmem:[%s1736_s1 + $0xd0] sm:$0xff] }
   0x6   :  { %830 = vmatprep.subr.mxu1 %v102_v6  ;;  %793 = vmatpush3.msra.mxu0 %v54_v7  ;;  %v100_v14 = vld [vmem:[%s1736_s1 + $0x1e0] sm:$0xff]  ;;  %v99_v18 = vld [vmem:[%s1736_s1 + $0x1d8] sm:$0xff]  ;;  %v98_v22 = vld [vmem:[%s1736_s1 + $0x1d0] sm:$0xff] }
   0x7   :  { %831 = vmatpush3.msra.mxu1 %v86_v8  ;;  %794 = vmatprep.subr.mxu0 %v69_v9  ;;  %v52_v15 = vld [vmem:[%s1736_s1 + $0x60] sm:$0xff]  ;;  %v51_v19 = vld [vmem:[%s1736_s1 + $0x58] sm:$0xff]  ;;  %v50_v23 = vld [vmem:[%s1736_s1 + $0x50] sm:$0xff] }
   0x8   :  { %832 = vmatprep.subr.mxu1 %v101_v10  ;;  %v84_v16 = vld [vmem:[%s1736_s1 + $0x160] sm:$0xff]  ;;  %795 = vmatpush3.msra.mxu0 %v53_v11  ;;  %v83_v20 = vld [vmem:[%s1736_s1 + $0x158] sm:$0xff]  ;;  %v82_v24 = vld [vmem:[%s1736_s1 + $0x150] sm:$0xff] }
   0x9   :  { %833 = vmatpush3.msra.mxu1 %v85_v12  ;;  %796 = vmatprep.subr.mxu0 %v68_v13  ;;  %v65_v25 = vld [vmem:[%s1736_s1 + $0xc8] sm:$0xff]  ;;  %v64_v29 = vld [vmem:[%s1736_s1 + $0xc0] sm:$0xff]  ;;  %v63_v33 = vld [vmem:[%s1736_s1 + $0xb8] sm:$0xff] }
   0xa   :  { %834 = vmatprep.subr.mxu1 %v100_v14  ;;  %797 = vmatpush3.msra.mxu0 %v52_v15  ;;  %v97_v26 = vld [vmem:[%s1736_s1 + $0x1c8] sm:$0xff]  ;;  %v96_v30 = vld [vmem:[%s1736_s1 + $0x1c0] sm:$0xff]  ;;  %v95_v34 = vld [vmem:[%s1736_s1 + $0x1b8] sm:$0xff] }
   0xb   :  { %835 = vmatpush3.msra.mxu1 %v84_v16  ;;  %798 = vmatprep.subr.mxu0 %v67_v17  ;;  %v49_v27 = vld [vmem:[%s1736_s1 + $0x48] sm:$0xff]  ;;  %v48_v31 = vld [vmem:[%s1736_s1 + $0x40] sm:$0xff]  ;;  %v47_v35 = vld [vmem:[%s1736_s1 + $0x38] sm:$0xff] }
   0xc   :  { %836 = vmatprep.subr.mxu1 %v99_v18  ;;  %799 = vmatpush3.msra.mxu0 %v51_v19  ;;  %v81_v28 = vld [vmem:[%s1736_s1 + $0x148] sm:$0xff]  ;;  %v80_v32 = vld [vmem:[%s1736_s1 + $0x140] sm:$0xff]  ;;  %v79_v36 = vld [vmem:[%s1736_s1 + $0x138] sm:$0xff] }
   0xd   :  { %837 = vmatpush3.msra.mxu1 %v83_v20  ;;  %800 = vmatprep.subr.mxu0 %v66_v21  ;;  %v62_v37 = vld [vmem:[%s1736_s1 + $0xb0] sm:$0xff]  ;;  %v61_v41 = vld [vmem:[%s1736_s1 + $0xa8] sm:$0xff]  ;;  %v60_v45 = vld [vmem:[%s1736_s1 + $0xa0] sm:$0xff] }
   0xe   :  { %838 = vmatprep.subr.mxu1 %v98_v22  ;;  %801 = vmatpush3.msra.mxu0 %v50_v23  ;;  %v94_v38 = vld [vmem:[%s1736_s1 + $0x1b0] sm:$0xff]  ;;  %v93_v42 = vld [vmem:[%s1736_s1 + $0x1a8] sm:$0xff]  ;;  %v92_v46 = vld [vmem:[%s1736_s1 + $0x1a0] sm:$0xff] }
   0xf   :  { %839 = vmatpush3.msra.mxu1 %v82_v24  ;;  %802 = vmatprep.subr.mxu0 %v65_v25  ;;  %v46_v39 = vld [vmem:[%s1736_s1 + $0x30] sm:$0xff]  ;;  %v45_v43 = vld [vmem:[%s1736_s1 + $0x28] sm:$0xff]  ;;  %v44_v47 = vld [vmem:[%s1736_s1 + $0x20] sm:$0xff] }
  0x10   :  { %840 = vmatprep.subr.mxu1 %v97_v26  ;;  %803 = vmatpush3.msra.mxu0 %v49_v27  ;;  %v78_v40 = vld [vmem:[%s1736_s1 + $0x130] sm:$0xff]  ;;  %v77_v44 = vld [vmem:[%s1736_s1 + $0x128] sm:$0xff]  ;;  %v76_v48 = vld [vmem:[%s1736_s1 + $0x120] sm:$0xff] }
  0x11   :  { %841 = vmatpush3.msra.mxu1 %v81_v28  ;;  %804 = vmatprep.subr.mxu0 %v64_v29  ;;  %v59_v49 = vld [vmem:[%s1736_s1 + $0x98] sm:$0xff]  ;;  %v58_v53 = vld [vmem:[%s1736_s1 + $0x90] sm:$0xff]  ;;  %v57_v57 = vld [vmem:[%s1736_s1 + $0x88] sm:$0xff] }
  0x12   :  { %842 = vmatprep.subr.mxu1 %v96_v30  ;;  %805 = vmatpush3.msra.mxu0 %v48_v31  ;;  %v91_v50 = vld [vmem:[%s1736_s1 + $0x198] sm:$0xff]  ;;  %v90_v54 = vld [vmem:[%s1736_s1 + $0x190] sm:$0xff]  ;;  %v89_v58 = vld [vmem:[%s1736_s1 + $0x188] sm:$0xff] }
  0x13   :  { %843 = vmatpush3.msra.mxu1 %v80_v32  ;;  %806 = vmatprep.subr.mxu0 %v63_v33  ;;  %v43_v51 = vld [vmem:[%s1736_s1 + $0x18] sm:$0xff]  ;;  %v42_v55 = vld [vmem:[%s1736_s1 + $0x10] sm:$0xff]  ;;  %v41_v59 = vld [vmem:[%s1736_s1 + $0x8] sm:$0xff] }
  0x14   :  { %844 = vmatprep.subr.mxu1 %v95_v34  ;;  %807 = vmatpush3.msra.mxu0 %v47_v35  ;;  %v75_v52 = vld [vmem:[%s1736_s1 + $0x118] sm:$0xff]  ;;  %v74_v56 = vld [vmem:[%s1736_s1 + $0x110] sm:$0xff]  ;;  %v73_v60 = vld [vmem:[%s1736_s1 + $0x108] sm:$0xff] }
  0x15   :  { %845 = vmatpush3.msra.mxu1 %v79_v36  ;;  %808 = vmatprep.subr.mxu0 %v62_v37  ;;  %v56_v61 = vld [vmem:[%s1736_s1 + $0x80] sm:$0xff]  ;;  %v15_v0 = vld [vmem:[%s1737_s0 + $0x8] sm:$0xff]  ;;  %v17_v3 = vld [vmem:[%s1737_s0 + $0x18] sm:$0xff] }
  0x16   :  { %846 = vmatprep.subr.mxu1 %v94_v38  ;;  %809 = vmatpush3.msra.mxu0 %v46_v39  ;;  %v88_v62 = vld [vmem:[%s1736_s1 + $0x180] sm:$0xff]  ;;  %v135_v4 = vld [vmem:[%s1736_s1 + $0x2f8] sm:$0xff]  ;;  %v16_v6 = vld [vmem:[%s1737_s0 + $0x10] sm:$0xff] }
  0x17   :  { %847 = vmatpush3.msra.mxu1 %v78_v40  ;;  %810 = vmatprep.subr.mxu0 %v61_v41  ;;  %v40_v63 = vld [vmem:[%s1736_s1] sm:$0xff]  ;;  %v167_v5 = vld [vmem:[%s1736_s1 + $0x3f8] sm:$0xff]  ;;  %v134_v9 = vld [vmem:[%s1736_s1 + $0x2f0] sm:$0xff] }
  0x18   :  { %848 = vmatprep.subr.mxu1 %v93_v42  ;;  %811 = vmatpush3.msra.mxu0 %v45_v43  ;;  %v72_v1 = vld [vmem:[%s1736_s1 + $0x100] sm:$0xff]  ;;  %v119_v7 = vld [vmem:[%s1736_s1 + $0x278] sm:$0xff]  ;;  %v166_v10 = vld [vmem:[%s1736_s1 + $0x3f0] sm:$0xff] }
  0x19   :  { %849 = vmatpush3.msra.mxu1 %v77_v44  ;;  %812 = vmatprep.subr.mxu0 %v60_v45  ;;  %v14_v2 = vld [vmem:[%s1737_s0] sm:$0xff]  ;;  %v151_v8 = vld [vmem:[%s1736_s1 + $0x378] sm:$0xff]  ;;  %v118_v11 = vld [vmem:[%s1736_s1 + $0x270] sm:$0xff] }
  0x1a   :  { %850 = vmatprep.subr.mxu1 %v92_v46  ;;  %813 = vmatpush3.msra.mxu0 %v44_v47  ;;  %v150_v12 = vld [vmem:[%s1736_s1 + $0x370] sm:$0xff]  ;;  %v133_v13 = vld [vmem:[%s1736_s1 + $0x2e8] sm:$0xff]  ;;  %v132_v17 = vld [vmem:[%s1736_s1 + $0x2e0] sm:$0xff] }
  0x1b   :  { %851 = vmatpush3.msra.mxu1 %v76_v48  ;;  %814 = vmatprep.subr.mxu0 %v59_v49  ;;  %v165_v14 = vld [vmem:[%s1736_s1 + $0x3e8] sm:$0xff]  ;;  %v164_v18 = vld [vmem:[%s1736_s1 + $0x3e0] sm:$0xff]  ;;  %v131_v21 = vld [vmem:[%s1736_s1 + $0x2d8] sm:$0xff] }
  0x1c   :  { %852 = vmatprep.subr.mxu1 %v91_v50  ;;  %815 = vmatpush3.msra.mxu0 %v43_v51  ;;  %v117_v15 = vld [vmem:[%s1736_s1 + $0x268] sm:$0xff]  ;;  %v116_v19 = vld [vmem:[%s1736_s1 + $0x260] sm:$0xff]  ;;  %v163_v22 = vld [vmem:[%s1736_s1 + $0x3d8] sm:$0xff] }
  0x1d   :  { %853 = vmatpush3.msra.mxu1 %v75_v52  ;;  %816 = vmatprep.subr.mxu0 %v58_v53  ;;  %v149_v16 = vld [vmem:[%s1736_s1 + $0x368] sm:$0xff]  ;;  %v148_v20 = vld [vmem:[%s1736_s1 + $0x360] sm:$0xff]  ;;  %v115_v23 = vld [vmem:[%s1736_s1 + $0x258] sm:$0xff] }
  0x1e   :  { %854 = vmatprep.subr.mxu1 %v90_v54  ;;  %817 = vmatpush3.msra.mxu0 %v42_v55  ;;  %v147_v24 = vld [vmem:[%s1736_s1 + $0x358] sm:$0xff]  ;;  %v130_v25 = vld [vmem:[%s1736_s1 + $0x2d0] sm:$0xff]  ;;  %v129_v29 = vld [vmem:[%s1736_s1 + $0x2c8] sm:$0xff] }
  0x1f   :  { %855 = vmatpush3.msra.mxu1 %v74_v56  ;;  %818 = vmatprep.subr.mxu0 %v57_v57  ;;  %v162_v26 = vld [vmem:[%s1736_s1 + $0x3d0] sm:$0xff]  ;;  %v161_v30 = vld [vmem:[%s1736_s1 + $0x3c8] sm:$0xff]  ;;  %v128_v33 = vld [vmem:[%s1736_s1 + $0x2c0] sm:$0xff] }
  0x20   :  { %856 = vmatprep.subr.mxu1 %v89_v58  ;;  %819 = vmatpush3.msra.mxu0 %v41_v59  ;;  %v114_v27 = vld [vmem:[%s1736_s1 + $0x250] sm:$0xff]  ;;  %v113_v31 = vld [vmem:[%s1736_s1 + $0x248] sm:$0xff]  ;;  %v160_v34 = vld [vmem:[%s1736_s1 + $0x3c0] sm:$0xff] }
  0x21   :  { %857 = vmatpush3.msra.mxu1 %v73_v60  ;;  %820 = vmatprep.subr.mxu0 %v56_v61  ;;  %v146_v28 = vld [vmem:[%s1736_s1 + $0x350] sm:$0xff]  ;;  %v145_v32 = vld [vmem:[%s1736_s1 + $0x348] sm:$0xff]  ;;  %v112_v35 = vld [vmem:[%s1736_s1 + $0x240] sm:$0xff] }
  0x22   :  { %858 = vmatprep.subr.mxu1 %v88_v62  ;;  %821 = vmatpush3.msra.mxu0 %v40_v63  ;;  %v144_v36 = vld [vmem:[%s1736_s1 + $0x340] sm:$0xff]  ;;  %v127_v37 = vld [vmem:[%s1736_s1 + $0x2b8] sm:$0xff]  ;;  %v126_v41 = vld [vmem:[%s1736_s1 + $0x2b0] sm:$0xff] }
  0x23   :  { %319 = vmatprep.mubr.f32.mxu0 %v15_v0  ;;  %859 = vmatpush3.msra.mxu1 %v72_v1  ;;  %v159_v38 = vld [vmem:[%s1736_s1 + $0x3b8] sm:$0xff]  ;;  %v158_v42 = vld [vmem:[%s1736_s1 + $0x3b0] sm:$0xff]  ;;  %v125_v45 = vld [vmem:[%s1736_s1 + $0x2a8] sm:$0xff] }
  0x24   :  { %320 = vmatmul.mubr.f32.vlgmr.msra.gmra.mxu0 %v14_v2  ;;  %394 = vmatprep.mubr.f32.mxu1 %v17_v3  ;;  %v111_v39 = vld [vmem:[%s1736_s1 + $0x238] sm:$0xff]  ;;  %v110_v43 = vld [vmem:[%s1736_s1 + $0x230] sm:$0xff]  ;;  %v157_v46 = vld [vmem:[%s1736_s1 + $0x3a8] sm:$0xff] }
  0x25   :  { %866 = vmatprep.subr.mxu0 %v135_v4  ;;  %904 = vmatprep.subr.mxu1 %v167_v5  ;;  %v143_v40 = vld [vmem:[%s1736_s1 + $0x338] sm:$0xff]  ;;  %v142_v44 = vld [vmem:[%s1736_s1 + $0x330] sm:$0xff]  ;;  %v109_v47 = vld [vmem:[%s1736_s1 + $0x228] sm:$0xff] }
  0x26   :  { %395 = vmatmul.mubr.f32.vlgmr.msra.gmra.mxu1 %v16_v6  ;;  %867 = vmatpush3.msra.mxu0 %v119_v7  ;;  %v141_v48 = vld [vmem:[%s1736_s1 + $0x328] sm:$0xff]  ;;  %v124_v49 = vld [vmem:[%s1736_s1 + $0x2a0] sm:$0xff]  ;;  %v123_v53 = vld [vmem:[%s1736_s1 + $0x298] sm:$0xff] }
  0x27   :  { %905 = vmatpush3.msra.mxu1 %v151_v8  ;;  %868 = vmatprep.subr.mxu0 %v134_v9  ;;  %v156_v50 = vld [vmem:[%s1736_s1 + $0x3a0] sm:$0xff]  ;;  %v155_v54 = vld [vmem:[%s1736_s1 + $0x398] sm:$0xff]  ;;  %v28_v57 = vld [vmem:[%s1737_s0 + $0x70] sm:$0x3] }
  0x28   :  { %906 = vmatprep.subr.mxu1 %v166_v10  ;;  %869 = vmatpush3.msra.mxu0 %v118_v11  ;;  %v108_v51 = vld [vmem:[%s1736_s1 + $0x220] sm:$0xff]  ;;  %v107_v55 = vld [vmem:[%s1736_s1 + $0x218] sm:$0xff]  ;;  %v122_v58 = vld [vmem:[%s1736_s1 + $0x290] sm:$0xff] }
  0x29   :  { %907 = vmatpush3.msra.mxu1 %v150_v12  ;;  %870 = vmatprep.subr.mxu0 %v133_v13  ;;  %v140_v52 = vld [vmem:[%s1736_s1 + $0x320] sm:$0xff]  ;;  %v139_v56 = vld [vmem:[%s1736_s1 + $0x318] sm:$0xff]  ;;  %v154_v59 = vld [vmem:[%s1736_s1 + $0x390] sm:$0xff] }
  0x2a   :  { %908 = vmatprep.subr.mxu1 %v165_v14  ;;  %871 = vmatpush3.msra.mxu0 %v117_v15  ;;  %v27_v60 = vld [vmem:[%s1737_s0 + $0x68] sm:$0x3]  ;;  %v106_v61 = vld [vmem:[%s1736_s1 + $0x210] sm:$0xff]  ;;  %v30_v63 = vld [vmem:[%s1737_s0 + $0x80] sm:$0x3] }
  0x2b   :  { %909 = vmatpush3.msra.mxu1 %v149_v16  ;;  %872 = vmatprep.subr.mxu0 %v132_v17  ;;  %v138_v62 = vld [vmem:[%s1736_s1 + $0x310] sm:$0xff]  ;;  %v121_v0 = vld [vmem:[%s1736_s1 + $0x288] sm:$0xff]  ;;  %v29_v2 = vld [vmem:[%s1737_s0 + $0x78] sm:$0x3] }
  0x2c   :  { %910 = vmatprep.subr.mxu1 %v164_v18  ;;  %873 = vmatpush3.msra.mxu0 %v116_v19  ;;  %v153_v1 = vld [vmem:[%s1736_s1 + $0x388] sm:$0xff]  ;;  %v120_v5 = vld [vmem:[%s1736_s1 + $0x280] sm:$0xff]  ;;  %v21_v11 = vld [vmem:[%s1737_s0 + $0x38] sm:$0xff] }
  0x2d   :  { %911 = vmatpush3.msra.mxu1 %v148_v20  ;;  %874 = vmatprep.subr.mxu0 %v131_v21  ;;  %v105_v3 = vld [vmem:[%s1736_s1 + $0x208] sm:$0xff]  ;;  %v152_v6 = vld [vmem:[%s1736_s1 + $0x380] sm:$0xff]  ;;  %v199_v12 = vld [vmem:[%s1736_s1 + $0x4f8] sm:$0xff] }
  0x2e   :  { %912 = vmatprep.subr.mxu1 %v163_v22  ;;  %875 = vmatpush3.msra.mxu0 %v115_v23  ;;  %v137_v4 = vld [vmem:[%s1736_s1 + $0x308] sm:$0xff]  ;;  %v104_v7 = vld [vmem:[%s1736_s1 + $0x200] sm:$0xff]  ;;  %v231_v13 = vld [vmem:[%s1736_s1 + $0x5f8] sm:$0xff] }
  0x2f   :  { %913 = vmatpush3.msra.mxu1 %v147_v24  ;;  %876 = vmatprep.subr.mxu0 %v130_v25  ;;  %v19_v8 = vld [vmem:[%s1737_s0 + $0x28] sm:$0xff]  ;;  %v136_v9 = vld [vmem:[%s1736_s1 + $0x300] sm:$0xff]  ;;  %v20_v14 = vld [vmem:[%s1737_s0 + $0x30] sm:$0xff] }
  0x30   :  { %914 = vmatprep.subr.mxu1 %v162_v26  ;;  %877 = vmatpush3.msra.mxu0 %v114_v27  ;;  %v18_v10 = vld [vmem:[%s1737_s0 + $0x20] sm:$0xff]  ;;  %v183_v15 = vld [vmem:[%s1736_s1 + $0x478] sm:$0xff]  ;;  %v198_v17 = vld [vmem:[%s1736_s1 + $0x4f0] sm:$0xff] }
  0x31   :  { %915 = vmatpush3.msra.mxu1 %v146_v28  ;;  %878 = vmatprep.subr.mxu0 %v129_v29  ;;  %v215_v16 = vld [vmem:[%s1736_s1 + $0x578] sm:$0xff]  ;;  %v230_v18 = vld [vmem:[%s1736_s1 + $0x5f0] sm:$0xff]  ;;  %v31_v22 = vld [vmem:[%s1737_s0 + $0x88] sm:$0x3] }
  0x32   :  { %916 = vmatprep.subr.mxu1 %v161_v30  ;;  %879 = vmatpush3.msra.mxu0 %v113_v31  ;;  %v32_v19 = vld [vmem:[%s1737_s0 + $0x90] sm:$0x3]  ;;  %v197_v23 = vld [vmem:[%s1736_s1 + $0x4e8] sm:$0xff]  ;;  %v34_v25 = vld [vmem:[%s1737_s0 + $0xa0] sm:$0x3] }
  0x33   :  { %917 = vmatpush3.msra.mxu1 %v145_v32  ;;  %880 = vmatprep.subr.mxu0 %v128_v33  ;;  %v182_v20 = vld [vmem:[%s1736_s1 + $0x470] sm:$0xff]  ;;  %v229_v24 = vld [vmem:[%s1736_s1 + $0x5e8] sm:$0xff]  ;;  %v196_v28 = vld [vmem:[%s1736_s1 + $0x4e0] sm:$0xff] }
  0x34   :  { %918 = vmatprep.subr.mxu1 %v160_v34  ;;  %881 = vmatpush3.msra.mxu0 %v112_v35  ;;  %v214_v21 = vld [vmem:[%s1736_s1 + $0x570] sm:$0xff]  ;;  %v181_v26 = vld [vmem:[%s1736_s1 + $0x468] sm:$0xff]  ;;  %v33_v29 = vld [vmem:[%s1737_s0 + $0x98] sm:$0x3] }
  0x35   :  { %919 = vmatpush3.msra.mxu1 %v144_v36  ;;  %882 = vmatprep.subr.mxu0 %v127_v37  ;;  %v213_v27 = vld [vmem:[%s1736_s1 + $0x568] sm:$0xff]  ;;  %v228_v30 = vld [vmem:[%s1736_s1 + $0x5e0] sm:$0xff]  ;;  %v195_v33 = vld [vmem:[%s1736_s1 + $0x4d8] sm:$0xff] }
  0x36   :  { %920 = vmatprep.subr.mxu1 %v159_v38  ;;  %883 = vmatpush3.msra.mxu0 %v111_v39  ;;  %v180_v31 = vld [vmem:[%s1736_s1 + $0x460] sm:$0xff]  ;;  %v227_v34 = vld [vmem:[%s1736_s1 + $0x5d8] sm:$0xff]  ;;  %v194_v37 = vld [vmem:[%s1736_s1 + $0x4d0] sm:$0xff] }
  0x37   :  { %921 = vmatpush3.msra.mxu1 %v143_v40  ;;  %884 = vmatprep.subr.mxu0 %v126_v41  ;;  %v212_v32 = vld [vmem:[%s1736_s1 + $0x560] sm:$0xff]  ;;  %v179_v35 = vld [vmem:[%s1736_s1 + $0x458] sm:$0xff]  ;;  %v226_v38 = vld [vmem:[%s1736_s1 + $0x5d0] sm:$0xff] }
  0x38   :  { %922 = vmatprep.subr.mxu1 %v158_v42  ;;  %885 = vmatpush3.msra.mxu0 %v110_v43  ;;  %v211_v36 = vld [vmem:[%s1736_s1 + $0x558] sm:$0xff]  ;;  %v178_v39 = vld [vmem:[%s1736_s1 + $0x450] sm:$0xff]  ;;  %v193_v41 = vld [vmem:[%s1736_s1 + $0x4c8] sm:$0xff] }
  0x39   :  { %923 = vmatpush3.msra.mxu1 %v142_v44  ;;  %886 = vmatprep.subr.mxu0 %v125_v45  ;;  %v210_v40 = vld [vmem:[%s1736_s1 + $0x550] sm:$0xff]  ;;  %v225_v42 = vld [vmem:[%s1736_s1 + $0x5c8] sm:$0xff]  ;;  %v192_v45 = vld [vmem:[%s1736_s1 + $0x4c0] sm:$0xff] }
  0x3a   :  { %924 = vmatprep.subr.mxu1 %v157_v46  ;;  %887 = vmatpush3.msra.mxu0 %v109_v47  ;;  %v177_v43 = vld [vmem:[%s1736_s1 + $0x448] sm:$0xff]  ;;  %v224_v46 = vld [vmem:[%s1736_s1 + $0x5c0] sm:$0xff] }
  0x3b   :  { %925 = vmatpush3.msra.mxu1 %v141_v48  ;;  %888 = vmatprep.subr.mxu0 %v124_v49  ;;  %v209_v44 = vld [vmem:[%s1736_s1 + $0x548] sm:$0xff]  ;;  %v176_v47 = vld [vmem:[%s1736_s1 + $0x440] sm:$0xff]  ;;  %v191_v49 = vld [vmem:[%s1736_s1 + $0x4b8] sm:$0xff] }
  0x3c   :  { %926 = vmatprep.subr.mxu1 %v156_v50  ;;  %889 = vmatpush3.msra.mxu0 %v108_v51  ;;  %v208_v48 = vld [vmem:[%s1736_s1 + $0x540] sm:$0xff]  ;;  %v223_v50 = vld [vmem:[%s1736_s1 + $0x5b8] sm:$0xff] }
  0x3d   :  { %927 = vmatpush3.msra.mxu1 %v140_v52  ;;  %890 = vmatprep.subr.mxu0 %v123_v53  ;;  %v175_v51 = vld [vmem:[%s1736_s1 + $0x438] sm:$0xff]  ;;  %v190_v53 = vld [vmem:[%s1736_s1 + $0x4b0] sm:$0xff] }
  0x3e   :  { %928 = vmatprep.subr.mxu1 %v155_v54  ;;  %891 = vmatpush3.msra.mxu0 %v107_v55  ;;  %v207_v52 = vld [vmem:[%s1736_s1 + $0x538] sm:$0xff]  ;;  %v222_v54 = vld [vmem:[%s1736_s1 + $0x5b0] sm:$0xff] }
  0x3f   :  { %929 = vmatpush3.msra.mxu1 %v139_v56  ;;  %324 = vmatprep.mubr.f32.mxu0 %v28_v57  ;;  %v174_v55 = vld [vmem:[%s1736_s1 + $0x430] sm:$0xff]  ;;  %v189_v57 = vld [vmem:[%s1736_s1 + $0x4a8] sm:$0xff] }
  0x40   :  { %892 = vmatprep.subr.mxu0 %v122_v58  ;;  %930 = vmatprep.subr.mxu1 %v154_v59  ;;  %v206_v56 = vld [vmem:[%s1736_s1 + $0x530] sm:$0xff]  ;;  %v221_v58 = vld [vmem:[%s1736_s1 + $0x5a8] sm:$0xff] }
  0x41   :  { %325 = vmatmul.mubr.f32.gmra.mxu0 %v27_v60  ;;  %931 = vmatpush3.msra.mxu1 %v138_v62  ;;  %v173_v59 = vld [vmem:[%s1736_s1 + $0x428] sm:$0xff]  ;;  %v220_v62 = vld [vmem:[%s1736_s1 + $0x5a0] sm:$0xff] }
  0x42   :  { %893 = vmatpush3.msra.mxu0 %v106_v61  ;;  %399 = vmatprep.mubr.f32.mxu1 %v30_v63  ;;  %v205_v60 = vld [vmem:[%s1736_s1 + $0x528] sm:$0xff]  ;;  %v188_v61 = vld [vmem:[%s1736_s1 + $0x4a0] sm:$0xff] }
  0x43   :  { %894 = vmatprep.subr.mxu0 %v121_v0  ;;  %932 = vmatprep.subr.mxu1 %v153_v1  ;;  %v172_v63 = vld [vmem:[%s1736_s1 + $0x420] sm:$0xff]  ;;  %v187_v1 = vld [vmem:[%s1736_s1 + $0x498] sm:$0xff] }
  0x44   :  { %400 = vmatmul.mubr.f32.gmra.mxu1 %v29_v2  ;;  %895 = vmatpush3.msra.mxu0 %v105_v3  ;;  %v204_v0 = vld [vmem:[%s1736_s1 + $0x520] sm:$0xff]  ;;  %v219_v2 = vld [vmem:[%s1736_s1 + $0x598] sm:$0xff] }
  0x45   :  { %933 = vmatpush3.msra.mxu1 %v137_v4  ;;  %896 = vmatprep.subr.mxu0 %v120_v5  ;;  %v171_v3 = vld [vmem:[%s1736_s1 + $0x418] sm:$0xff]  ;;  %v186_v5 = vld [vmem:[%s1736_s1 + $0x490] sm:$0xff] }
  0x46   :  { %934 = vmatprep.subr.mxu1 %v152_v6  ;;  %897 = vmatpush3.msra.mxu0 %v104_v7  ;;  %v203_v4 = vld [vmem:[%s1736_s1 + $0x518] sm:$0xff]  ;;  %v218_v6 = vld [vmem:[%s1736_s1 + $0x590] sm:$0xff] }
  0x47   :  { %469 = vmatprep.mubr.f32.mxu0 %v19_v8  ;;  %935 = vmatpush3.msra.mxu1 %v136_v9  ;;  %v170_v7 = vld [vmem:[%s1736_s1 + $0x410] sm:$0xff]  ;;  %v185_v9 = vld [vmem:[%s1736_s1 + $0x488] sm:$0xff] }
  0x48   :  { %470 = vmatmul.mubr.f32.vlgmr.msra.gmra.mxu0 %v18_v10  ;;  %544 = vmatprep.mubr.f32.mxu1 %v21_v11  ;;  %v202_v8 = vld [vmem:[%s1736_s1 + $0x510] sm:$0xff]  ;;  %v217_v10 = vld [vmem:[%s1736_s1 + $0x588] sm:$0xff] }
  0x49   :  { %942 = vmatprep.subr.mxu0 %v199_v12  ;;  %980 = vmatprep.subr.mxu1 %v231_v13  ;;  %v169_v11 = vld [vmem:[%s1736_s1 + $0x408] sm:$0xff]  ;;  %v184_v13 = vld [vmem:[%s1736_s1 + $0x480] sm:$0xff] }
  0x4a   :  { %545 = vmatmul.mubr.f32.vlgmr.msra.gmra.mxu1 %v20_v14  ;;  %943 = vmatpush3.msra.mxu0 %v183_v15  ;;  %v201_v12 = vld [vmem:[%s1736_s1 + $0x508] sm:$0xff]  ;;  %v216_v14 = vld [vmem:[%s1736_s1 + $0x580] sm:$0xff] }
  0x4b   :  { %981 = vmatpush3.msra.mxu1 %v215_v16  ;;  %944 = vmatprep.subr.mxu0 %v198_v17  ;;  %v168_v15 = vld [vmem:[%s1736_s1 + $0x400] sm:$0xff]  ;;  %v23_v16 = vld [vmem:[%s1737_s0 + $0x48] sm:$0xff] }
  0x4c   :  { %982 = vmatprep.subr.mxu1 %v230_v18  ;;  %474 = vmatprep.mubr.f32.mxu0 %v32_v19  ;;  %v200_v17 = vld [vmem:[%s1736_s1 + $0x500] sm:$0xff]  ;;  %v25_v18 = vld [vmem:[%s1737_s0 + $0x58] sm:$0xff] }
  0x4d   :  { %945 = vmatpush3.msra.mxu0 %v182_v20  ;;  %983 = vmatpush3.msra.mxu1 %v214_v21  ;;  %v22_v19 = vld [vmem:[%s1737_s0 + $0x40] sm:$0xff]  ;;  %v24_v20 = vld [vmem:[%s1737_s0 + $0x50] sm:$0xff]  ;;  %v235_v21 = vld [vmem:[%s1736_s1 + $0x618] sm:$0xff] }
  0x4e   :  { %475 = vmatmul.mubr.f32.gmra.mxu0 %v31_v22  ;;  %946 = vmatprep.subr.mxu0 %v197_v23  ;;  %v36_v22 = vld [vmem:[%s1737_s0 + $0xb0] sm:$0x3]  ;;  %v38_v23 = vld [vmem:[%s1737_s0 + $0xc0] sm:$0x3] }
  0x4f   :  { %984 = vmatprep.subr.mxu1 %v229_v24  ;;  %549 = vmatprep.mubr.f32.mxu1 %v34_v25  ;;  %v234_v24 = vld [vmem:[%s1736_s1 + $0x610] sm:$0xff]  ;;  %v236_v25 = vld [vmem:[%s1738_s2] sm:$0xff] }
  0x50   :  { %947 = vmatpush3.msra.mxu0 %v181_v26  ;;  %985 = vmatpush3.msra.mxu1 %v213_v27  ;;  %v37_v26 = vld [vmem:[%s1737_s0 + $0xb8] sm:$0x3]  ;;  %v35_v27 = vld [vmem:[%s1737_s0 + $0xa8] sm:$0x3] }
  0x51   :  { %948 = vmatprep.subr.mxu0 %v196_v28  ;;  %550 = vmatmul.mubr.f32.gmra.mxu1 %v33_v29  ;;  %v233_v28 = vld [vmem:[%s1736_s1 + $0x608] sm:$0xff]  ;;  %v26_v29 = vld [vmem:[%s1737_s0 + $0x60] sm:$0xff] }
  0x52   :  { %986 = vmatprep.subr.mxu1 %v228_v30  ;;  %949 = vmatpush3.msra.mxu0 %v180_v31  ;;  %v232_v30 = vld [vmem:[%s1736_s1 + $0x600] sm:$0xff]  ;;  %v237_v31 = vld [vmem:[%s1738_s2 + $0x8] sm:$0x3] }
  0x53   :  { %987 = vmatpush3.msra.mxu1 %v212_v32  ;;  %950 = vmatprep.subr.mxu0 %v195_v33  ;;  %v39_v32 = vld [vmem:[%s1737_s0 + $0xc8] sm:$0x3] }
  0x54   :  { %988 = vmatprep.subr.mxu1 %v227_v34  ;;  %951 = vmatpush3.msra.mxu0 %v179_v35 }
  0x55   :  { %989 = vmatpush3.msra.mxu1 %v211_v36  ;;  %952 = vmatprep.subr.mxu0 %v194_v37 }
  0x56   :  { %990 = vmatprep.subr.mxu1 %v226_v38  ;;  %953 = vmatpush3.msra.mxu0 %v178_v39 }
  0x57   :  { %991 = vmatpush3.msra.mxu1 %v210_v40  ;;  %954 = vmatprep.subr.mxu0 %v193_v41 }
  0x58   :  { %992 = vmatprep.subr.mxu1 %v225_v42  ;;  %955 = vmatpush3.msra.mxu0 %v177_v43 }
  0x59   :  { %993 = vmatpush3.msra.mxu1 %v209_v44  ;;  %956 = vmatprep.subr.mxu0 %v192_v45 }
  0x5a   :  { %994 = vmatprep.subr.mxu1 %v224_v46  ;;  %957 = vmatpush3.msra.mxu0 %v176_v47 }
  0x5b   :  { %995 = vmatpush3.msra.mxu1 %v208_v48  ;;  %958 = vmatprep.subr.mxu0 %v191_v49 }
  0x5c   :  { %996 = vmatprep.subr.mxu1 %v223_v50  ;;  %959 = vmatpush3.msra.mxu0 %v175_v51 }
  0x5d   :  { %997 = vmatpush3.msra.mxu1 %v207_v52  ;;  %960 = vmatprep.subr.mxu0 %v190_v53 }
  0x5e   :  { %998 = vmatprep.subr.mxu1 %v222_v54  ;;  %961 = vmatpush3.msra.mxu0 %v174_v55 }
  0x5f   :  { %999 = vmatpush3.msra.mxu1 %v206_v56  ;;  %962 = vmatprep.subr.mxu0 %v189_v57 }
  0x60   :  { %1000 = vmatprep.subr.mxu1 %v221_v58  ;;  %963 = vmatpush3.msra.mxu0 %v173_v59 }
  0x61   :  { %1001 = vmatpush3.msra.mxu1 %v205_v60  ;;  %964 = vmatprep.subr.mxu0 %v188_v61 }
  0x62   :  { %1002 = vmatprep.subr.mxu1 %v220_v62  ;;  %965 = vmatpush3.msra.mxu0 %v172_v63 }
  0x63   :  { %1003 = vmatpush3.msra.mxu1 %v204_v0  ;;  %966 = vmatprep.subr.mxu0 %v187_v1 }
  0x64   :  { %1004 = vmatprep.subr.mxu1 %v219_v2  ;;  %967 = vmatpush3.msra.mxu0 %v171_v3 }
  0x65   :  { %1005 = vmatpush3.msra.mxu1 %v203_v4  ;;  %968 = vmatprep.subr.mxu0 %v186_v5 }
  0x66   :  { %1006 = vmatprep.subr.mxu1 %v218_v6  ;;  %969 = vmatpush3.msra.mxu0 %v170_v7 }
  0x67   :  { %1007 = vmatpush3.msra.mxu1 %v202_v8  ;;  %970 = vmatprep.subr.mxu0 %v185_v9 }
  0x68   :  { %1008 = vmatprep.subr.mxu1 %v217_v10  ;;  %971 = vmatpush3.msra.mxu0 %v169_v11 }
  0x69   :  { %1009 = vmatpush3.msra.mxu1 %v201_v12  ;;  %972 = vmatprep.subr.mxu0 %v184_v13 }
  0x6a   :  { %1010 = vmatprep.subr.mxu1 %v216_v14  ;;  %973 = vmatpush3.msra.mxu0 %v168_v15 }
  0x6b   :  { %619 = vmatprep.mubr.f32.mxu0 %v23_v16  ;;  %1011 = vmatpush3.msra.mxu1 %v200_v17 }
  0x6c   :  { %694 = vmatprep.mubr.f32.mxu1 %v25_v18  ;;  %620 = vmatmul.mubr.f32.vlgmr.msra.gmra.mxu0 %v22_v19 }
  0x6d   :  { %695 = vmatmul.mubr.f32.vlgmr.msra.gmra.mxu1 %v24_v20  ;;  %1024 = vmatprep.subr.mxu0 %v235_v21 }
  0x6e   :  { %624 = vmatprep.mubr.f32.mxu0 %v36_v22  ;;  %1025 = vmatpush3.msra.mxu0 %v235_v21 }
  0x6f   :  { %699 = vmatprep.mubr.f32.mxu1 %v38_v23  ;;  %1026 = vmatprep.subr.mxu0 %v234_v24 }
  0x70   :  { %240 = vperm.xlu0 %1036, %v236_v25   ;;  %1027 = vmatpush3.msra.mxu0 %v234_v24 }
  0x71   :  { %700 = vmatmul.mubr.f32.gmra.mxu1 %v37_v26  ;;  %625 = vmatmul.mubr.f32.gmra.mxu0 %v35_v27 }
  0x72   :  { %1028 = vmatprep.subr.mxu0 %v233_v28  ;;  %1032 = vmatprep.mubr.msk.f32.mxu0 %vm248_vm0, %v26_v29 }
  0x73   :  { %1029 = vmatpush3.msra.mxu0 %v233_v28 }
  0x74   :  { %1030 = vmatprep.subr.mxu0 %v232_v30  ;;  %245 = vperm.xlu0 %1036, %v237_v31  }
  0x75   :  { %1031 = vmatpush3.msra.mxu0 %v232_v30 }
  0x76   :  { %1033 = vmatmul.mubr.msk.f32.vlgmr.msra.gmra.mxu0 %vm248_vm0, %v39_v32 }
  0xe4   :  { %v822_v33 = vpop.f32.mrf.mxu0 }
  0xe6   :  { %v860_v34 = vpop.f32.mrf.mxu1  ;;  %v823_v35 = vpop.f32.mrf.mxu0 }
  0xe7   :  { %v824_v44 = vadd.f32 %v823_v35, %v822_v33 }
  0xe8   :  { %v861_v36 = vpop.f32.mrf.mxu1 }
  0xe9   :  { %v862_v48 = vadd.f32 %v861_v36, %v860_v34 }
  0xeb   :  { %v241_v46 = vpop.permute.xlu0 %240 }
  0xec   :  { %v322_v49 = vadd.f32 %v824_v44, %v241_v46 }
  0xee   :  { %v397_v55 = vadd.f32 %v862_v48, %v322_v49 }
  0xef   :  { %v246_v52 = vpop.permute.xlu0 %245 }
 0x101   :  { %v825_v37 = vpop.f32.mrf.mxu0 }
 0x103   :  { %v826_v39 = vpop.f32.mrf.mxu0 }
 0x104   :  { %v863_v38 = vpop.f32.mrf.mxu1  ;;  %v827_v50 = vadd.f32 %v826_v39, %v825_v37 }
 0x106   :  { %v864_v40 = vpop.f32.mrf.mxu1  ;;  %v327_v56 = vadd.f32 %v827_v50, %v246_v52 }
 0x107   :  { %v865_v57 = vadd.f32 %v864_v40, %v863_v38 }
 0x108   :  { %v898_v41 = vpop.f32.mrf.mxu0 }
 0x109   :  { %v402_v0 = vadd.f32 %v865_v57, %v327_v56 }
 0x10a   :  { %v936_v42 = vpop.f32.mrf.mxu1  ;;  %v899_v43 = vpop.f32.mrf.mxu0 }
 0x10b   :  { %v900_v53 = vadd.f32 %v899_v43, %v898_v41 }
 0x10c   :  { %v937_v45 = vpop.f32.mrf.mxu1 }
 0x10d   :  { %v472_v59 = vadd.f32 %v900_v53, %v397_v55  ;;  %v938_v60 = vadd.f32 %v937_v45, %v936_v42 }
 0x10e   :  { %v901_v47 = vpop.f32.mrf.mxu0 }
 0x10f   :  { %v547_v4 = vadd.f32 %v938_v60, %v472_v59 }
 0x110   :  { %v902_v54 = vpop.f32.mrf.mxu0 }
 0x111   :  { %v939_v51 = vpop.f32.mrf.mxu1  ;;  %v903_v61 = vadd.f32 %v902_v54, %v901_v47 }
 0x113   :  { %v940_v58 = vpop.f32.mrf.mxu1  ;;  %v477_v5 = vadd.f32 %v903_v61, %v402_v0 }
 0x114   :  { %v941_v6 = vadd.f32 %v940_v58, %v939_v51 }
 0x116   :  { %v552_v12 = vadd.f32 %v941_v6, %v477_v5 }
 0x12c   :  { %v974_v62 = vpop.f32.mrf.mxu0 }
 0x12d   :  { %v1012_v63 = vpop.f32.mrf.mxu1 }
 0x12e   :  { %v975_v1 = vpop.f32.mrf.mxu0 }
 0x12f   :  { %v1013_v2 = vpop.f32.mrf.mxu1  ;;  %v976_v3 = vadd.f32 %v975_v1, %v974_v62 }
 0x130   :  { %v1014_v13 = vadd.f32 %v1013_v2, %v1012_v63 }
 0x131   :  { %v1015_v7 = vpop.f32.mrf.mxu1  ;;  %v977_v8 = vpop.f32.mrf.mxu0  ;;  %v622_v9 = vadd.f32 %v976_v3, %v547_v4 }
 0x133   :  { %v978_v10 = vpop.f32.mrf.mxu0  ;;  %v1016_v11 = vpop.f32.mrf.mxu1  ;;  %v697_v18 = vadd.f32 %v1014_v13, %v622_v9 }
 0x134   :  { %v979_v14 = vadd.f32 %v978_v10, %v977_v8  ;;  %v1017_v17 = vadd.f32 %v1016_v11, %v1015_v7 }
 0x136   :  { %v1034_v15 = vpop.f32.mrf.mxu0  ;;  %v627_v16 = vadd.f32 %v979_v14, %v552_v12 }
 0x138   :  { %v771_v19 = vpop.f32.mrf.mxu0  ;;  %v702_v20 = vadd.f32 %v1017_v17, %v627_v16 }
 0x139   :  { %v772_v21 = vadd.f32 %v771_v19, %v697_v18 }
 0x13a   :  { %v777_v22 = vadd.f32 %v1034_v15, %v702_v20 }
 0x13b   :  { %781 = vst.msk [vmem:[%s1739_s3] sm:$0xff] %vm780_vm1, %v772_v21 }
 0x13c   :  { %783 = vst.msk [vmem:[%s1739_s3 + $0x8] sm:$0x3] %vm782_vm2, %v777_v22 }

// kernel: cnn_classif_bnorm_forward.4
= control target key start
LH: loop header
LB: loop body
LE: loop exit
PB: predicated region body
PF: predicated region fallthrough
CT: control target
= control target key end

     0   :  { %s1977_s18 = smov 0   ;;  %s1979_s19 = smov 0   ;;  %s2554_s0 = inlined_call_operand.vmem [shape: bf16[400,512], index: 0, kind: input, shape index: {}]   ;;  %s2555_s1 = inlined_call_operand.vmem [shape: bf16[32,400], index: 1, kind: input, shape index: {}]   ;;  %s2556_s2 = inlined_call_operand.vmem [shape: f32[32,1], index: 2, kind: input, shape index: {}]   ;;  %s2557_s3 = inlined_call_operand.vmem [shape: f32[32,1], index: 3, kind: input, shape index: {}]   ;;  %s2558_s4 = inlined_call_operand.vmem [shape: f32[32,1], index: 4, kind: input, shape index: {}]   ;;  %s2559_s5 = inlined_call_operand.vmem [shape: f32[32,128], index: 5, kind: output, shape index: {}]  }
   0x1   :  { %s1981_s20 = smov 0  }
   0x2 LB: > { %s27_s21 = sadd.s32 1, %s1937_s19  ;;  %p1591_p0 = scmp.ge.s32.totalorder %s1941_s20, 1  ;;  %s1941_s20 = sphi %s1981_s20, %s15_s20   ;;  %s1937_s19 = sphi %s1979_s19, %s2573_s19   ;;  %s1933_s18 = sphi %s1977_s18, %s2572_s18  }
   0x3   : > { %p29_p1 = scmp.ge.s32.totalorder %s27_s21, 2  ;;  %p200_p2 = scmp.lt.s32.totalorder %s1941_s20, 3 }
   0x5   : > { %s2575_s21 = smov (%p29_p1, %s27_s21), 0  ;;  %p201_p3 = pnand %p1591_p0, %p200_p2 }
   0x7   : > { %204 = sbr.rel (%p201_p3) target bundleno = 696 (0x2b8), region = 40 }
   0xc   : > { %p238_p4 = scmp.eq.s32.totalorder %s1933_s18, 0 }
   0xd   : > { %vm244_vm0 = vcmask (%p238_p4), 7168   ;;  %v1943_v0 = vmov (%p238_p4), 0.0  }
   0xe   : > { %243 = sbr.rel (!%p238_p4) target bundleno = 19 (0x13), region = 44  ;;  %245 = vst.msk [vmem:[#allocation2] sm:$0xff] (%p238_p4), %vm244_vm0, %v1943_v0  ;;  %246 = vst.msk [vmem:[#allocation2 + $0x8] sm:$0xff] (%p238_p4), %vm244_vm0, %v1943_v0 }
   0xf   : > { %247 = vst.msk [vmem:[#allocation2 + $0x10] sm:$0xff] (%p238_p4), %vm244_vm0, %v1943_v0  ;;  %248 = vst.msk [vmem:[#allocation2 + $0x18] sm:$0xff] (%p238_p4), %vm244_vm0, %v1943_v0 }
  0x10   : > { %249 = vst.msk [vmem:[#allocation3] sm:$0xff] (%p238_p4), %vm244_vm0, %v1943_v0  ;;  %250 = vst.msk [vmem:[#allocation3 + $0x8] sm:$0xff] (%p238_p4), %vm244_vm0, %v1943_v0 }
  0x11   : > { %251 = vst.msk [vmem:[#allocation3 + $0x10] sm:$0xff] (%p238_p4), %vm244_vm0, %v1943_v0  ;;  %252 = vst.msk [vmem:[#allocation3 + $0x18] sm:$0xff] (%p238_p4), %vm244_vm0, %v1943_v0 }
  0x13 PF: > { %v1747_v1 = vld [vmem:[%s2554_s0 + $0xe4] ss:$16 sps:$4 sm:$0xff]   ;;  %v1944_v3 = vmov 0   ;;  %v1751_v4 = vld [vmem:[%s2554_s0 + $0xe0] ss:$16 sps:$4 sm:$0xff]   ;;  %vm923_vm1 = vcmask 130048  }
  0x14   : > { %v1749_v2 = vld [vmem:[%s2554_s0 + $0x2e4] ss:$16 sps:$4 sm:$0xff]   ;;  %1745 = vset.pattern.permute.xlu0 %v1944_v3  ;;  %1746 = vset.pattern.permute.xlu1 %v1944_v3  ;;  %v1752_v5 = vld [vmem:[%s2554_s0 + $0x2e0] ss:$16 sps:$4 sm:$0xff]   ;;  %v2091_v32 = vld [vmem:[%s2555_s1 + $0xc] ss:$16 sps:$4 sm:$0xff]  }
  0x15   : > { %930 = vmatprep.subr.bf16.mxu0 %v1747_v1  ;;  %983 = vmatprep.subr.bf16.mxu1 %v1749_v2  ;;  %v1753_v6 = vld [vmem:[%s2554_s0 + $0xc4] ss:$16 sps:$4 sm:$0xff]   ;;  %v1757_v8 = vld [vmem:[%s2554_s0 + $0xc0] ss:$16 sps:$4 sm:$0xff]   ;;  %v1808_v40 = vld [vmem:[%s2554_s0 + $0xec] ss:$16 sps:$4 sm:$0xff]  }
  0x16   : > { %931 = vmatpush1.bf16.msra.mxu0 %v1751_v4  ;;  %984 = vmatpush1.bf16.msra.mxu1 %v1752_v5  ;;  %v1755_v7 = vld [vmem:[%s2554_s0 + $0x2c4] ss:$16 sps:$4 sm:$0xff]   ;;  %v1758_v9 = vld [vmem:[%s2554_s0 + $0x2c0] ss:$16 sps:$4 sm:$0xff]   ;;  %v2122_v41 = vld [vmem:[%s2555_s1 + $0x8] ss:$16 sps:$4 sm:$0xff]  }
  0x17   : > { %932 = vmatprep.subr.bf16.mxu0 %v1753_v6  ;;  %985 = vmatprep.subr.bf16.mxu1 %v1755_v7  ;;  %v1759_v10 = vld [vmem:[%s2554_s0 + $0xa4] ss:$16 sps:$4 sm:$0xff]   ;;  %v1763_v12 = vld [vmem:[%s2554_s0 + $0xa0] ss:$16 sps:$4 sm:$0xff]   ;;  %v1806_v42 = vld [vmem:[%s2554_s0 + $0xe8] ss:$16 sps:$4 sm:$0xff]  }
  0x18   : > { %v1761_v11 = vld [vmem:[%s2554_s0 + $0x2a4] ss:$16 sps:$4 sm:$0xff]   ;;  %v1764_v13 = vld [vmem:[%s2554_s0 + $0x2a0] ss:$16 sps:$4 sm:$0xff]   ;;  %1701 = vmatprep.mubr.msk.bf16.mxu1 %vm923_vm1, %v2091_v32  ;;  %v1814_v45 = vld [vmem:[%s2554_s0 + $0xcc] ss:$16 sps:$4 sm:$0xff]  }
  0x19   : > { %v1765_v14 = vld [vmem:[%s2554_s0 + $0x84] ss:$16 sps:$4 sm:$0xff]   ;;  %v1769_v16 = vld [vmem:[%s2554_s0 + $0x80] ss:$16 sps:$4 sm:$0xff]   ;;  %v1812_v46 = vld [vmem:[%s2554_s0 + $0xc8] ss:$16 sps:$4 sm:$0xff]  }
  0x1a   : > { %933 = vmatpush1.bf16.msra.mxu0 %v1757_v8  ;;  %986 = vmatpush1.bf16.msra.mxu1 %v1758_v9  ;;  %v1767_v15 = vld [vmem:[%s2554_s0 + $0x284] ss:$16 sps:$4 sm:$0xff]   ;;  %v1770_v17 = vld [vmem:[%s2554_s0 + $0x280] ss:$16 sps:$4 sm:$0xff]   ;;  %v1820_v49 = vld [vmem:[%s2554_s0 + $0xac] ss:$16 sps:$4 sm:$0xff]  }
  0x1b   : > { %934 = vmatprep.subr.bf16.mxu0 %v1759_v10  ;;  %987 = vmatprep.subr.bf16.mxu1 %v1761_v11  ;;  %v1771_v18 = vld [vmem:[%s2554_s0 + $0x64] ss:$16 sps:$4 sm:$0xff]   ;;  %v1775_v20 = vld [vmem:[%s2554_s0 + $0x60] ss:$16 sps:$4 sm:$0xff]   ;;  %v1818_v50 = vld [vmem:[%s2554_s0 + $0xa8] ss:$16 sps:$4 sm:$0xff]  }
  0x1c   : > { %v1773_v19 = vld [vmem:[%s2554_s0 + $0x264] ss:$16 sps:$4 sm:$0xff]   ;;  %v1776_v21 = vld [vmem:[%s2554_s0 + $0x260] ss:$16 sps:$4 sm:$0xff]   ;;  %v1826_v53 = vld [vmem:[%s2554_s0 + $0x8c] ss:$16 sps:$4 sm:$0xff]  }
  0x1d   : > { %v1777_v22 = vld [vmem:[%s2554_s0 + $0x44] ss:$16 sps:$4 sm:$0xff]   ;;  %v1781_v24 = vld [vmem:[%s2554_s0 + $0x40] ss:$16 sps:$4 sm:$0xff]   ;;  %v1824_v55 = vld [vmem:[%s2554_s0 + $0x88] ss:$16 sps:$4 sm:$0xff]  }
  0x1e   : > { %935 = vmatpush1.bf16.msra.mxu0 %v1763_v12  ;;  %988 = vmatpush1.bf16.msra.mxu1 %v1764_v13  ;;  %v1779_v23 = vld [vmem:[%s2554_s0 + $0x244] ss:$16 sps:$4 sm:$0xff]   ;;  %v1782_v25 = vld [vmem:[%s2554_s0 + $0x240] ss:$16 sps:$4 sm:$0xff]   ;;  %v1832_v58 = vld [vmem:[%s2554_s0 + $0x6c] ss:$16 sps:$4 sm:$0xff]  }
  0x1f   : > { %936 = vmatprep.subr.bf16.mxu0 %v1765_v14  ;;  %989 = vmatprep.subr.bf16.mxu1 %v1767_v15  ;;  %v1783_v26 = vld [vmem:[%s2554_s0 + $0x24] ss:$16 sps:$4 sm:$0xff]   ;;  %v1787_v28 = vld [vmem:[%s2554_s0 + $0x20] ss:$16 sps:$4 sm:$0xff]   ;;  %v1830_v59 = vld [vmem:[%s2554_s0 + $0x68] ss:$16 sps:$4 sm:$0xff]  }
  0x20   : > { %v1785_v27 = vld [vmem:[%s2554_s0 + $0x224] ss:$16 sps:$4 sm:$0xff]   ;;  %v1788_v29 = vld [vmem:[%s2554_s0 + $0x220] ss:$16 sps:$4 sm:$0xff]   ;;  %v1838_v62 = vld [vmem:[%s2554_s0 + $0x4c] ss:$16 sps:$4 sm:$0xff]  }
  0x21   : > { %v1789_v30 = vld [vmem:[%s2554_s0 + $0x4] ss:$16 sps:$4 sm:$0xff]   ;;  %v1793_v33 = vld [vmem:[%s2554_s0] ss:$16 sps:$4 sm:$0xff]   ;;  %v1836_v63 = vld [vmem:[%s2554_s0 + $0x48] ss:$16 sps:$4 sm:$0xff]  }
  0x22   : > { %937 = vmatpush1.bf16.msra.mxu0 %v1769_v16  ;;  %990 = vmatpush1.bf16.msra.mxu1 %v1770_v17  ;;  %v1791_v31 = vld [vmem:[%s2554_s0 + $0x204] ss:$16 sps:$4 sm:$0xff]   ;;  %v1794_v34 = vld [vmem:[%s2554_s0 + $0x200] ss:$16 sps:$4 sm:$0xff]   ;;  %v1844_v2 = vld [vmem:[%s2554_s0 + $0x2c] ss:$16 sps:$4 sm:$0xff]  }
  0x23   : > { %938 = vmatprep.subr.bf16.mxu0 %v1771_v18  ;;  %991 = vmatprep.subr.bf16.mxu1 %v1773_v19  ;;  %v1795_v35 = vld [vmem:[%s2554_s0 + $0x1e4] ss:$16 sps:$4 sm:$0xff]   ;;  %v1799_v37 = vld [vmem:[%s2554_s0 + $0x1e0] ss:$16 sps:$4 sm:$0xff]   ;;  %v1842_v3 = vld [vmem:[%s2554_s0 + $0x28] ss:$16 sps:$4 sm:$0xff]  }
  0x24   : > { %v1797_v36 = vld [vmem:[%s2554_s0 + $0x304] ss:$16 sps:$4 sm:$0xff]   ;;  %v1800_v38 = vld [vmem:[%s2554_s0 + $0x300] ss:$16 sps:$4 sm:$0xff]   ;;  %v1851_v5 = vld [vmem:[%s2554_s0 + $0xc] ss:$16 sps:$4 sm:$0xff]  }
  0x25   : > { %v1804_v39 = vld [vmem:[%s2554_s0 + $0x1c4] ss:$16 sps:$4 sm:$0xff]   ;;  %v1809_v43 = vld [vmem:[%s2554_s0 + $0x1c0] ss:$16 sps:$4 sm:$0xff]   ;;  %v1854_v7 = vld [vmem:[%s2554_s0 + $0x2ec] ss:$16 sps:$4 sm:$0xff]  }
  0x26   : > { %939 = vmatpush1.bf16.msra.mxu0 %v1775_v20  ;;  %992 = vmatpush1.bf16.msra.mxu1 %v1776_v21  ;;  %v1810_v44 = vld [vmem:[%s2554_s0 + $0x1a4] ss:$16 sps:$4 sm:$0xff]   ;;  %v1815_v47 = vld [vmem:[%s2554_s0 + $0x1a0] ss:$16 sps:$4 sm:$0xff]   ;;  %v1849_v8 = vld [vmem:[%s2554_s0 + $0x8] ss:$16 sps:$4 sm:$0xff]  }
  0x27   : > { %940 = vmatprep.subr.bf16.mxu0 %v1777_v22  ;;  %993 = vmatprep.subr.bf16.mxu1 %v1779_v23  ;;  %v1816_v48 = vld [vmem:[%s2554_s0 + $0x184] ss:$16 sps:$4 sm:$0xff]   ;;  %v1821_v51 = vld [vmem:[%s2554_s0 + $0x180] ss:$16 sps:$4 sm:$0xff]   ;;  %v1852_v9 = vld [vmem:[%s2554_s0 + $0x2e8] ss:$16 sps:$4 sm:$0xff]  }
  0x28   : > { %v1822_v52 = vld [vmem:[%s2554_s0 + $0x164] ss:$16 sps:$4 sm:$0xff]   ;;  %v1827_v56 = vld [vmem:[%s2554_s0 + $0x160] ss:$16 sps:$4 sm:$0xff]   ;;  %v2226_v10 = vld [vmem:[%s2555_s1 + $0x2c] ss:$16 sps:$4 sm:$0xff]  }
  0x29   : > { %v1848_v54 = vld [vmem:[%s2555_s1 + $0x4] ss:$16 sps:$4 sm:$0xff]   ;;  %v1833_v60 = vld [vmem:[%s2554_s0 + $0x140] ss:$16 sps:$4 sm:$0xff]   ;;  %v2231_v11 = vld [vmem:[%s2555_s1 + $0x28] ss:$16 sps:$4 sm:$0xff]  }
  0x2a   : > { %941 = vmatpush1.bf16.msra.mxu0 %v1781_v24  ;;  %994 = vmatpush1.bf16.msra.mxu1 %v1782_v25  ;;  %v1828_v57 = vld [vmem:[%s2554_s0 + $0x144] ss:$16 sps:$4 sm:$0xff]   ;;  %v1839_v0 = vld [vmem:[%s2554_s0 + $0x120] ss:$16 sps:$4 sm:$0xff]   ;;  %v1857_v12 = vld [vmem:[%s2554_s0 + $0x1ec] ss:$16 sps:$4 sm:$0xff]  }
  0x2b   : > { %942 = vmatprep.subr.bf16.mxu0 %v1783_v26  ;;  %995 = vmatprep.subr.bf16.mxu1 %v1785_v27  ;;  %v1834_v61 = vld [vmem:[%s2554_s0 + $0x124] ss:$16 sps:$4 sm:$0xff]   ;;  %v1845_v4 = vld [vmem:[%s2554_s0 + $0x100] ss:$16 sps:$4 sm:$0xff]   ;;  %v1860_v13 = vld [vmem:[%s2554_s0 + $0x2cc] ss:$16 sps:$4 sm:$0xff]  }
  0x2c   : > { %962 = vmatprep.mubr.bf16.mxu0 %v1848_v54  ;;  %v1840_v1 = vld [vmem:[%s2554_s0 + $0x104] ss:$16 sps:$4 sm:$0xff]   ;;  %v2212_v6 = vld [vmem:[%s2555_s1] ss:$16 sps:$4 sm:$0xff]   ;;  %v1855_v15 = vld [vmem:[%s2554_s0 + $0x1e8] ss:$16 sps:$4 sm:$0xff]  }
  0x2d   : > { %v2242_v14 = vld [vmem:[%s2555_s1 + $0x24] ss:$16 sps:$4 sm:$0xff]   ;;  %v1858_v16 = vld [vmem:[%s2554_s0 + $0x2c8] ss:$16 sps:$4 sm:$0xff]   ;;  %v1863_v17 = vld [vmem:[%s2554_s0 + $0x1cc] ss:$16 sps:$4 sm:$0xff]  }
  0x2e   : > { %943 = vmatpush1.bf16.msra.mxu0 %v1787_v28  ;;  %996 = vmatpush1.bf16.msra.mxu1 %v1788_v29  ;;  %v1866_v18 = vld [vmem:[%s2554_s0 + $0x2ac] ss:$16 sps:$4 sm:$0xff]   ;;  %v1861_v19 = vld [vmem:[%s2554_s0 + $0x1c8] ss:$16 sps:$4 sm:$0xff]   ;;  %v2267_v20 = vld [vmem:[%s2555_s1 + $0x20] ss:$16 sps:$4 sm:$0xff]  }
  0x2f   : > { %944 = vmatprep.subr.bf16.mxu0 %v1789_v30  ;;  %997 = vmatprep.subr.bf16.mxu1 %v1791_v31  ;;  %v1864_v21 = vld [vmem:[%s2554_s0 + $0x2a8] ss:$16 sps:$4 sm:$0xff]   ;;  %v361_v22 = vld [vmem:[%s2556_s2] sm:$0xff]  ;;  %v363_v23 = vld [vmem:[%s2556_s2 + $0x10] sm:$0xff]  ;;  %p1705_p5 = scmp.ne.s32.totalorder %s1933_s18, 0 }
  0x30   : > { %v1869_v24 = vld [vmem:[%s2554_s0 + $0x1ac] ss:$16 sps:$4 sm:$0xff]   ;;  %367 = vperm.xlu0 %1745, %v361_v22   ;;  %377 = vperm.xlu1 %1746, %v363_v23   ;;  %v1867_v27 = vld [vmem:[%s2554_s0 + $0x1a8] ss:$16 sps:$4 sm:$0xff]  }
  0x31   : > { %v1872_v25 = vld [vmem:[%s2554_s0 + $0x28c] ss:$16 sps:$4 sm:$0xff]   ;;  %v1870_v28 = vld [vmem:[%s2554_s0 + $0x288] ss:$16 sps:$4 sm:$0xff]  }
  0x32   : > { %945 = vmatpush1.bf16.msra.mxu0 %v1793_v33  ;;  %998 = vmatpush1.bf16.msra.mxu1 %v1794_v34  ;;  %v362_v26 = vld [vmem:[%s2556_s2 + $0x8] sm:$0xff]  ;;  %v364_v29 = vld [vmem:[%s2556_s2 + $0x18] sm:$0xff] }
  0x33   : > { %946 = vmatprep.subr.bf16.mxu0 %v1795_v35  ;;  %1013 = vmatprep.subr.bf16.mxu1 %v1797_v36  ;;  %v1875_v30 = vld [vmem:[%s2554_s0 + $0x18c] ss:$16 sps:$4 sm:$0xff]   ;;  %v1873_v33 = vld [vmem:[%s2554_s0 + $0x188] ss:$16 sps:$4 sm:$0xff]  }
  0x34   : > { %v1878_v31 = vld [vmem:[%s2554_s0 + $0x26c] ss:$16 sps:$4 sm:$0xff]   ;;  %372 = vperm.xlu0 %1745, %v362_v26   ;;  %382 = vperm.xlu1 %1746, %v364_v29   ;;  %v1876_v34 = vld [vmem:[%s2554_s0 + $0x268] ss:$16 sps:$4 sm:$0xff]  }
  0x35   : > { %v1884_v35 = vld [vmem:[%s2554_s0 + $0x16c] ss:$16 sps:$4 sm:$0xff]   ;;  %v1882_v36 = vld [vmem:[%s2554_s0 + $0x168] ss:$16 sps:$4 sm:$0xff]  }
  0x36   : > { %947 = vmatpush2.bf16.msra.mxu0 %v1799_v37  ;;  %1014 = vmatpush2.bf16.msra.mxu1 %v1800_v38  ;;  %v1885_v37 = vld [vmem:[%s2554_s0 + $0x248] ss:$16 sps:$4 sm:$0xff]   ;;  %v1893_v38 = vld [vmem:[%s2554_s0 + $0x14c] ss:$16 sps:$4 sm:$0xff]  }
  0x37   : > { %948 = vmatprep.subr.bf16.mxu0 %v1804_v39  ;;  %1036 = vmatprep.subr.bf16.mxu1 %v1808_v40  ;;  %v1896_v39 = vld [vmem:[%s2554_s0 + $0x22c] ss:$16 sps:$4 sm:$0xff]   ;;  %v1891_v40 = vld [vmem:[%s2554_s0 + $0x148] ss:$16 sps:$4 sm:$0xff]  }
  0x39   : > { %1016 = vmatmul.mubr.bf16.vlgmr.msra.gmra.mxu1 %v2122_v41 }
  0x3a   : > { %949 = vmatpush2.bf16.msra.mxu0 %v1809_v43  ;;  %1037 = vmatpush1.bf16.msra.mxu1 %v1806_v42  ;;  %v1894_v42 = vld [vmem:[%s2554_s0 + $0x228] ss:$16 sps:$4 sm:$0xff]   ;;  %v1899_v43 = vld [vmem:[%s2554_s0 + $0x12c] ss:$16 sps:$4 sm:$0xff]  }
  0x3b   : > { %950 = vmatprep.subr.bf16.mxu0 %v1810_v44  ;;  %1038 = vmatprep.subr.bf16.mxu1 %v1814_v45  ;;  %v1902_v44 = vld [vmem:[%s2554_s0 + $0x20c] ss:$16 sps:$4 sm:$0xff]   ;;  %v1897_v45 = vld [vmem:[%s2554_s0 + $0x128] ss:$16 sps:$4 sm:$0xff]  }
  0x3c   : > { %1702 = vmatprep.mubr.msk.bf16.mxu1 %vm923_vm1, %v2226_v10 }
  0x3e   : > { %951 = vmatpush2.bf16.msra.mxu0 %v1815_v47  ;;  %1039 = vmatpush1.bf16.msra.mxu1 %v1812_v46  ;;  %v1900_v46 = vld [vmem:[%s2554_s0 + $0x208] ss:$16 sps:$4 sm:$0xff]   ;;  %v1905_v47 = vld [vmem:[%s2554_s0 + $0x10c] ss:$16 sps:$4 sm:$0xff]  }
  0x3f   : > { %952 = vmatprep.subr.bf16.mxu0 %v1816_v48  ;;  %1040 = vmatprep.subr.bf16.mxu1 %v1820_v49  ;;  %v1908_v48 = vld [vmem:[%s2554_s0 + $0x30c] ss:$16 sps:$4 sm:$0xff]   ;;  %v1903_v49 = vld [vmem:[%s2554_s0 + $0x108] ss:$16 sps:$4 sm:$0xff]  }
  0x41   : > { %1026 = vmatmul.mubr.bf16.gmra.mxu1 %v2231_v11 }
  0x42   : > { %953 = vmatpush2.bf16.msra.mxu0 %v1821_v51  ;;  %1041 = vmatpush1.bf16.msra.mxu1 %v1818_v50  ;;  %v1906_v50 = vld [vmem:[%s2554_s0 + $0x308] ss:$16 sps:$4 sm:$0xff]  }
  0x43   : > { %954 = vmatprep.subr.bf16.mxu0 %v1822_v52  ;;  %1042 = vmatprep.subr.bf16.mxu1 %v1826_v53 }
  0x44   : > { %1068 = vmatprep.mubr.bf16.mxu1 %v1848_v54 }
  0x46   : > { %955 = vmatpush2.bf16.msra.mxu0 %v1827_v56  ;;  %1043 = vmatpush1.bf16.msra.mxu1 %v1824_v55 }
  0x47   : > { %956 = vmatprep.subr.bf16.mxu0 %v1828_v57  ;;  %1044 = vmatprep.subr.bf16.mxu1 %v1832_v58 }
  0x4a   : > { %957 = vmatpush2.bf16.msra.mxu0 %v1833_v60  ;;  %1045 = vmatpush1.bf16.msra.mxu1 %v1830_v59 }
  0x4b   : > { %958 = vmatprep.subr.bf16.mxu0 %v1834_v61  ;;  %1046 = vmatprep.subr.bf16.mxu1 %v1838_v62 }
  0x4e   : > { %959 = vmatpush2.bf16.msra.mxu0 %v1839_v0  ;;  %1047 = vmatpush1.bf16.msra.mxu1 %v1836_v63 }
  0x4f   : > { %960 = vmatprep.subr.bf16.mxu0 %v1840_v1  ;;  %1048 = vmatprep.subr.bf16.mxu1 %v1844_v2 }
  0x52   : > { %961 = vmatpush2.bf16.msra.mxu0 %v1845_v4  ;;  %1049 = vmatpush1.bf16.msra.mxu1 %v1842_v3 }
  0x53   : > { %1050 = vmatprep.subr.bf16.mxu1 %v1851_v5  ;;  %1089 = vmatprep.subr.bf16.mxu0 %v1854_v7 }
  0x55   : > { %963 = vmatmul.mubr.bf16.vlgmr.msra.gmra.mxu0 %v2212_v6 }
  0x56   : > { %1051 = vmatpush1.bf16.msra.mxu1 %v1849_v8  ;;  %1090 = vmatpush1.bf16.msra.mxu0 %v1852_v9 }
  0x57   : > { %1052 = vmatprep.subr.bf16.mxu1 %v1857_v12  ;;  %1091 = vmatprep.subr.bf16.mxu0 %v1860_v13 }
  0x58   : > { %972 = vmatprep.mubr.bf16.mxu0 %v2242_v14 }
  0x5a   : > { %1053 = vmatpush2.bf16.msra.mxu1 %v1855_v15  ;;  %1092 = vmatpush1.bf16.msra.mxu0 %v1858_v16 }
  0x5b   : > { %1054 = vmatprep.subr.bf16.mxu1 %v1863_v17  ;;  %1093 = vmatprep.subr.bf16.mxu0 %v1866_v18 }
  0x5d   : > { %973 = vmatmul.mubr.bf16.gmra.mxu0 %v2267_v20 }
  0x5e   : > { %1055 = vmatpush2.bf16.msra.mxu1 %v1861_v19  ;;  %1094 = vmatpush1.bf16.msra.mxu0 %v1864_v21 }
  0x5f   : > { %1056 = vmatprep.subr.bf16.mxu1 %v1869_v24  ;;  %1095 = vmatprep.subr.bf16.mxu0 %v1872_v25 }
  0x60   : > { %1703 = vmatprep.mubr.msk.bf16.mxu0 %vm923_vm1, %v2091_v32  ;;  %v1887_v32 = vld [vmem:[%s2554_s0 + $0x24c] ss:$16 sps:$4 sm:$0xff]  }
  0x62   : > { %1057 = vmatpush2.bf16.msra.mxu1 %v1867_v27  ;;  %1096 = vmatpush1.bf16.msra.mxu0 %v1870_v28 }
  0x63   : > { %1058 = vmatprep.subr.bf16.mxu1 %v1875_v30  ;;  %1097 = vmatprep.subr.bf16.mxu0 %v1878_v31 }
  0x66   : > { %1059 = vmatpush2.bf16.msra.mxu1 %v1873_v33  ;;  %1098 = vmatpush1.bf16.msra.mxu0 %v1876_v34 }
  0x67   : > { %1060 = vmatprep.subr.bf16.mxu1 %v1884_v35  ;;  %1099 = vmatprep.subr.bf16.mxu0 %v1887_v32 }
  0x6a   : > { %1061 = vmatpush2.bf16.msra.mxu1 %v1882_v36  ;;  %1100 = vmatpush1.bf16.msra.mxu0 %v1885_v37 }
  0x6b   : > { %1062 = vmatprep.subr.bf16.mxu1 %v1893_v38  ;;  %1101 = vmatprep.subr.bf16.mxu0 %v1896_v39 }
  0x6e   : > { %1063 = vmatpush2.bf16.msra.mxu1 %v1891_v40  ;;  %1102 = vmatpush1.bf16.msra.mxu0 %v1894_v42 }
  0x6f   : > { %1064 = vmatprep.subr.bf16.mxu1 %v1899_v43  ;;  %1103 = vmatprep.subr.bf16.mxu0 %v1902_v44 }
  0x72   : > { %1065 = vmatpush2.bf16.msra.mxu1 %v1897_v45  ;;  %1104 = vmatpush1.bf16.msra.mxu0 %v1900_v46 }
  0x73   : > { %1066 = vmatprep.subr.bf16.mxu1 %v1905_v47  ;;  %1119 = vmatprep.subr.bf16.mxu0 %v1908_v48 }
  0x76   : > { %1067 = vmatpush2.bf16.msra.mxu1 %v1903_v49  ;;  %1120 = vmatpush2.bf16.msra.mxu0 %v1906_v50 }
  0x79   : > { %1069 = vmatmul.mubr.bf16.vlgmr.msra.gmra.mxu1 %v2212_v6  ;;  %1122 = vmatmul.mubr.bf16.vlgmr.msra.gmra.mxu0 %v2122_v41 }
  0x7a   : > { %1078 = vmatprep.mubr.bf16.mxu1 %v2242_v14  ;;  %1704 = vmatprep.mubr.msk.bf16.mxu0 %vm923_vm1, %v2226_v10 }
  0x81   : > { %1079 = vmatmul.mubr.bf16.gmra.mxu1 %v2267_v20  ;;  %1132 = vmatmul.mubr.bf16.gmra.mxu0 %v2231_v11 }
  0xab   : > { %v368_v53 = vpop.permute.xlu0 %367  ;;  %v378_v62 = vpop.permute.xlu1 %377 }
  0xaf   : > { %v373_v58 = vpop.permute.xlu0 %372  ;;  %v383_v12 = vpop.permute.xlu1 %382 }
  0xf9   : > { %v1017_v51 = vpop.f32.mrf.mxu1 }
  0xfb   : > { %v1019_v52 = vpop.f32.mrf.mxu1 }
  0xfd   : > { %v1021_v54 = vpop.f32.mrf.mxu1 }
  0xff   : > { %v1023_v55 = vpop.f32.mrf.mxu1 }
 0x101   : > { %v1027_v60 = vpop.f32.mrf.mxu1 }
 0x103   : > { %v1029_v4 = vpop.f32.mrf.mxu1 }
 0x105   : > { %v1031_v14 = vpop.f32.mrf.mxu1 }
 0x107   : > { %v1033_v23 = vpop.f32.mrf.mxu1 }
 0x115   : > { %v964_v56 = vpop.f32.mrf.mxu0 }
 0x116   : > { %v965_v57 = vadd.f32 %v964_v56, %v368_v53 }
 0x117   : > { %v966_v59 = vpop.f32.mrf.mxu0 }
 0x118   : > { %v1018_v41 = vadd.f32 %v1017_v51, %v965_v57  ;;  %v967_v61 = vadd.f32 %v966_v59, %v368_v53 }
 0x119   : > { %v968_v63 = vpop.f32.mrf.mxu0 }
 0x11a   : > { %v2366_v0 = vmax.f32 %v1018_v41, 0.0  ;;  %v1020_v1 = vadd.f32 %v1019_v52, %v967_v61  ;;  %v969_v2 = vadd.f32 %v968_v63, %v373_v58 }
 0x11b   : > { %v970_v3 = vpop.f32.mrf.mxu0 }
 0x11c   : > { %v2368_v5 = vmax.f32 %v1020_v1, 0.0  ;;  %v1022_v6 = vadd.f32 %v1021_v54, %v969_v2  ;;  %v971_v7 = vadd.f32 %v970_v3, %v373_v58 }
 0x11d   : > { %v974_v8 = vpop.f32.mrf.mxu0 }
 0x11e   : > { %v2370_v9 = vmax.f32 %v1022_v6, 0.0  ;;  %v1024_v10 = vadd.f32 %v1023_v55, %v971_v7  ;;  %v975_v11 = vadd.f32 %v974_v8, %v378_v62 }
 0x11f   : > { %v976_v13 = vpop.f32.mrf.mxu0 }
 0x120   : > { %v2372_v15 = vmax.f32 %v1024_v10, 0.0  ;;  %v977_v16 = vadd.f32 %v976_v13, %v378_v62  ;;  %v1028_v17 = vadd.f32 %v1027_v60, %v975_v11 }
 0x121   : > { %v978_v18 = vpop.f32.mrf.mxu0 }
 0x122   : > { %v2374_v19 = vmax.f32 %v1028_v17, 0.0  ;;  %v1030_v20 = vadd.f32 %v1029_v4, %v977_v16  ;;  %v979_v21 = vadd.f32 %v978_v18, %v383_v12 }
 0x123   : > { %v980_v22 = vpop.f32.mrf.mxu0 }
 0x124   : > { %2566 = vst [vmem:[#allocation6_spill] sm:$0xff] %v2374_v19  ;;  %v2376_v24 = vmax.f32 %v1030_v20, 0.0  ;;  %v981_v25 = vadd.f32 %v980_v22, %v383_v12  ;;  %v1032_v26 = vadd.f32 %v1031_v14, %v979_v21 }
 0x126   : > { %v2378_v27 = vmax.f32 %v1032_v26, 0.0  ;;  %v1034_v28 = vadd.f32 %v1033_v23, %v981_v25 }
 0x128   : > { %v2380_v29 = vmax.f32 %v1034_v28, 0.0 }
 0x139   : > { %v1070_v30 = vpop.f32.mrf.mxu1  ;;  %v1123_v31 = vpop.f32.mrf.mxu0 }
 0x13a   : > { %v1071_v33 = vadd.f32 %v1070_v30, %v368_v53 }
 0x13b   : > { %v1072_v34 = vpop.f32.mrf.mxu1  ;;  %v1125_v35 = vpop.f32.mrf.mxu0 }
 0x13c   : > { %v1124_v32 = vadd.f32 %v1123_v31, %v1071_v33  ;;  %v1073_v36 = vadd.f32 %v1072_v34, %v368_v53 }
 0x13d   : > { %v1074_v37 = vpop.f32.mrf.mxu1  ;;  %v1127_v38 = vpop.f32.mrf.mxu0 }
 0x13e   : > { %v2382_v39 = vmax.f32 %v1124_v32, 0.0  ;;  %v1126_v40 = vadd.f32 %v1125_v35, %v1073_v36  ;;  %v1075_v42 = vadd.f32 %v1074_v37, %v373_v58 }
 0x13f   : > { %v1076_v43 = vpop.f32.mrf.mxu1  ;;  %v1129_v44 = vpop.f32.mrf.mxu0 }
 0x140   : > { %v2384_v45 = vmax.f32 %v1126_v40, 0.0  ;;  %v1128_v46 = vadd.f32 %v1127_v38, %v1075_v42  ;;  %v1077_v47 = vadd.f32 %v1076_v43, %v373_v58 }
 0x141   : > { %v1080_v48 = vpop.f32.mrf.mxu1  ;;  %v1133_v49 = vpop.f32.mrf.mxu0 }
 0x142   : > { %v2386_v50 = vmax.f32 %v1128_v46, 0.0  ;;  %v1130_v51 = vadd.f32 %v1129_v44, %v1077_v47  ;;  %v1081_v52 = vadd.f32 %v1080_v48, %v378_v62 }
 0x143   : > { %v1082_v54 = vpop.f32.mrf.mxu1  ;;  %v1135_v53 = vpop.f32.mrf.mxu0 }
 0x144   : > { %v2388_v55 = vmax.f32 %v1130_v51, 0.0  ;;  %v1134_v56 = vadd.f32 %v1133_v49, %v1081_v52  ;;  %v1083_v57 = vadd.f32 %v1082_v54, %v378_v62 }
 0x145   : > { %v1084_v59 = vpop.f32.mrf.mxu1  ;;  %v1137_v60 = vpop.f32.mrf.mxu0 }
 0x146   : > { %v2390_v41 = vmax.f32 %v1134_v56, 0.0  ;;  %v1136_v61 = vadd.f32 %v1135_v53, %v1083_v57  ;;  %v1085_v63 = vadd.f32 %v1084_v59, %v383_v12 }
 0x147   : > { %v1086_v1 = vpop.f32.mrf.mxu1  ;;  %v1139_v4 = vpop.f32.mrf.mxu0 }
 0x148   : > { %2567 = vst [vmem:[#allocation7_spill] sm:$0xff] %v2390_v41  ;;  %v2392_v58 = vmax.f32 %v1136_v61, 0.0  ;;  %v1138_v2 = vadd.f32 %v1137_v60, %v1085_v63  ;;  %v1087_v3 = vadd.f32 %v1086_v1, %v383_v12  ;;  %1160 = sbr.rel (%p1705_p5) target bundleno = 504 (0x1f8), region = 48 }
 0x14a   : > { %2568 = vst [vmem:[#allocation8_spill] sm:$0xff] %v2392_v58  ;;  %v2394_v6 = vmax.f32 %v1138_v2, 0.0  ;;  %v1140_v7 = vadd.f32 %v1139_v4, %v1087_v3 }
 0x14c   : > { %v2396_v8 = vmax.f32 %v1140_v7, 0.0 }
 0x14d   : > { %v1161_v62 = vlaneseq  ;;  %v1289_v10 = vmul.f32 %v2370_v9, %v2370_v9  ;;  %v1290_v11 = vmul.f32 %v2372_v15, %v2372_v15  ;;  %v1291_v13 = vmul.f32 %v2386_v50, %v2386_v50 }
 0x14e   : > { %v1292_v12 = vmul.f32 %v2388_v55, %v2388_v55  ;;  %v1285_v14 = vmul.f32 %v2366_v0, %v2366_v0  ;;  %v1286_v16 = vmul.f32 %v2368_v5, %v2368_v5  ;;  %v1287_v18 = vmul.f32 %v2382_v39, %v2382_v39 }
 0x14f   : > { %v1162_v17 = vand.u32 127, %v1161_v62  ;;  %v1288_v20 = vmul.f32 %v2384_v45, %v2384_v45  ;;  %v1297_v21 = vmul.f32 %v2378_v27, %v2378_v27  ;;  %v2419_v22 = vmul.f32 %v2380_v29, %v2380_v29 }
 0x150   : > { %v2423_v23 = vmul.f32 %v2394_v6, %v2394_v6  ;;  %v2427_v25 = vmul.f32 %v2396_v8, %v2396_v8  ;;  %v2431_v26 = vmul.f32 %v2374_v19, %v2374_v19  ;;  %v1945_v33 = vmov 0.0  }
 0x151   : > { %v1163_v28 = vadd.s32 128, %v1162_v17  ;;  %v1164_v30 = vadd.s32 256, %v1162_v17  ;;  %v1165_v31 = vadd.s32 384, %v1162_v17  ;;  %vm1220_vm2 = vcmp.lt.s32.totalorder %v1162_v17, 98 }
 0x152   : > { %v1706_v34 = vsel %vm1220_vm2, 1.0, %v1945_v33  ;;  %v1294_v35 = vmul.f32 %v2376_v24, %v2376_v24  ;;  %v1295_v32 = vmul.f32 %v2390_v41, %v2390_v41  ;;  %v1296_v36 = vmul.f32 %v2392_v58, %v2392_v58 }
 0x153   : > { %v1178_v37 = vand.u32 127, %v1163_v28  ;;  %v1185_v38 = vand.u32 127, %v1164_v30  ;;  %v1192_v40 = vand.u32 127, %v1165_v31  ;;  %v1244_v42 = vmul.f32 %v1706_v34, %v2374_v19 }
 0x154   : > { %v1236_v43 = vmul.f32 %v1706_v34, %v2366_v0  ;;  %v1248_v44 = vmul.f32 %v1706_v34, %v2378_v27  ;;  %v1240_v46 = vmul.f32 %v1706_v34, %v2370_v9  ;;  %v1305_v47 = vmul.f32 %v1706_v34, %v1289_v10 }
 0x155   : > { %vm1221_vm3 = vcmp.lt.s32.totalorder %v1178_v37, 98  ;;  %vm1222_vm4 = vcmp.lt.s32.totalorder %v1185_v38, 98  ;;  %vm1223_vm5 = vcmp.lt.s32.totalorder %v1192_v40, 98  ;;  %v1301_v48 = vmul.f32 %v1706_v34, %v1285_v14 }
 0x156   : > { %v1707_v49 = vsel %vm1221_vm3, 1.0, %v1945_v33  ;;  %v1708_v51 = vsel %vm1222_vm4, 1.0, %v1945_v33  ;;  %v1709_v52 = vsel %vm1223_vm5, 1.0, %v1945_v33  ;;  %v1313_v54 = vmul.f32 %v1706_v34, %v1297_v21 }
 0x157   : > { %v1245_v53 = vmul.f32 %v1707_v49, %v2376_v24  ;;  %v1246_v56 = vmul.f32 %v1708_v51, %v2390_v41  ;;  %v1247_v57 = vmul.f32 %v1709_v52, %v2392_v58  ;;  %v1237_v59 = vmul.f32 %v1707_v49, %v2368_v5 }
 0x158   : > { %v1238_v60 = vmul.f32 %v1708_v51, %v2382_v39  ;;  %v1239_v61 = vmul.f32 %v1709_v52, %v2384_v45  ;;  %v1249_v63 = vmul.f32 %v1707_v49, %v2380_v29  ;;  %v1250_v1 = vmul.f32 %v1708_v51, %v2394_v6 }
 0x159   : > { %v1262_v2 = vadd.f32 %v1245_v53, %v1244_v42  ;;  %v1252_v3 = vadd.f32 %v1237_v59, %v1236_v43  ;;  %v1251_v4 = vmul.f32 %v1709_v52, %v2396_v8  ;;  %v1241_v7 = vmul.f32 %v1707_v49, %v2372_v15 }
 0x15a   : > { %v1267_v62 = vadd.f32 %v1249_v63, %v1248_v44  ;;  %v1242_v10 = vmul.f32 %v1708_v51, %v2386_v50  ;;  %v1243_v14 = vmul.f32 %v1709_v52, %v2388_v55  ;;  %v1306_v17 = vmul.f32 %v1707_v49, %v1290_v11 }
 0x15b   : > { %v1263_v21 = vadd.f32 %v1262_v2, %v1246_v56  ;;  %v1253_v28 = vadd.f32 %v1252_v3, %v1238_v60  ;;  %v1257_v30 = vadd.f32 %v1241_v7, %v1240_v46  ;;  %v1307_v31 = vmul.f32 %v1708_v51, %v1291_v13  ;;  %v1281_v2 = vld [vmem:[#allocation3] sm:$0xff] }
 0x15c   : > { %v1268_v33 = vadd.f32 %v1267_v62, %v1250_v1  ;;  %v1308_v37 = vmul.f32 %v1709_v52, %v1292_v12  ;;  %v1322_v38 = vadd.f32 %v1306_v17, %v1305_v47  ;;  %v1302_v40 = vmul.f32 %v1707_v49, %v1286_v16 }
 0x15d   : > { %v1264_v42 = vadd.f32 %v1263_v21, %v1247_v57  ;;  %v1254_v43 = vadd.f32 %v1253_v28, %v1239_v61  ;;  %v1258_v53 = vadd.f32 %v1257_v30, %v1242_v10  ;;  %v1303_v59 = vmul.f32 %v1708_v51, %v1287_v18  ;;  %v1284_v10 = vld [vmem:[#allocation3 + $0x18] sm:$0xff] }
 0x15e   : > { %v1269_v41 = vadd.f32 %v1268_v33, %v1251_v4  ;;  %v1323_v58 = vadd.f32 %v1322_v38, %v1307_v31  ;;  %v1304_v44 = vmul.f32 %v1709_v52, %v1288_v20  ;;  %v1317_v63 = vadd.f32 %v1302_v40, %v1301_v48 }
 0x15f   : > { %1265 = vadd.xlane.f32.xlu1 %v1264_v42  ;;  %1255 = vadd.xlane.f32.xlu0 %v1254_v43  ;;  %v1259_v19 = vadd.f32 %v1258_v53, %v1243_v14  ;;  %v1314_v11 = vmul.f32 %v1707_v49, %v2419_v22  ;;  %v1315_v46 = vmul.f32 %v1708_v51, %v2423_v23  ;;  %vm1276_vm6 = vcmask 7168   ;;  %v1283_v14 = vld [vmem:[#allocation3 + $0x10] sm:$0xff] }
 0x160   : > { %v1318_v13 = vadd.f32 %v1317_v63, %v1303_v59  ;;  %v1309_v12 = vmul.f32 %v1706_v34, %v2431_v26  ;;  %v1310_v16 = vmul.f32 %v1707_v49, %v1294_v35  ;;  %v1311_v56 = vmul.f32 %v1708_v51, %v1295_v32  ;;  %v1234_v26 = vld [vmem:[#allocation2 + $0x10] sm:$0xff]  ;;  %v1232_v34 = vld [vmem:[#allocation2] sm:$0xff] }
 0x161   : > { %v1332_v47 = vadd.f32 %v1314_v11, %v1313_v54  ;;  %v1324_v57 = vadd.f32 %v1323_v58, %v1308_v37  ;;  %v1316_v18 = vmul.f32 %v1709_v52, %v2427_v25  ;;  %v1312_v60 = vmul.f32 %v1709_v52, %v1296_v36  ;;  %v1235_v36 = vld [vmem:[#allocation2 + $0x18] sm:$0xff]  ;;  %v1282_v54 = vld [vmem:[#allocation3 + $0x8] sm:$0xff] }
 0x162   : > { %v1319_v20 = vadd.f32 %v1318_v13, %v1304_v44  ;;  %v1327_v61 = vadd.f32 %v1310_v16, %v1309_v12 }
 0x163   : > { %1270 = vadd.xlane.f32.xlu1 %v1269_v41  ;;  %1260 = vadd.xlane.f32.xlu0 %v1259_v19  ;;  %v1333_v48 = vadd.f32 %v1332_v47, %v1315_v46  ;;  %v1233_v41 = vld [vmem:[#allocation2 + $0x8] sm:$0xff] }
 0x164   : > { %v1328_v1 = vadd.f32 %v1327_v61, %v1311_v56 }
 0x165   : > { %v1334_v22 = vadd.f32 %v1333_v48, %v1316_v18 }
 0x166   : > { %v1329_v23 = vadd.f32 %v1328_v1, %v1312_v60 }
 0x167   : > { %1325 = vadd.xlane.f32.xlu1 %v1324_v57  ;;  %1320 = vadd.xlane.f32.xlu0 %v1319_v20 }
 0x16b   : > { %1335 = vadd.xlane.f32.xlu1 %v1334_v22  ;;  %1330 = vadd.xlane.f32.xlu0 %v1329_v23 }
 0x1e8   : > { %v1266_v35 = vpop.xlane.xlu1 %1265  ;;  %v1256_v58 = vpop.xlane.xlu0 %1255 }
 0x1e9   : > { %v1274_v32 = vadd.f32 %v1266_v35, %v1234_v26  ;;  %v1272_v25 = vadd.f32 %v1256_v58, %v1232_v34 }
 0x1eb   : > { %1279 = vst.msk [vmem:[#allocation2 + $0x10] sm:$0xff] %vm1276_vm6, %v1274_v32  ;;  %1277 = vst.msk [vmem:[#allocation2] sm:$0xff] %vm1276_vm6, %v1272_v25 }
 0x1ec   : > { %v1271_v19 = vpop.xlane.xlu1 %1270  ;;  %v1261_v49 = vpop.xlane.xlu0 %1260 }
 0x1ed   : > { %v1275_v51 = vadd.f32 %v1271_v19, %v1235_v36  ;;  %v1273_v52 = vadd.f32 %v1261_v49, %v1233_v41 }
 0x1ef   : > { %1280 = vst.msk [vmem:[#allocation2 + $0x18] sm:$0xff] %vm1276_vm6, %v1275_v51  ;;  %1278 = vst.msk [vmem:[#allocation2 + $0x8] sm:$0xff] %vm1276_vm6, %v1273_v52 }
 0x1f0   : > { %v1326_v3 = vpop.xlane.xlu1 %1325  ;;  %v1321_v4 = vpop.xlane.xlu0 %1320 }
 0x1f1   : > { %v1338_v7 = vadd.f32 %v1326_v3, %v1282_v54  ;;  %v1337_v62 = vadd.f32 %v1321_v4, %v1281_v2 }
 0x1f3   : > { %1342 = vst.msk [vmem:[#allocation3 + $0x8] sm:$0xff] %vm1276_vm6, %v1338_v7  ;;  %1341 = vst.msk [vmem:[#allocation3] sm:$0xff] %vm1276_vm6, %v1337_v62 }
 0x1f4   : > { %v1336_v17 = vpop.xlane.xlu1 %1335  ;;  %v1331_v21 = vpop.xlane.xlu0 %1330 }
 0x1f5   : > { %v1340_v28 = vadd.f32 %v1336_v17, %v1284_v10  ;;  %v1339_v30 = vadd.f32 %v1331_v21, %v1283_v14 }
 0x1f7   : > { %1344 = vst.msk [vmem:[#allocation3 + $0x18] sm:$0xff] %vm1276_vm6, %v1340_v28  ;;  %1343 = vst.msk [vmem:[#allocation3 + $0x10] sm:$0xff] %vm1276_vm6, %v1339_v30 }
 0x1f8 PF: > { %p1345_p6 = scmp.eq.s32.totalorder %s1933_s18, 1 }
 0x1f9   : > { %v1350_v31 = vld [vmem:[#allocation2] sm:$0xff] (%p1345_p6)  ;;  %v1351_v40 = vld [vmem:[#allocation2 + $0x8] sm:$0xff] (%p1345_p6)  ;;  %v1352_v59 = vld [vmem:[#allocation2 + $0x10] sm:$0xff] (%p1345_p6)  ;;  %vm1390_vm7 = vcmask (%p1345_p6), 7168  }
 0x1fa   : > { %1349 = sbr.rel (!%p1345_p6) target bundleno = 539 (0x21b), region = 52  ;;  %v1358_v33 = vld [vmem:[#allocation3] sm:$0xff] (%p1345_p6)  ;;  %v1354_v37 = vmul.f32 (%p1345_p6), 0.0025510204, %v1350_v31  ;;  %v1359_v42 = vld [vmem:[#allocation3 + $0x8] sm:$0xff] (%p1345_p6)  ;;  %v1353_v46 = vld [vmem:[#allocation2 + $0x18] sm:$0xff] (%p1345_p6) }
 0x1fb   : > { %v1362_v38 = vmul.f32 (%p1345_p6), 0.0025510204, %v1358_v33  ;;  %v1355_v43 = vmul.f32 (%p1345_p6), 0.0025510204, %v1351_v40  ;;  %v1363_v53 = vmul.f32 (%p1345_p6), 0.0025510204, %v1359_v42 }
 0x1fc   : > { %v1366_v44 = vmul.f32 (%p1345_p6), %v1354_v37, %v1354_v37  ;;  %v1356_v63 = vmul.f32 (%p1345_p6), 0.0025510204, %v1352_v59  ;;  %v1357_v47 = vmul.f32 (%p1345_p6), 0.0025510204, %v1353_v46  ;;  %v1374_v34 = vld [vmem:[%s2557_s3] sm:$0xff] (%p1345_p6)  ;;  %v1375_v35 = vld [vmem:[%s2557_s3 + $0x8] sm:$0xff] (%p1345_p6) }
 0x1fd   : > { %v1367_v13 = vmul.f32 (%p1345_p6), %v1355_v43, %v1355_v43  ;;  %v1376_v32 = vld [vmem:[%s2557_s3 + $0x10] sm:$0xff] (%p1345_p6)  ;;  %v1377_v41 = vld [vmem:[%s2557_s3 + $0x18] sm:$0xff] (%p1345_p6)  ;;  %v1395_v51 = vld [vmem:[%s2558_s4] sm:$0xff] (%p1345_p6) }
 0x1fe   : > { %v1360_v11 = vld [vmem:[#allocation3 + $0x10] sm:$0xff] (%p1345_p6)  ;;  %v1361_v16 = vld [vmem:[#allocation3 + $0x18] sm:$0xff] (%p1345_p6)  ;;  %v1370_v56 = vsub.f32 (%p1345_p6), %v1362_v38, %v1366_v44  ;;  %v1368_v57 = vmul.f32 (%p1345_p6), %v1356_v63, %v1356_v63  ;;  %v1369_v20 = vmul.f32 (%p1345_p6), %v1357_v47, %v1357_v47  ;;  %v1396_v3 = vld [vmem:[%s2558_s4 + $0x8] sm:$0xff] (%p1345_p6) }
 0x1ff   : > { %v1364_v12 = vmul.f32 0.0025510204, %v1360_v11  ;;  %v1365_v18 = vmul.f32 0.0025510204, %v1361_v16  ;;  %v1371_v60 = vsub.f32 %v1363_v53, %v1367_v13  ;;  %v1397_v62 = vld [vmem:[%s2558_s4 + $0x10] sm:$0xff]  ;;  %v1398_v17 = vld [vmem:[%s2558_s4 + $0x18] sm:$0xff] }
 0x200   : > { %v1378_v48 = vadd.f32 1e-05, %v1370_v56 }
 0x201   : > { %v1372_v61 = vsub.f32 %v1364_v12, %v1368_v57  ;;  %v1379_v1 = vadd.f32 1e-05, %v1371_v60  ;;  %v1373_v22 = vsub.f32 %v1365_v18, %v1369_v20 }
 0x202   : > { %1909 = vrsqrt.f32 %v1378_v48 }
 0x203   : > { %v1380_v23 = vadd.f32 1e-05, %v1372_v61  ;;  %1911 = vrsqrt.f32 %v1379_v1  ;;  %v1381_v26 = vadd.f32 1e-05, %v1373_v22 }
 0x205   : > { %1913 = vrsqrt.f32 %v1380_v23 }
 0x206   : > { %1915 = vrsqrt.f32 %v1381_v26 }
 0x20f   : > { %v1910_v58 = vpop.eup %1909 }
 0x210   : > { %v1912_v25 = vpop.eup %1911  ;;  %v1386_v36 = vmul.f32 %v1910_v58, %v1374_v34 }
 0x211   : > { %v1387_v49 = vmul.f32 %v1912_v25, %v1375_v35 }
 0x212   : > { %v1914_v19 = vpop.eup %1913  ;;  %1391 = vst.msk [vmem:[#allocation4] sm:$0xff] %vm1390_vm7, %v1386_v36  ;;  %v1399_v2 = vmul.f32 %v1386_v36, %v1354_v37 }
 0x213   : > { %v1916_v52 = vpop.eup %1915  ;;  %v1388_v54 = vmul.f32 %v1914_v19, %v1376_v32  ;;  %1392 = vst.msk [vmem:[#allocation4 + $0x8] sm:$0xff] %vm1390_vm7, %v1387_v49  ;;  %v1400_v7 = vmul.f32 %v1387_v49, %v1355_v43 }
 0x214   : > { %v1389_v4 = vmul.f32 %v1916_v52, %v1377_v41  ;;  %v1403_v10 = vsub.f32 %v1395_v51, %v1399_v2 }
 0x215   : > { %1393 = vst.msk [vmem:[#allocation4 + $0x10] sm:$0xff] %vm1390_vm7, %v1388_v54  ;;  %v1401_v14 = vmul.f32 %v1388_v54, %v1356_v63  ;;  %v1404_v21 = vsub.f32 %v1396_v3, %v1400_v7 }
 0x216   : > { %1394 = vst.msk [vmem:[#allocation4 + $0x18] sm:$0xff] %vm1390_vm7, %v1389_v4  ;;  %v1402_v28 = vmul.f32 %v1389_v4, %v1357_v47  ;;  %1407 = vst.msk [vmem:[#allocation5] sm:$0xff] %vm1390_vm7, %v1403_v10 }
 0x217   : > { %v1405_v30 = vsub.f32 %v1397_v62, %v1401_v14  ;;  %1408 = vst.msk [vmem:[#allocation5 + $0x8] sm:$0xff] %vm1390_vm7, %v1404_v21 }
 0x218   : > { %v1406_v31 = vsub.f32 %v1398_v17, %v1402_v28 }
 0x219   : > { %1409 = vst.msk [vmem:[#allocation5 + $0x10] sm:$0xff] %vm1390_vm7, %v1405_v30 }
 0x21a   : > { %1410 = vst.msk [vmem:[#allocation5 + $0x18] sm:$0xff] %vm1390_vm7, %v1406_v31 }
 0x21b PF: > { %p1711_p7 = scmp.ne.s32.totalorder %s1933_s18, 1 }
 0x21d   : > { %1413 = sbr.rel (%p1711_p7) target bundleno = 696 (0x2b8), region = 56 }
 0x222   : > { %v1440_v33 = vld [vmem:[#allocation4 + $0x10] sm:$0xff]  ;;  %v1438_v37 = vld [vmem:[#allocation4] sm:$0xff]  ;;  %v1441_v38 = vld [vmem:[#allocation4 + $0x18] sm:$0xff]  ;;  %v1946_v40 = vmov 0   ;;  %v1415_v57 = vmax.f32 %v2370_v9, %v2372_v15  ;;  %v1419_v18 = vmax.f32 %v2386_v50, %v2388_v55  ;;  %v1427_v60 = vmin.f32 %v2370_v9, %v2372_v15 }
 0x223   : > { %1918 = vset.pattern.permute.xlu1 %v1946_v40  ;;  %1917 = vset.pattern.permute.xlu0 %v1946_v40  ;;  %vm1444_vm8 = vcmp.gt.f32.partialorder %v1440_v33, 0.0  ;;  %vm1442_vm9 = vcmp.gt.f32.partialorder %v1438_v37, 0.0  ;;  %vm1445_vm10 = vcmp.gt.f32.partialorder %v1441_v38, 0.0  ;;  %v1439_v42 = vld [vmem:[#allocation4 + $0x8] sm:$0xff]  ;;  %v1494_v11 = vld [vmem:[#allocation5] sm:$0xff]  ;;  %v1497_v46 = vld [vmem:[#allocation5 + $0x18] sm:$0xff]  ;;  %v1431_v20 = vmin.f32 %v2386_v50, %v2388_v55 }
 0x224   : > { %v1448_v43 = vsel %vm1444_vm8, 1, %v1946_v40  ;;  %v1446_v53 = vsel %vm1442_vm9, 1, %v1946_v40  ;;  %vm1443_vm11 = vcmp.gt.f32.partialorder %v1439_v42, 0.0  ;;  %v1449_v59 = vsel %vm1445_vm10, 1, %v1946_v40  ;;  %v1495_v63 = vld [vmem:[#allocation5 + $0x8] sm:$0xff]  ;;  %v1496_v13 = vld [vmem:[#allocation5 + $0x10] sm:$0xff] }
 0x225   : > { %1457 = vperm.xlu1 %1918, %v1448_v43   ;;  %1451 = vperm.xlu0 %1917, %v1446_v53   ;;  %v1447_v44 = vsel %vm1443_vm11, 1, %v1946_v40  ;;  %v1414_v48 = vmax.f32 %v2366_v0, %v2368_v5  ;;  %v1418_v61 = vmax.f32 %v2382_v39, %v2384_v45  ;;  %v1426_v1 = vmin.f32 %v2366_v0, %v2368_v5  ;;  %v2569_v5 = vld [vmem:[#allocation6_spill] sm:$0xff]  ;;  %v2570_v58 = vld [vmem:[#allocation8_spill] sm:$0xff]  ;;  %v2571_v32 = vld [vmem:[#allocation7_spill] sm:$0xff] }
 0x226   : > { %v1430_v22 = vmin.f32 %v2382_v39, %v2384_v45  ;;  %v1423_v26 = vmax.f32 %v1415_v57, %v1419_v18  ;;  %v1435_v34 = vmin.f32 %v1427_v60, %v1431_v20  ;;  %v1417_v9 = vmax.f32 %v2378_v27, %v2380_v29 }
 0x227   : > { %v1421_v15 = vmax.f32 %v2394_v6, %v2396_v8  ;;  %v1422_v50 = vmax.f32 %v1414_v48, %v1418_v61  ;;  %v1429_v55 = vmin.f32 %v2378_v27, %v2380_v29  ;;  %v1433_v0 = vmin.f32 %v2394_v6, %v2396_v8 }
 0x228   : > { %v1416_v39 = vmax.f32 %v2569_v5, %v2376_v24  ;;  %v1434_v45 = vmin.f32 %v1426_v1, %v1430_v22  ;;  %v1420_v25 = vmax.f32 %v2571_v32, %v2570_v58  ;;  %v1428_v36 = vmin.f32 %v2569_v5, %v2376_v24 }
 0x229   : > { %1460 = vperm.xlu1 %1918, %v1449_v59   ;;  %1454 = vperm.xlu0 %1917, %v1447_v44   ;;  %v1432_v41 = vmin.f32 %v2571_v32, %v2570_v58  ;;  %v1425_v29 = vmax.f32 %v1417_v9, %v1421_v15  ;;  %v1437_v49 = vmin.f32 %v1429_v55, %v1433_v0 }
 0x22a   : > { %v1424_v51 = vmax.f32 %v1416_v39, %v1420_v25 }
 0x22b   : > { %v1436_v52 = vmin.f32 %v1428_v36, %v1432_v41 }
 0x22d   : > { %1477 = vperm.xlu1 %1918, %v1439_v42   ;;  %1472 = vperm.xlu0 %1917, %v1438_v37  }
 0x231   : > { %1487 = vperm.xlu1 %1918, %v1441_v38   ;;  %1482 = vperm.xlu0 %1917, %v1440_v33  }
 0x235   : > { %1505 = vperm.xlu1 %1918, %v1495_v63   ;;  %1500 = vperm.xlu0 %1917, %v1494_v11  }
 0x239   : > { %1515 = vperm.xlu1 %1918, %v1497_v46   ;;  %1510 = vperm.xlu0 %1917, %v1496_v13  }
 0x2a0   : > { %v1458_v12 = vpop.permute.xlu1 %1457  ;;  %v1452_v47 = vpop.permute.xlu0 %1451 }
 0x2a1   : > { %vm1462_vm12 = vcmp.eq.s32.totalorder %v1452_v47, 1  ;;  %vm1464_vm14 = vcmp.eq.s32.totalorder %v1458_v12, 1 }
 0x2a2   : > { %v1466_v8 = vsel %vm1462_vm12, %v1422_v50, %v1434_v45  ;;  %v1468_v10 = vsel %vm1464_vm14, %v1424_v51, %v1436_v52 }
 0x2a4   : > { %v1461_v16 = vpop.permute.xlu1 %1460  ;;  %v1455_v56 = vpop.permute.xlu0 %1454 }
 0x2a5   : > { %vm1463_vm13 = vcmp.eq.s32.totalorder %v1455_v56, 1  ;;  %vm1465_vm15 = vcmp.eq.s32.totalorder %v1461_v16, 1 }
 0x2a6   : > { %v1467_v6 = vsel %vm1463_vm13, %v1423_v26, %v1435_v34  ;;  %v1469_v62 = vsel %vm1465_vm15, %v1425_v29, %v1437_v49 }
 0x2a8   : > { %v1478_v23 = vpop.permute.xlu1 %1477  ;;  %v1473_v35 = vpop.permute.xlu0 %1472 }
 0x2a9   : > { %v1491_v54 = vmul.f32 %v1478_v23, %v1467_v6  ;;  %v1490_v2 = vmul.f32 %v1473_v35, %v1466_v8 }
 0x2ac   : > { %v1488_v19 = vpop.permute.xlu1 %1487  ;;  %v1483_v27 = vpop.permute.xlu0 %1482 }
 0x2ad   : > { %v1493_v14 = vmul.f32 %v1488_v19, %v1469_v62  ;;  %v1492_v17 = vmul.f32 %v1483_v27, %v1468_v10 }
 0x2b0   : > { %v1506_v3 = vpop.permute.xlu1 %1505  ;;  %v1501_v4 = vpop.permute.xlu0 %1500 }
 0x2b1   : > { %v1519_v24 = vadd.f32 %v1506_v3, %v1491_v54  ;;  %v1518_v7 = vadd.f32 %v1501_v4, %v1490_v2 }
 0x2b3   : > { %1523 = vst [vmem:[%s2559_s5 + $0x8] sm:$0xff] %v1519_v24  ;;  %1522 = vst [vmem:[%s2559_s5] sm:$0xff] %v1518_v7 }
 0x2b4   : > { %v1516_v21 = vpop.permute.xlu1 %1515  ;;  %v1511_v28 = vpop.permute.xlu0 %1510 }
 0x2b5   : > { %v1521_v30 = vadd.f32 %v1516_v21, %v1493_v14  ;;  %v1520_v31 = vadd.f32 %v1511_v28, %v1492_v17 }
 0x2b7   : > { %1525 = vst [vmem:[%s2559_s5 + $0x18] sm:$0xff] %v1521_v30  ;;  %1524 = vst [vmem:[%s2559_s5 + $0x10] sm:$0xff] %v1520_v31 }
 0x2b8 PF: > { %s15_s20 = sadd.s32 1, %s1941_s20   ;;  %s2572_s18 = smov %s1937_s19 }
 0x2b9   : > { %p12_p8 = scmp.ge.s32.totalorder %s15_s20, 4   ;;  %s2573_s19 = smov %s2575_s21 }
 0x2bb   :  { %14 = sbr.rel (!%p12_p8) target bundleno = 2 (0x2), region = 86 }

</bundles_post_ra>
